<compile_context>
chip_gen: v6e
topology: v6e:2x2x1
jax: 0.10.0
libtpu: 0.0.40
codegen_flags: <defaults>
</compile_context>

<pallas_src>
import jax
import jax.numpy as jnp
from jax.experimental import pallas as pl
from jax.experimental.pallas import tpu as pltpu


def _vmem_limit_bytes():
    """Per-generation scoped-VMEM request (v5e/v6e: ~96 MiB, v7x: ~48 MiB)."""
    cap = 128 * 1024 * 1024
    try:
        info = pltpu.get_tpu_info()
        cap = int(getattr(info, "vmem_capacity_bytes", cap))
    except Exception:
        pass
    return int(min(96 * 1024 * 1024, max(32 * 1024 * 1024, (cap * 3) // 4)))


def _pick_row_tile(n, h, w, c, cmid, budget_bytes):
    """Largest row tile TR (divisor of H) fitting the VMEM budget with grid >= 2."""
    # x block + out block (double buffered, f32) + f32 acc + bf16 mid slab & taps.
    per_row = w * c * 4 * 5 + w * cmid * 2 * 5
    divisors = [d for d in range(h, 0, -1) if h % d == 0]
    fitting = [d for d in divisors if d * per_row <= budget_bytes] or [divisors[-1]]
    for prefer_packed in (True, False):          # prefer TR*W multiple of 16 (bf16 sublanes)
        for d in fitting:
            if n * (h // d) < 2:                 # keep >= 2 grid steps for megacore
                continue
            if prefer_packed and (d * w) % 16 != 0:
                continue
            return d
    return fitting[0]


@jax.jit
def residual_layer(x_nchw, w1, g1, b1, rm1, rv1, w2, g2, b2, rm2, rv2, eps=1e-5):
    """Forward pass of ResidualLayer.  x_nchw: [N, C, H, W] float32."""
    n, c, h, w = x_nchw.shape
    cmid = w1.shape[0]                            # C // 2

    # ---- fold BN scale into conv weights (shift remains a per-channel add) ----
    scale1 = g1 / jnp.sqrt(rv1 + eps)
    shift1 = (b1 - rm1 * scale1).reshape(1, cmid).astype(jnp.float32)
    w1_mat = (w1.reshape(cmid, c).T * scale1[None, :]).astype(jnp.bfloat16)       # [C, Cmid]

    scale2 = g2 / jnp.sqrt(rv2 + eps)
    shift2 = (b2 - rm2 * scale2).reshape(1, c).astype(jnp.float32)
    w2_mat = (jnp.transpose(w2, (2, 3, 1, 0)) * scale2).reshape(9, cmid, c)        # [9,Cmid,C]
    w2_mat = w2_mat.astype(jnp.bfloat16)

    # ---- flat NHWC view of the activations ------------------------------------
    # TODO(synk): keep activations NHWC end-to-end at the model level.
    x_flat = jnp.transpose(x_nchw, (0, 2, 3, 1)).reshape(n * h * w, c)
    x_flat = x_flat.astype(jnp.float32)

    vmem_limit = _vmem_limit_bytes()
    resident_bytes = (9 * cmid * c + c * cmid) * 2 + (c + cmid) * 4
    budget = int(vmem_limit * 0.6) - 4 * resident_bytes
    tr = _pick_row_tile(n, h, w, c, cmid, budget)
    nblk = h // tr
    trw = tr * w
    slab_rows = (tr + 2) * w + 2     # halo row above + TR rows + halo row below + 2 guard px

    def kernel(xc_ref, xu_ref, xd_ref, w1_ref, s1_ref, w2_ref, s2_ref, o_ref, mid_ref):
        i = pl.program_id(1)
        w1b = w1_ref[...]
        s1b = s1_ref[...]

        def conv1(rows_f32):
            acc = jnp.dot(rows_f32.astype(jnp.bfloat16), w1b,
                          preferred_element_type=jnp.float32)
            y = acc + s1b
            return jnp.maximum(y, 0.1 * y).astype(jnp.bfloat16)     # LeakyReLU(0.1)

        xc = xc_ref[...]                                  # [TR*W, C] f32 (also the residual)
        keep_up = (i > 0).astype(jnp.bfloat16)            # mid row -1 is zero-padding at top
        keep_dn = (i < nblk - 1).astype(jnp.bfloat16)     # mid row TR is zero-padding at bottom
        m_up = conv1(xu_ref[...]) * keep_up               # [W,  Cmid]
        m_dn = conv1(xd_ref[...]) * keep_dn               # [W,  Cmid]
        m_cn = conv1(xc)                                  # [TRW, Cmid]

        zrow = jnp.zeros((1, cmid), jnp.bfloat16)
        mid_ref[pl.ds(0, 1), :] = zrow                    # guard pixel left of halo row -1
        mid_ref[pl.ds(1, w), :] = m_up
        mid_ref[pl.ds(1 + w, trw), :] = m_cn
        mid_ref[pl.ds(1 + w + trw, w), :] = m_dn
        mid_ref[pl.ds(slab_rows - 1, 1), :] = zrow        # guard pixel right of halo row TR

        # Flat +-1 column shifts wrap across image rows; mask those taps to zero.
        col = jax.lax.broadcasted_iota(jnp.int32, (trw, 1), 0) % w
        not_left = col != 0
        not_right = col != (w - 1)

        acc = jnp.zeros((trw, c), jnp.float32)
        for k in range(9):                                # 3x3 taps, k = kh*3 + kw
            kh, kw = k // 3, k % 3
            tap = mid_ref[pl.ds(kh * w + kw, trw), :]     # mid at (row+kh-1, col+kw-1)
            if kw == 0:
                tap = jnp.where(not_left, tap, jnp.zeros_like(tap))
            elif kw == 2:
                tap = jnp.where(not_right, tap, jnp.zeros_like(tap))
            acc = acc + jnp.dot(tap, w2_ref[k], preferred_element_type=jnp.float32)

        y = acc + s2_ref[...]
        y = jnp.maximum(y, 0.1 * y)                       # LeakyReLU(0.1)
        o_ref[...] = (y + xc).astype(o_ref.dtype)         # fused residual add

    def resident(shape):                                  # weights/shifts: single-buffered
        return pl.BlockSpec(shape, lambda b, i: (0,) * len(shape),
                            pipeline_mode=pl.Buffered(1))

    out_flat = pl.pallas_call(
        kernel,
        out_shape=jax.ShapeDtypeStruct((n * h * w, c), jnp.float32),
        grid_spec=pltpu.PrefetchScalarGridSpec(
            num_scalar_prefetch=0,
            grid=(n, nblk),
            in_specs=[
                pl.BlockSpec((trw, c), lambda b, i: (b * nblk + i, 0)),      # x row block
                pl.BlockSpec((w, c),                                          # halo row above
                             lambda b, i: (b * h + jnp.maximum(i * tr - 1, 0), 0)),
                pl.BlockSpec((w, c),                                          # halo row below
                             lambda b, i: (b * h + jnp.minimum(i * tr + tr, h - 1), 0)),
                resident((c, cmid)),          # w1 (BN scale folded)
                resident((1, cmid)),          # shift1
                resident((9, cmid, c)),       # w2 (BN scale folded), per-tap matrices
                resident((1, c)),             # shift2
            ],
            out_specs=pl.BlockSpec((trw, c), lambda b, i: (b * nblk + i, 0)),
            scratch_shapes=[pltpu.VMEM((slab_rows, cmid), jnp.bfloat16)],
        ),
        compiler_params=pltpu.CompilerParams(
            dimension_semantics=("parallel", "parallel"),
            vmem_limit_bytes=vmem_limit),
    )(x_flat, x_flat, x_flat, w1_mat, shift1, w2_mat, shift2)

    out_nhwc = out_flat.reshape(n, h, w, c)
    return jnp.transpose(out_nhwc, (0, 3, 1, 2))          # back to NCHW


# ------------------------------ reference ------------------------------------

def _reference(x, w1, g1, b1, rm1, rv1, w2, g2, b2, rm2, rv2, eps=1e-5):
    def conv_bn_lrelu(inp, wt, g, b, mean, var, pad):
        conv = jax.lax.conv_general_dilated(
            inp.astype(jnp.float32), wt.astype(jnp.float32),
            window_strides=(1, 1), padding=((pad, pad), (pad, pad)),
            dimension_numbers=("NCHW", "OIHW", "NCHW"))
        scale = (g / jnp.sqrt(var + eps)).reshape(1, -1, 1, 1)
        shift = (b - mean * g / jnp.sqrt(var + eps)).reshape(1, -1, 1, 1)
        y = conv * scale + shift
        return jnp.where(y >= 0, y, 0.1 * y)

    y = conv_bn_lrelu(x, w1, g1, b1, rm1, rv1, 0)
    y = conv_bn_lrelu(y, w2, g2, b2, rm2, rv2, 1)
    return x + y


if __name__ == "__main__":
    N, C, H, W = 2, 4, 16, 16
    CMID = C // 2

    key = jax.random.PRNGKey(0)
    keys = jax.random.split(key, 11)

    x = jax.random.normal(keys[0], (N, C, H, W), dtype=jnp.float32)
    w1 = 0.1 * jax.random.normal(keys[1], (CMID, C, 1, 1), dtype=jnp.float32)
    g1 = 1.0 + 0.1 * jax.random.normal(keys[2], (CMID,), dtype=jnp.float32)
    b1 = 0.1 * jax.random.normal(keys[3], (CMID,), dtype=jnp.float32)
    rm1 = 0.1 * jax.random.normal(keys[4], (CMID,), dtype=jnp.float32)
    rv1 = jnp.abs(1.0 + 0.1 * jax.random.normal(keys[5], (CMID,), dtype=jnp.float32))
    w2 = 0.1 * jax.random.normal(keys[6], (C, CMID, 3, 3), dtype=jnp.float32)
    g2 = 1.0 + 0.1 * jax.random.normal(keys[7], (C,), dtype=jnp.float32)
    b2 = 0.1 * jax.random.normal(keys[8], (C,), dtype=jnp.float32)
    rm2 = 0.1 * jax.random.normal(keys[9], (C,), dtype=jnp.float32)
    rv2 = jnp.abs(1.0 + 0.1 * jax.random.normal(keys[10], (C,), dtype=jnp.float32))

    out = residual_layer(x, w1, g1, b1, rm1, rv1, w2, g2, b2, rm2, rv2)
    out = jax.block_until_ready(out)

    ref = _reference(x, w1, g1, b1, rm1, rv1, w2, g2, b2, rm2, rv2)
    assert out.shape == (N, C, H, W), out.shape
    max_err = float(jnp.max(jnp.abs(out - ref)))
    # bf16 matmul operands + bf16 intermediate => loosened tolerance vs f32 ref.
    assert jnp.allclose(out, ref, atol=3e-2, rtol=3e-2), max_err

    print("KERNEL_OK")
</pallas_src>

<mosaic_0001>
module attributes {stable_mosaic.version = 11 : i64} {
  func.func @kernel(%arg0: i32, %arg1: i32, %arg2: memref<256x4xf32, #tpu.memory_space<vmem>>, %arg3: memref<16x4xf32, #tpu.memory_space<vmem>>, %arg4: memref<16x4xf32, #tpu.memory_space<vmem>>, %arg5: memref<4x2xbf16, #tpu.memory_space<vmem>>, %arg6: memref<1x2xf32, #tpu.memory_space<vmem>>, %arg7: memref<9x2x4xbf16, #tpu.memory_space<vmem>>, %arg8: memref<1x4xf32, #tpu.memory_space<vmem>>, %arg9: memref<256x4xf32, #tpu.memory_space<vmem>>, %arg10: memref<290x2xbf16, #tpu.memory_space<vmem>>) attributes {dimension_semantics = [#tpu.dimension_semantics<parallel>, #tpu.dimension_semantics<parallel>], iteration_bounds = array<i64: 2, 1>, scalar_prefetch = 0 : i64, scratch_operands = 1 : i64, tpu.core_type = #tpu.core_type<tc>, window_params = [{transform_indices = @transform_0, window_bounds = array<i64: 256, 4>}, {transform_indices = @transform_1, window_bounds = array<i64: 16, 4>}, {transform_indices = @transform_2, window_bounds = array<i64: 16, 4>}, {pipeline_mode = #tpu.pipeline_mode<synchronous>, transform_indices = @transform_3, window_bounds = array<i64: 4, 2>}, {pipeline_mode = #tpu.pipeline_mode<synchronous>, transform_indices = @transform_4, window_bounds = array<i64: 1, 2>}, {pipeline_mode = #tpu.pipeline_mode<synchronous>, transform_indices = @transform_5, window_bounds = array<i64: 9, 2, 4>}, {pipeline_mode = #tpu.pipeline_mode<synchronous>, transform_indices = @transform_6, window_bounds = array<i64: 1, 4>}, {transform_indices = @transform_7, window_bounds = array<i64: 256, 4>}]} {
    %c0 = arith.constant 0 : index
    %c0_0 = arith.constant 0 : index
    %0 = vector.load %arg5[%c0, %c0_0] : memref<4x2xbf16, #tpu.memory_space<vmem>>, vector<4x2xbf16>
    %c0_1 = arith.constant 0 : index
    %c0_2 = arith.constant 0 : index
    %1 = vector.load %arg6[%c0_1, %c0_2] : memref<1x2xf32, #tpu.memory_space<vmem>>, vector<1x2xf32>
    %c0_3 = arith.constant 0 : index
    %c0_4 = arith.constant 0 : index
    %2 = vector.load %arg2[%c0_3, %c0_4] : memref<256x4xf32, #tpu.memory_space<vmem>>, vector<256x4xf32>
    %c0_i32 = arith.constant 0 : i32
    %3 = arith.cmpi sgt, %arg1, %c0_i32 : i32
    %4 = arith.extui %3 : i1 to i32
    %5 = arith.sitofp %4 : i32 to f32
    %6 = arith.truncf %5 : f32 to bf16
    %c0_i32_5 = arith.constant 0 : i32
    %7 = arith.cmpi slt, %arg1, %c0_i32_5 : i32
    %8 = arith.extui %7 : i1 to i32
    %9 = arith.sitofp %8 : i32 to f32
    %10 = arith.truncf %9 : f32 to bf16
    %c0_6 = arith.constant 0 : index
    %c0_7 = arith.constant 0 : index
    %11 = vector.load %arg3[%c0_6, %c0_7] : memref<16x4xf32, #tpu.memory_space<vmem>>, vector<16x4xf32>
    %12 = arith.truncf %11 : vector<16x4xf32> to vector<16x4xbf16>
    %cst = arith.constant dense<0.000000e+00> : vector<16x2xf32>
    %13 = tpu.matmul %12, %0, %cst {dimension_numbers = #tpu.dot_dimension_numbers<[1], [0], [0], [1], [0, 0, 1, 1], [], []>} : vector<16x4xbf16>, vector<4x2xbf16>, vector<16x2xf32> -> vector<16x2xf32>
    %14 = vector.broadcast %1 : vector<1x2xf32> to vector<16x2xf32>
    %15 = arith.addf %13, %14 : vector<16x2xf32>
    %cst_8 = arith.constant 1.000000e-01 : f32
    %16 = vector.broadcast %cst_8 : f32 to vector<16x2xf32>
    %17 = arith.mulf %16, %15 : vector<16x2xf32>
    %18 = arith.maximumf %15, %17 : vector<16x2xf32>
    %19 = arith.truncf %18 : vector<16x2xf32> to vector<16x2xbf16>
    %20 = vector.broadcast %6 : bf16 to vector<16x2xbf16>
    %21 = arith.mulf %19, %20 : vector<16x2xbf16>
    %c0_9 = arith.constant 0 : index
    %c0_10 = arith.constant 0 : index
    %22 = vector.load %arg4[%c0_9, %c0_10] : memref<16x4xf32, #tpu.memory_space<vmem>>, vector<16x4xf32>
    %23 = arith.truncf %22 : vector<16x4xf32> to vector<16x4xbf16>
    %cst_11 = arith.constant dense<0.000000e+00> : vector<16x2xf32>
    %24 = tpu.matmul %23, %0, %cst_11 {dimension_numbers = #tpu.dot_dimension_numbers<[1], [0], [0], [1], [0, 0, 1, 1], [], []>} : vector<16x4xbf16>, vector<4x2xbf16>, vector<16x2xf32> -> vector<16x2xf32>
    %25 = vector.broadcast %1 : vector<1x2xf32> to vector<16x2xf32>
    %26 = arith.addf %24, %25 : vector<16x2xf32>
    %cst_12 = arith.constant 1.000000e-01 : f32
    %27 = vector.broadcast %cst_12 : f32 to vector<16x2xf32>
    %28 = arith.mulf %27, %26 : vector<16x2xf32>
    %29 = arith.maximumf %26, %28 : vector<16x2xf32>
    %30 = arith.truncf %29 : vector<16x2xf32> to vector<16x2xbf16>
    %31 = vector.broadcast %10 : bf16 to vector<16x2xbf16>
    %32 = arith.mulf %30, %31 : vector<16x2xbf16>
    %33 = arith.truncf %2 : vector<256x4xf32> to vector<256x4xbf16>
    %cst_13 = arith.constant dense<0.000000e+00> : vector<256x2xf32>
    %34 = tpu.matmul %33, %0, %cst_13 {dimension_numbers = #tpu.dot_dimension_numbers<[1], [0], [0], [1], [0, 0, 1, 1], [], []>} : vector<256x4xbf16>, vector<4x2xbf16>, vector<256x2xf32> -> vector<256x2xf32>
    %35 = vector.broadcast %1 : vector<1x2xf32> to vector<256x2xf32>
    %36 = arith.addf %34, %35 : vector<256x2xf32>
    %cst_14 = arith.constant 1.000000e-01 : f32
    %37 = vector.broadcast %cst_14 : f32 to vector<256x2xf32>
    %38 = arith.mulf %37, %36 : vector<256x2xf32>
    %39 = arith.maximumf %36, %38 : vector<256x2xf32>
    %40 = arith.truncf %39 : vector<256x2xf32> to vector<256x2xbf16>
    %cst_15 = arith.constant 0.000000e+00 : bf16
    %41 = vector.broadcast %cst_15 : bf16 to vector<1x2xbf16>
    %c0_16 = arith.constant 0 : index
    %c0_17 = arith.constant 0 : index
    %42 = vector.load %arg10[%c0_16, %c0_17] : memref<290x2xbf16, #tpu.memory_space<vmem>>, vector<1x2xbf16>
    tpu.vector_store %arg10[%c0_16, %c0_17], %41 {strides = array<i32>} : memref<290x2xbf16, #tpu.memory_space<vmem>>, vector<1x2xbf16>,
    %c1 = arith.constant 1 : index
    %c0_18 = arith.constant 0 : index
    %43 = vector.load %arg10[%c1, %c0_18] : memref<290x2xbf16, #tpu.memory_space<vmem>>, vector<16x2xbf16>
    tpu.vector_store %arg10[%c1, %c0_18], %21 {strides = array<i32>} : memref<290x2xbf16, #tpu.memory_space<vmem>>, vector<16x2xbf16>,
    %c17 = arith.constant 17 : index
    %c0_19 = arith.constant 0 : index
    %44 = vector.load %arg10[%c17, %c0_19] : memref<290x2xbf16, #tpu.memory_space<vmem>>, vector<256x2xbf16>
    tpu.vector_store %arg10[%c17, %c0_19], %40 {strides = array<i32>} : memref<290x2xbf16, #tpu.memory_space<vmem>>, vector<256x2xbf16>,
    %c273 = arith.constant 273 : index
    %c0_20 = arith.constant 0 : index
    %45 = vector.load %arg10[%c273, %c0_20] : memref<290x2xbf16, #tpu.memory_space<vmem>>, vector<16x2xbf16>
    tpu.vector_store %arg10[%c273, %c0_20], %32 {strides = array<i32>} : memref<290x2xbf16, #tpu.memory_space<vmem>>, vector<16x2xbf16>,
    %c289 = arith.constant 289 : index
    %c0_21 = arith.constant 0 : index
    %46 = vector.load %arg10[%c289, %c0_21] : memref<290x2xbf16, #tpu.memory_space<vmem>>, vector<1x2xbf16>
    tpu.vector_store %arg10[%c289, %c0_21], %41 {strides = array<i32>} : memref<290x2xbf16, #tpu.memory_space<vmem>>, vector<1x2xbf16>,
    %47 = tpu.iota {dimensions = array<i32: 0>} : vector<256x1xi32>
    %c16_i32 = arith.constant 16 : i32
    %c0_i32_22 = arith.constant 0 : i32
    %48 = arith.cmpi eq, %c16_i32, %c0_i32_22 : i32
    %c1_i32 = arith.constant 1 : i32
    %49 = arith.select %48, %c1_i32, %c16_i32 : i32
    %50 = vector.broadcast %49 : i32 to vector<256x1xi32>
    %51 = arith.remsi %47, %50 : vector<256x1xi32>
    %c0_i32_23 = arith.constant 0 : i32
    %52 = vector.broadcast %c0_i32_23 : i32 to vector<256x1xi32>
    %53 = arith.cmpi ne, %51, %52 : vector<256x1xi32>
    %c0_i32_24 = arith.constant 0 : i32
    %54 = vector.broadcast %c0_i32_24 : i32 to vector<256x1xi32>
    %55 = arith.cmpi slt, %51, %54 : vector<256x1xi32>
    %c0_i32_25 = arith.constant 0 : i32
    %56 = arith.cmpi slt, %49, %c0_i32_25 : i32
    %57 = vector.broadcast %56 : i1 to vector<256x1xi1>
    %58 = vector.broadcast %57 : vector<256x1xi1> to vector<256x1xi1>
    %59 = arith.xori %55, %58 : vector<256x1xi1>
    %60 = arith.andi %59, %53 : vector<256x1xi1>
    %61 = vector.broadcast %49 : i32 to vector<256x1xi32>
    %62 = arith.addi %51, %61 : vector<256x1xi32>
    %63 = arith.select %60, %62, %51 : vector<256x1xi1>, vector<256x1xi32>
    %c0_i32_26 = arith.constant 0 : i32
    %64 = vector.broadcast %c0_i32_26 : i32 to vector<256x1xi32>
    %65 = arith.cmpi ne, %63, %64 : vector<256x1xi32>
    %c15_i32 = arith.constant 15 : i32
    %66 = vector.broadcast %c15_i32 : i32 to vector<256x1xi32>
    %67 = arith.cmpi ne, %63, %66 : vector<256x1xi32>
    %cst_27 = arith.constant 0.000000e+00 : f32
    %68 = vector.broadcast %cst_27 : f32 to vector<256x4xf32>
    %c0_28 = arith.constant 0 : index
    %c0_29 = arith.constant 0 : index
    %69 = vector.load %arg10[%c0_28, %c0_29] : memref<290x2xbf16, #tpu.memory_space<vmem>>, vector<256x2xbf16>
    %cst_30 = arith.constant 0.000000e+00 : bf16
    %70 = vector.broadcast %cst_30 : bf16 to vector<256x2xbf16>
    %71 = vector.shape_cast %65 : vector<256x1xi1> to vector<256x1xi1>
    %72 = vector.broadcast %71 : vector<256x1xi1> to vector<256x2xi1>
    %73 = arith.select %72, %69, %70 : vector<256x2xi1>, vector<256x2xbf16>
    %c0_31 = arith.constant 0 : index
    %c0_32 = arith.constant 0 : index
    %c0_33 = arith.constant 0 : index
    %74 = vector.load %arg7[%c0_31, %c0_32, %c0_33] : memref<9x2x4xbf16, #tpu.memory_space<vmem>>, vector<1x2x4xbf16>
    %75 = vector.shape_cast %74 : vector<1x2x4xbf16> to vector<2x4xbf16>
    %cst_34 = arith.constant dense<0.000000e+00> : vector<256x4xf32>
    %76 = tpu.matmul %73, %75, %cst_34 {dimension_numbers = #tpu.dot_dimension_numbers<[1], [0], [0], [1], [0, 0, 1, 1], [], []>} : vector<256x2xbf16>, vector<2x4xbf16>, vector<256x4xf32> -> vector<256x4xf32>
    %77 = arith.addf %68, %76 : vector<256x4xf32>
    %c1_35 = arith.constant 1 : index
    %c0_36 = arith.constant 0 : index
    %78 = vector.load %arg10[%c1_35, %c0_36] : memref<290x2xbf16, #tpu.memory_space<vmem>>, vector<256x2xbf16>
    %c1_37 = arith.constant 1 : index
    %c0_38 = arith.constant 0 : index
    %c0_39 = arith.constant 0 : index
    %79 = vector.load %arg7[%c1_37, %c0_38, %c0_39] : memref<9x2x4xbf16, #tpu.memory_space<vmem>>, vector<1x2x4xbf16>
    %80 = vector.shape_cast %79 : vector<1x2x4xbf16> to vector<2x4xbf16>
    %cst_40 = arith.constant dense<0.000000e+00> : vector<256x4xf32>
    %81 = tpu.matmul %78, %80, %cst_40 {dimension_numbers = #tpu.dot_dimension_numbers<[1], [0], [0], [1], [0, 0, 1, 1], [], []>} : vector<256x2xbf16>, vector<2x4xbf16>, vector<256x4xf32> -> vector<256x4xf32>
    %82 = arith.addf %77, %81 : vector<256x4xf32>
    %c2 = arith.constant 2 : index
    %c0_41 = arith.constant 0 : index
    %83 = vector.load %arg10[%c2, %c0_41] : memref<290x2xbf16, #tpu.memory_space<vmem>>, vector<256x2xbf16>
    %cst_42 = arith.constant 0.000000e+00 : bf16
    %84 = vector.broadcast %cst_42 : bf16 to vector<256x2xbf16>
    %85 = vector.shape_cast %67 : vector<256x1xi1> to vector<256x1xi1>
    %86 = vector.broadcast %85 : vector<256x1xi1> to vector<256x2xi1>
    %87 = arith.select %86, %83, %84 : vector<256x2xi1>, vector<256x2xbf16>
    %c2_43 = arith.constant 2 : index
    %c0_44 = arith.constant 0 : index
    %c0_45 = arith.constant 0 : index
    %88 = vector.load %arg7[%c2_43, %c0_44, %c0_45] : memref<9x2x4xbf16, #tpu.memory_space<vmem>>, vector<1x2x4xbf16>
    %89 = vector.shape_cast %88 : vector<1x2x4xbf16> to vector<2x4xbf16>
    %cst_46 = arith.constant dense<0.000000e+00> : vector<256x4xf32>
    %90 = tpu.matmul %87, %89, %cst_46 {dimension_numbers = #tpu.dot_dimension_numbers<[1], [0], [0], [1], [0, 0, 1, 1], [], []>} : vector<256x2xbf16>, vector<2x4xbf16>, vector<256x4xf32> -> vector<256x4xf32>
    %91 = arith.addf %82, %90 : vector<256x4xf32>
    %c16 = arith.constant 16 : index
    %c0_47 = arith.constant 0 : index
    %92 = vector.load %arg10[%c16, %c0_47] : memref<290x2xbf16, #tpu.memory_space<vmem>>, vector<256x2xbf16>
    %cst_48 = arith.constant 0.000000e+00 : bf16
    %93 = vector.broadcast %cst_48 : bf16 to vector<256x2xbf16>
    %94 = vector.shape_cast %65 : vector<256x1xi1> to vector<256x1xi1>
    %95 = vector.broadcast %94 : vector<256x1xi1> to vector<256x2xi1>
    %96 = arith.select %95, %92, %93 : vector<256x2xi1>, vector<256x2xbf16>
    %c3 = arith.constant 3 : index
    %c0_49 = arith.constant 0 : index
    %c0_50 = arith.constant 0 : index
    %97 = vector.load %arg7[%c3, %c0_49, %c0_50] : memref<9x2x4xbf16, #tpu.memory_space<vmem>>, vector<1x2x4xbf16>
    %98 = vector.shape_cast %97 : vector<1x2x4xbf16> to vector<2x4xbf16>
    %cst_51 = arith.constant dense<0.000000e+00> : vector<256x4xf32>
    %99 = tpu.matmul %96, %98, %cst_51 {dimension_numbers = #tpu.dot_dimension_numbers<[1], [0], [0], [1], [0, 0, 1, 1], [], []>} : vector<256x2xbf16>, vector<2x4xbf16>, vector<256x4xf32> -> vector<256x4xf32>
    %100 = arith.addf %91, %99 : vector<256x4xf32>
    %c17_52 = arith.constant 17 : index
    %c0_53 = arith.constant 0 : index
    %101 = vector.load %arg10[%c17_52, %c0_53] : memref<290x2xbf16, #tpu.memory_space<vmem>>, vector<256x2xbf16>
    %c4 = arith.constant 4 : index
    %c0_54 = arith.constant 0 : index
    %c0_55 = arith.constant 0 : index
    %102 = vector.load %arg7[%c4, %c0_54, %c0_55] : memref<9x2x4xbf16, #tpu.memory_space<vmem>>, vector<1x2x4xbf16>
    %103 = vector.shape_cast %102 : vector<1x2x4xbf16> to vector<2x4xbf16>
    %cst_56 = arith.constant dense<0.000000e+00> : vector<256x4xf32>
    %104 = tpu.matmul %101, %103, %cst_56 {dimension_numbers = #tpu.dot_dimension_numbers<[1], [0], [0], [1], [0, 0, 1, 1], [], []>} : vector<256x2xbf16>, vector<2x4xbf16>, vector<256x4xf32> -> vector<256x4xf32>
    %105 = arith.addf %100, %104 : vector<256x4xf32>
    %c18 = arith.constant 18 : index
    %c0_57 = arith.constant 0 : index
    %106 = vector.load %arg10[%c18, %c0_57] : memref<290x2xbf16, #tpu.memory_space<vmem>>, vector<256x2xbf16>
    %cst_58 = arith.constant 0.000000e+00 : bf16
    %107 = vector.broadcast %cst_58 : bf16 to vector<256x2xbf16>
    %108 = vector.shape_cast %67 : vector<256x1xi1> to vector<256x1xi1>
    %109 = vector.broadcast %108 : vector<256x1xi1> to vector<256x2xi1>
    %110 = arith.select %109, %106, %107 : vector<256x2xi1>, vector<256x2xbf16>
    %c5 = arith.constant 5 : index
    %c0_59 = arith.constant 0 : index
    %c0_60 = arith.constant 0 : index
    %111 = vector.load %arg7[%c5, %c0_59, %c0_60] : memref<9x2x4xbf16, #tpu.memory_space<vmem>>, vector<1x2x4xbf16>
    %112 = vector.shape_cast %111 : vector<1x2x4xbf16> to vector<2x4xbf16>
    %cst_61 = arith.constant dense<0.000000e+00> : vector<256x4xf32>
    %113 = tpu.matmul %110, %112, %cst_61 {dimension_numbers = #tpu.dot_dimension_numbers<[1], [0], [0], [1], [0, 0, 1, 1], [], []>} : vector<256x2xbf16>, vector<2x4xbf16>, vector<256x4xf32> -> vector<256x4xf32>
    %114 = arith.addf %105, %113 : vector<256x4xf32>
    %c32 = arith.constant 32 : index
    %c0_62 = arith.constant 0 : index
    %115 = vector.load %arg10[%c32, %c0_62] : memref<290x2xbf16, #tpu.memory_space<vmem>>, vector<256x2xbf16>
    %cst_63 = arith.constant 0.000000e+00 : bf16
    %116 = vector.broadcast %cst_63 : bf16 to vector<256x2xbf16>
    %117 = vector.shape_cast %65 : vector<256x1xi1> to vector<256x1xi1>
    %118 = vector.broadcast %117 : vector<256x1xi1> to vector<256x2xi1>
    %119 = arith.select %118, %115, %116 : vector<256x2xi1>, vector<256x2xbf16>
    %c6 = arith.constant 6 : index
    %c0_64 = arith.constant 0 : index
    %c0_65 = arith.constant 0 : index
    %120 = vector.load %arg7[%c6, %c0_64, %c0_65] : memref<9x2x4xbf16, #tpu.memory_space<vmem>>, vector<1x2x4xbf16>
    %121 = vector.shape_cast %120 : vector<1x2x4xbf16> to vector<2x4xbf16>
    %cst_66 = arith.constant dense<0.000000e+00> : vector<256x4xf32>
    %122 = tpu.matmul %119, %121, %cst_66 {dimension_numbers = #tpu.dot_dimension_numbers<[1], [0], [0], [1], [0, 0, 1, 1], [], []>} : vector<256x2xbf16>, vector<2x4xbf16>, vector<256x4xf32> -> vector<256x4xf32>
    %123 = arith.addf %114, %122 : vector<256x4xf32>
    %c33 = arith.constant 33 : index
    %c0_67 = arith.constant 0 : index
    %124 = vector.load %arg10[%c33, %c0_67] : memref<290x2xbf16, #tpu.memory_space<vmem>>, vector<256x2xbf16>
    %c7 = arith.constant 7 : index
    %c0_68 = arith.constant 0 : index
    %c0_69 = arith.constant 0 : index
    %125 = vector.load %arg7[%c7, %c0_68, %c0_69] : memref<9x2x4xbf16, #tpu.memory_space<vmem>>, vector<1x2x4xbf16>
    %126 = vector.shape_cast %125 : vector<1x2x4xbf16> to vector<2x4xbf16>
    %cst_70 = arith.constant dense<0.000000e+00> : vector<256x4xf32>
    %127 = tpu.matmul %124, %126, %cst_70 {dimension_numbers = #tpu.dot_dimension_numbers<[1], [0], [0], [1], [0, 0, 1, 1], [], []>} : vector<256x2xbf16>, vector<2x4xbf16>, vector<256x4xf32> -> vector<256x4xf32>
    %128 = arith.addf %123, %127 : vector<256x4xf32>
    %c34 = arith.constant 34 : index
    %c0_71 = arith.constant 0 : index
    %129 = vector.load %arg10[%c34, %c0_71] : memref<290x2xbf16, #tpu.memory_space<vmem>>, vector<256x2xbf16>
    %cst_72 = arith.constant 0.000000e+00 : bf16
    %130 = vector.broadcast %cst_72 : bf16 to vector<256x2xbf16>
    %131 = vector.shape_cast %67 : vector<256x1xi1> to vector<256x1xi1>
    %132 = vector.broadcast %131 : vector<256x1xi1> to vector<256x2xi1>
    %133 = arith.select %132, %129, %130 : vector<256x2xi1>, vector<256x2xbf16>
    %c8 = arith.constant 8 : index
    %c0_73 = arith.constant 0 : index
    %c0_74 = arith.constant 0 : index
    %134 = vector.load %arg7[%c8, %c0_73, %c0_74] : memref<9x2x4xbf16, #tpu.memory_space<vmem>>, vector<1x2x4xbf16>
    %135 = vector.shape_cast %134 : vector<1x2x4xbf16> to vector<2x4xbf16>
    %cst_75 = arith.constant dense<0.000000e+00> : vector<256x4xf32>
    %136 = tpu.matmul %133, %135, %cst_75 {dimension_numbers = #tpu.dot_dimension_numbers<[1], [0], [0], [1], [0, 0, 1, 1], [], []>} : vector<256x2xbf16>, vector<2x4xbf16>, vector<256x4xf32> -> vector<256x4xf32>
    %137 = arith.addf %128, %136 : vector<256x4xf32>
    %c0_76 = arith.constant 0 : index
    %c0_77 = arith.constant 0 : index
    %138 = vector.load %arg8[%c0_76, %c0_77] : memref<1x4xf32, #tpu.memory_space<vmem>>, vector<1x4xf32>
    %139 = vector.broadcast %138 : vector<1x4xf32> to vector<256x4xf32>
    %140 = arith.addf %137, %139 : vector<256x4xf32>
    %cst_78 = arith.constant 1.000000e-01 : f32
    %141 = vector.broadcast %cst_78 : f32 to vector<256x4xf32>
    %142 = arith.mulf %141, %140 : vector<256x4xf32>
    %143 = arith.maximumf %140, %142 : vector<256x4xf32>
    %144 = arith.addf %143, %2 : vector<256x4xf32>
    %c0_79 = arith.constant 0 : index
    %c0_80 = arith.constant 0 : index
    %145 = vector.load %arg9[%c0_79, %c0_80] : memref<256x4xf32, #tpu.memory_space<vmem>>, vector<256x4xf32>
    tpu.vector_store %arg9[%c0_79, %c0_80], %144 {strides = array<i32>} : memref<256x4xf32, #tpu.memory_space<vmem>>, vector<256x4xf32>,
    return
  }
  func.func @transform_0(%arg0: i32, %arg1: i32) -> (i32, i32) {
    %c1_i32 = arith.constant 1 : i32
    %0 = arith.muli %arg0, %c1_i32 : i32
    %1 = arith.addi %0, %arg1 : i32
    %c0_i32 = arith.constant 0 : i32
    %c0_i32_0 = arith.constant 0 : i32
    return %1, %c0_i32 : i32, i32
  }
  func.func @transform_1(%arg0: i32, %arg1: i32) -> (i32, i32) {
    %c16_i32 = arith.constant 16 : i32
    %0 = arith.muli %arg0, %c16_i32 : i32
    %c16_i32_0 = arith.constant 16 : i32
    %1 = arith.muli %arg1, %c16_i32_0 : i32
    %c1_i32 = arith.constant 1 : i32
    %2 = arith.subi %1, %c1_i32 : i32
    %c0_i32 = arith.constant 0 : i32
    %3 = arith.maxsi %2, %c0_i32 : i32
    %4 = arith.addi %0, %3 : i32
    %c0_i32_1 = arith.constant 0 : i32
    %c0_i32_2 = arith.constant 0 : i32
    return %4, %c0_i32_1 : i32, i32
  }
  func.func @transform_2(%arg0: i32, %arg1: i32) -> (i32, i32) {
    %c16_i32 = arith.constant 16 : i32
    %0 = arith.muli %arg0, %c16_i32 : i32
    %c16_i32_0 = arith.constant 16 : i32
    %1 = arith.muli %arg1, %c16_i32_0 : i32
    %c16_i32_1 = arith.constant 16 : i32
    %2 = arith.addi %1, %c16_i32_1 : i32
    %c15_i32 = arith.constant 15 : i32
    %3 = arith.minsi %2, %c15_i32 : i32
    %4 = arith.addi %0, %3 : i32
    %c0_i32 = arith.constant 0 : i32
    %c0_i32_2 = arith.constant 0 : i32
    return %4, %c0_i32 : i32, i32
  }
  func.func @transform_3(%arg0: i32, %arg1: i32) -> (i32, i32) {
    %c0_i32 = arith.constant 0 : i32
    %c0_i32_0 = arith.constant 0 : i32
    %c0_i32_1 = arith.constant 0 : i32
    return %c0_i32, %c0_i32_0 : i32, i32
  }
  func.func @transform_4(%arg0: i32, %arg1: i32) -> (i32, i32) {
    %c0_i32 = arith.constant 0 : i32
    %c0_i32_0 = arith.constant 0 : i32
    %c0_i32_1 = arith.constant 0 : i32
    return %c0_i32, %c0_i32_0 : i32, i32
  }
  func.func @transform_5(%arg0: i32, %arg1: i32) -> (i32, i32, i32) {
    %c0_i32 = arith.constant 0 : i32
    %c0_i32_0 = arith.constant 0 : i32
    %c0_i32_1 = arith.constant 0 : i32
    %c0_i32_2 = arith.constant 0 : i32
    return %c0_i32, %c0_i32_0, %c0_i32_1 : i32, i32, i32
  }
  func.func @transform_6(%arg0: i32, %arg1: i32) -> (i32, i32) {
    %c0_i32 = arith.constant 0 : i32
    %c0_i32_0 = arith.constant 0 : i32
    %c0_i32_1 = arith.constant 0 : i32
    return %c0_i32, %c0_i32_0 : i32, i32
  }
  func.func @transform_7(%arg0: i32, %arg1: i32) -> (i32, i32) {
    %c1_i32 = arith.constant 1 : i32
    %0 = arith.muli %arg0, %c1_i32 : i32
    %1 = arith.addi %0, %arg1 : i32
    %c0_i32 = arith.constant 0 : i32
    %c0_i32_0 = arith.constant 0 : i32
    return %1, %c0_i32 : i32, i32
  }
}

</mosaic_0001>

<bundles_post_ra>
// kernel: residual_layer.1
= control target key start
LH: loop header
LB: loop body
LE: loop exit
PB: predicated region body
PF: predicated region fallthrough
CT: control target
= control target key end

     0   :  { %s7413_s24 = smov 0   ;;  %s7415_s25 = smov 0   ;;  %s10312_s0 = inlined_call_operand.vmem [shape: f32[512,4], index: 0, kind: input, shape index: {}, may-alias: {0,1,2}]   ;;  %s10313_s1 = inlined_call_operand.vmem [shape: f32[512,4], index: 1, kind: input, shape index: {}, may-alias: {0,1,2}]   ;;  %s10314_s2 = inlined_call_operand.vmem [shape: f32[512,4], index: 2, kind: input, shape index: {}, may-alias: {0,1,2}]   ;;  %s10315_s3 = inlined_call_operand.vmem [shape: bf16[4,2], index: 3, kind: input, shape index: {}]   ;;  %s10316_s4 = inlined_call_operand.vmem [shape: f32[1,2], index: 4, kind: input, shape index: {}]   ;;  %s10317_s5 = inlined_call_operand.vmem [shape: bf16[9,2,4], index: 5, kind: input, shape index: {}]   ;;  %s10318_s6 = inlined_call_operand.vmem [shape: f32[1,4], index: 6, kind: input, shape index: {}]   ;;  %s10319_s7 = inlined_call_operand.vmem [shape: f32[512,4], index: 7, kind: output, shape index: {}]  }
   0x1   :  { %s7417_s26 = smov 0  }
   0x2 LB: > { %s29_s27 = sadd.s32 1, %s7363_s25  ;;  %p6294_p0 = scmp.ge.s32.totalorder %s7367_s26, 1  ;;  %s7367_s26 = sphi %s7417_s26, %s17_s26   ;;  %s7363_s25 = sphi %s7415_s25, %s11189_s25   ;;  %s7359_s24 = sphi %s7413_s24, %s11188_s24  }
   0x3   : > { %p31_p1 = scmp.ge.s32.totalorder %s29_s27, 2  ;;  %p326_p2 = scmp.lt.s32.totalorder %s7367_s26, 3 }
   0x5   : > { %s11191_s27 = smov (%p31_p1, %s29_s27), 0  ;;  %p327_p3 = pnand %p6294_p0, %p326_p2 }
   0x7   : > { %330 = sbr.rel (%p327_p3) target bundleno = 878 (0x36e), region = 48 }
   0xc   : > { %v437_v0 = vld [vmem:[%s10315_s3] sm:$0x3]  ;;  %vm510_vm0 = vcmask 1041408   ;;  %s6295_s30 = sshll.u32 %s7359_s24, 5  ;;  %v7369_v1 = vmov 0.0   ;;  %vm7370_vm1 = vmmov 0  }
   0xd   : > { %6875 = vmatprep.subr.bf16.mxu0 %v7369_v1  ;;  %v512_v2 = vsel %vm510_vm0, %v437_v0, 0  ;;  %6877 = vmatprep.mubr.msk.bf16.mxu0 %vm7370_vm1, %v7369_v1  ;;  %p384_p4 = scmp.lt.s32.totalorder %s6295_s30, 63  ;;  %s6667_s8 = sadd.s32 30, %s6295_s30  ;;  %vm10331_vm2 = vcmask 31744   ;;  %vm927_vm3 = vcmask 8192   ;;  %vm10332_vm8 = vcmask 1040384  }
   0xe   : > { %6876 = vmatpush3.bf16.msra.mxu0 %v512_v2  ;;  %6881 = vmatprep.subr.bf16.mxu1 %v7369_v1  ;;  %p415_p5 = scmp.lt.s32.totalorder %s6667_s8, 63  ;;  %vm928_vm4 = vsmask.f32 256  ;;  %v930_v58 = vld [vmem:[#allocation2] sm:$0x1]  ;;  %vm7371_vm10 = vmmov 1  }
   0xf   : > { %s11193_s30 = smov (!%p384_p4, %s6295_s30), 63  ;;  %7227 = vmatprep.subr.msk.bf16.mxu0 %vm510_vm0, %v437_v0  ;;  %6882 = vmatpush3.bf16.msra.mxu1 %v512_v2  ;;  %vm7500_vm5 = vmand %vm927_vm3, %vm928_vm4  ;;  %vm961_vm6 = vsmask.f32 7938  ;;  %v2085_v61 = vld [vmem:[%s10317_s5] sm:$0x1]  ;;  %vm2941_vm0 = vcmask 1044484  }
  0x10   : > { %6883 = vmatprep.mubr.msk.bf16.mxu1 %vm7370_vm1, %v7369_v1  ;;  %s7434_s9 = sshll.u32 %s11193_s30, 3  ;;  %s11195_s8 = smov (!%p415_p5, %s6667_s8), 63  ;;  %v931_v59 = vsel %vm7500_vm5, 0, %v930_v58  ;;  %vm7507_vm7 = vmand %vm927_vm3, %vm961_vm6  ;;  %v2648_v62 = vsel %vm10332_vm8, %v2085_v61, 0  ;;  %v6360_v63 = vld [vmem:[%s10317_s5 + $0x1] sm:$0x1] }
  0x11   : > { %s7440_s12 = scalar_lea.vmem %s10312_s0, %s7434_s9  ;;  %s400_s15 = scalar_lea.vmem %s10313_s1, %s7434_s9  ;;  %932 = vst [vmem:[#allocation2] sm:$0x1] %v931_v59  ;;  %7228 = vmatprep.subr.msk.bf16.mxu1 %vm10332_vm8, %v6360_v63  ;;  %v2356_v0 = vsel %vm10332_vm8, %v6360_v63, 0  ;;  %v6426_v1 = vld [vmem:[%s10317_s5 + $0x2] sm:$0x1]  ;;  %vm7529_vm11 = vmpackc.low %vm7371_vm10, %vm7371_vm10  ;;  %vm10340_vm10 = vcmask 11264  }
  0x12   : > { %v497_v3 = vld [vmem:[%s400_s15] sm:$0xff]  ;;  %v498_v4 = vld [vmem:[%s400_s15 + $0x8] sm:$0xff]  ;;  %v441_v9 = vld [vmem:[%s7440_s12 + $0x10] sm:$0xff]  ;;  %s6302_s16 = sshll.u32 %s11195_s8, 3  ;;  %v10582_v57 = vmov 0  ;;  %v10598_v60 = vmov 0  ;;  %s10064_s11 = scalar_lea.vmem %s10319_s7, %s7434_s9 }
  0x13   : > { %v439_v5 = vld [vmem:[%s7440_s12] sm:$0xff]  ;;  %v499_v6 = vpack.c.bf16 %v498_v4, %v497_v3  ;;  %v440_v7 = vld [vmem:[%s7440_s12 + $0x8] sm:$0xff]  ;;  %v442_v10 = vld [vmem:[%s7440_s12 + $0x18] sm:$0xff]  ;;  %s418_s19 = scalar_lea.vmem %s10314_s2, %s6302_s16 }
  0x14   : > { %v622_v8 = vpack.c.bf16 %v440_v7, %v439_v5  ;;  %v443_v11 = vld [vmem:[%s7440_s12 + $0x20] sm:$0xff]  ;;  %v444_v12 = vld [vmem:[%s7440_s12 + $0x28] sm:$0xff]  ;;  %v623_v13 = vpack.c.bf16 %v442_v10, %v441_v9  ;;  %v445_v18 = vld [vmem:[%s7440_s12 + $0x30] sm:$0xff]  ;;  %v10320_v10 = vmov 0  }
  0x15   : > { %6878 = vmatmul.mubr.msk.bf16.vlgmr.msra.gmra.mxu0 %vm10331_vm2, %v499_v6  ;;  %v624_v14 = vpack.c.bf16 %v444_v12, %v443_v11  ;;  %v565_v15 = vld [vmem:[%s418_s19] sm:$0xff]  ;;  %v566_v16 = vld [vmem:[%s418_s19 + $0x8] sm:$0xff]  ;;  %v446_v19 = vld [vmem:[%s7440_s12 + $0x38] sm:$0xff]  ;;  %v2908_v11 = vsel %vm7529_vm11, 65537, %v10320_v10 }
  0x16   : > { %6888 = vmatpush3.bf16.msra.mxu0 %v512_v2  ;;  %6889 = vmatprep.mubr.msk.bf16.mxu0 %vm10331_vm2, %v622_v8  ;;  %v567_v17 = vpack.c.bf16 %v566_v16, %v565_v15  ;;  %v447_v20 = vld [vmem:[%s7440_s12 + $0x40] sm:$0xff]  ;;  %v448_v21 = vld [vmem:[%s7440_s12 + $0x48] sm:$0xff]  ;;  %v625_v22 = vpack.c.bf16 %v446_v19, %v445_v18  ;;  %v449_v24 = vld [vmem:[%s7440_s12 + $0x50] sm:$0xff]  ;;  %v1444_v2 = vlaneseq  ;;  %v7548_v16 = vrot.slane %v2908_v11, 7 }
  0x17   : > { %v626_v23 = vpack.c.bf16 %v448_v21, %v447_v20  ;;  %v450_v25 = vld [vmem:[%s7440_s12 + $0x58] sm:$0xff]  ;;  %v451_v26 = vld [vmem:[%s7440_s12 + $0x60] sm:$0xff]  ;;  %v452_v27 = vld [vmem:[%s7440_s12 + $0x68] sm:$0xff]  ;;  %7229 = vmatprep.subr.msk.bf16.mxu0 %vm10332_vm8, %v2085_v61 }
  0x18   : > { %6884 = vmatmul.mubr.msk.bf16.vlgmr.msra.gmra.mxu1 %vm10331_vm2, %v567_v17  ;;  %v627_v28 = vpack.c.bf16 %v450_v25, %v449_v24  ;;  %v628_v29 = vpack.c.bf16 %v452_v27, %v451_v26  ;;  %v453_v30 = vld [vmem:[%s7440_s12 + $0x70] sm:$0xff]  ;;  %v454_v31 = vld [vmem:[%s7440_s12 + $0x78] sm:$0xff]  ;;  %v455_v32 = vld [vmem:[%s7440_s12 + $0x80] sm:$0xff]  ;;  %v7525_v3 = vshrl.u32 %v1444_v2, 7  ;;  %v7564_v25 = vrot.slane %v7548_v16, 4 }
  0x19   : > { %v456_v33 = vld [vmem:[%s7440_s12 + $0x88] sm:$0xff]  ;;  %v629_v34 = vpack.c.bf16 %v454_v31, %v453_v30  ;;  %v457_v36 = vld [vmem:[%s7440_s12 + $0x90] sm:$0xff]  ;;  %v458_v37 = vld [vmem:[%s7440_s12 + $0x98] sm:$0xff]  ;;  %6922 = vmatpush3.bf16.msra.mxu1 %v2356_v0 }
  0x1a   : > { %v630_v35 = vpack.c.bf16 %v456_v33, %v455_v32  ;;  %v459_v38 = vld [vmem:[%s7440_s12 + $0xa0] sm:$0xff]  ;;  %v460_v39 = vld [vmem:[%s7440_s12 + $0xa8] sm:$0xff]  ;;  %v631_v40 = vpack.c.bf16 %v458_v37, %v457_v36  ;;  %v461_v42 = vld [vmem:[%s7440_s12 + $0xb0] sm:$0xff]  ;;  %7230 = vmatprep.subr.msk.bf16.mxu1 %vm10332_vm8, %v6426_v1  ;;  %10465 = vst [vmem:[#allocation3_spill] sm:$0xff] %v7525_v3  ;;  %v1448_v4 = vadd.s32 24, %v7525_v3  ;;  %v1450_v5 = vadd.s32 40, %v7525_v3 }
  0x1b   : > { %v632_v41 = vpack.c.bf16 %v460_v39, %v459_v38  ;;  %v462_v43 = vld [vmem:[%s7440_s12 + $0xb8] sm:$0xff]  ;;  %v463_v44 = vld [vmem:[%s7440_s12 + $0xc0] sm:$0xff]  ;;  %v464_v45 = vld [vmem:[%s7440_s12 + $0xc8] sm:$0xff]  ;;  %v1446_v9 = vadd.s32 8, %v7525_v3  ;;  %v7552_v18 = vadd.s32 16, %v7525_v3  ;;  %v7559_v21 = vadd.s32 32, %v7525_v3 }
  0x1c   : > { %v633_v46 = vpack.c.bf16 %v462_v43, %v461_v42  ;;  %v634_v47 = vpack.c.bf16 %v464_v45, %v463_v44  ;;  %v465_v48 = vld [vmem:[%s7440_s12 + $0xd0] sm:$0xff]  ;;  %v466_v49 = vld [vmem:[%s7440_s12 + $0xd8] sm:$0xff]  ;;  %v467_v50 = vld [vmem:[%s7440_s12 + $0xe0] sm:$0xff]  ;;  %v1502_v6 = vand.u32 15, %v1448_v4  ;;  %v1516_v7 = vand.u32 15, %v1450_v5  ;;  %10471 = vst [vmem:[#allocation5_spill] sm:$0xff] %v7564_v25 }
  0x1d   : > { %6890 = vmatmul.mubr.msk.bf16.vlgmr.msra.gmra.mxu0 %vm10331_vm2, %v623_v13  ;;  %v468_v51 = vld [vmem:[%s7440_s12 + $0xe8] sm:$0xff]  ;;  %v635_v52 = vpack.c.bf16 %v466_v49, %v465_v48  ;;  %v469_v54 = vld [vmem:[%s7440_s12 + $0xf0] sm:$0xff]  ;;  %v470_v55 = vld [vmem:[%s7440_s12 + $0xf8] sm:$0xff]  ;;  %v1488_v13 = vand.u32 15, %v1446_v9  ;;  %v7571_v27 = vadd.s32 48, %v7525_v3  ;;  %v7584_v31 = vadd.s32 64, %v7525_v3 }
  0x1e   : > { %6893 = vmatprep.mubr.msk.bf16.mxu0 %vm10331_vm2, %v624_v14  ;;  %v636_v53 = vpack.c.bf16 %v468_v51, %v467_v50  ;;  %v637_v56 = vpack.c.bf16 %v470_v55, %v469_v54  ;;  %6956 = vmatpush3.bf16.msra.mxu0 %v2648_v62  ;;  %vm1896_vm9 = vcmp.ne.s32.totalorder %v1502_v6, 15  ;;  %vm1898_vm12 = vcmp.ne.s32.totalorder %v1516_v7, 15  ;;  %v7546_v15 = vld [vmem:[%s10316_s4] ss:$0 sm:$0xff]  ;;  %vm7578_vm3 = vmor %vm10332_vm8, %vm2941_vm0  ;;  %v968_v63 = vld [vmem:[#allocation2 + $0x8] sm:$0x1] }
  0x1f   : > { %vm2879_vm13 = vmpackc.low %vm1896_vm9, %vm1896_vm9  ;;  %vm7554_vm15 = vcmp.ne.s32.totalorder %v1488_v13, 15  ;;  %v7598_v36 = vadd.s32 96, %v7525_v3  ;;  %v7602_v39 = vadd.s32 112, %v7525_v3  ;;  %v7611_v44 = vadd.s32 128, %v7525_v3  ;;  %v6460_v42 = vld [vmem:[%s10317_s5 + $0x3] sm:$0x1] }
  0x20   : > { %vm2881_vm14 = vmpackc.low %vm1898_vm12, %vm1898_vm12  ;;  %v7538_v12 = vsel %vm2879_vm13, 65537, %v10320_v10  ;;  %v7614_v45 = vadd.s32 144, %v7525_v3  ;;  %v7621_v49 = vadd.s32 160, %v7525_v3  ;;  %vm938_vm9 = vsmask.f32 4368  ;;  %7231 = vmatprep.subr.msk.bf16.mxu0 %vm10332_vm8, %v6460_v42 }
  0x21   : > { %v7541_v14 = vsel %vm2881_vm14, 65537, %v10320_v10  ;;  %v2951_v17 = vrot.slane %v7538_v12, 7  ;;  %vm2877_vm1 = vmpackc.low %vm7554_vm15, %vm7554_vm15  ;;  %v7694_v33 = vadd.s32 56, %v7525_v3 }
  0x22   : > { %10468 = vst [vmem:[#allocation4_spill] sm:$0xff] %v7541_v14  ;;  %vm7677_vm12 = vmor %vm928_vm4, %vm938_vm9 }
  0x23   : > { %v7568_v26 = vrot.slane %v2951_v17, 4  ;;  %vm7683_vm13 = vmand %vm10340_vm10, %vm961_vm6  ;;  %10482 = vst [vmem:[#allocation10_spill] sm:$0xff] %v7694_v33  ;;  %vm10341_vm6 = vcmask 15360  }
  0x25   : > { %6894 = vmatmul.mubr.msk.bf16.gmra.mxu0 %vm10331_vm2, %v625_v22  ;;  %v10322_v22 = vrot.slane %v7541_v14, 7 }
  0x26   : > { %6897 = vmatprep.mubr.msk.bf16.mxu0 %vm10331_vm2, %v626_v23 }
  0x2d   : > { %6898 = vmatmul.mubr.msk.bf16.gmra.mxu0 %vm10331_vm2, %v627_v28  ;;  %v1481_v28 = vand.u32 15, %v7525_v3 }
  0x2e   : > { %6901 = vmatprep.mubr.msk.bf16.mxu0 %vm10331_vm2, %v628_v29 }
  0x2f   : > { %vm7716_vm4 = vcmp.ne.s32.totalorder %v1481_v28, 0 }
  0x30   : > { %vm7748_vm14 = vmpackc.low %vm7716_vm4, %vm7716_vm4 }
  0x35   : > { %6902 = vmatmul.mubr.msk.bf16.gmra.mxu0 %vm10331_vm2, %v629_v34  ;;  %v7592_v34 = vsel %vm7578_vm3, %v7564_v25, %v10322_v22 }
  0x36   : > { %6905 = vmatprep.mubr.msk.bf16.mxu0 %vm10331_vm2, %v630_v35  ;;  %10474 = vst [vmem:[#allocation6_spill] sm:$0xff] %v7592_v34  ;;  %v7595_v35 = vadd.s32 80, %v7525_v3 }
  0x3d   : > { %6906 = vmatmul.mubr.msk.bf16.gmra.mxu0 %vm10331_vm2, %v631_v40  ;;  %v2909_v40 = vsel %vm2877_vm1, 65537, %v10320_v10 }
  0x3e   : > { %6909 = vmatprep.mubr.msk.bf16.mxu0 %vm10331_vm2, %v632_v41  ;;  %v2945_v54 = vrot.slane %v2909_v40, 7 }
  0x40   : > { %v7635_v2 = vrot.slane %v2945_v54, 4 }
  0x45   : > { %6910 = vmatmul.mubr.msk.bf16.gmra.mxu0 %vm10331_vm2, %v633_v46 }
  0x46   : > { %6913 = vmatprep.mubr.msk.bf16.mxu0 %vm10331_vm2, %v634_v47  ;;  %v7617_v47 = vsel %vm10332_vm8, %v6426_v1, 0  ;;  %v7633_v1 = vadd.s32 192, %v7525_v3 }
  0x4d   : > { %6914 = vmatmul.mubr.msk.bf16.gmra.mxu0 %vm10331_vm2, %v635_v52 }
  0x4e   : > { %6917 = vmatprep.mubr.msk.bf16.mxu0 %vm10331_vm2, %v636_v53  ;;  %v7626_v53 = vadd.s32 176, %v7525_v3 }
  0x55   : > { %6918 = vmatmul.mubr.msk.bf16.gmra.mxu0 %vm10331_vm2, %v637_v56 }
  0xd5   : > { %v548_v20 = vpop.f32.mrf.mxu0 }
  0xd6   : > { %v549_v23 = vadd.f32 %v7546_v15, %v548_v20  ;;  %v7644_v20 = vadd.s32 208, %v7525_v3 }
  0xd7   : > { %v6879_v24 = vpop.f32.mrf.mxu0 }
  0xd8   : > { %v555_v37 = vmul.f32 0.1, %v549_v23  ;;  %v605_v62 = vpop.f32.mrf.mxu1 }
  0xd9   : > { %v551_v32 = vpop.f32.mrf.mxu0  ;;  %v7640_v11 = vadd.f32 %v7546_v15, %v605_v62 }
  0xda   : > { %v552_v38 = vadd.f32 %v7546_v15, %v551_v32  ;;  %v557_v55 = vmax.f32 %v549_v23, %v555_v37  ;;  %v6885_v13 = vpop.f32.mrf.mxu1  ;;  %v7647_v23 = vadd.s32 224, %v7525_v3 }
  0xdb   : > { %v6880_v41 = vpop.f32.mrf.mxu0  ;;  %v7671_v13 = vmul.f32 0.1, %v7640_v11 }
  0xdc   : > { %v556_v46 = vmul.f32 0.1, %v552_v38  ;;  %10475 = vst [vmem:[#allocation7_spill] sm:$0xff] %v7647_v23  ;;  %v7650_v41 = vpop.f32.mrf.mxu1 }
  0xdd   : > { %v6891_v50 = vpop.f32.mrf.mxu0 }
  0xde   : > { %v558_v56 = vmax.f32 %v552_v38, %v556_v46  ;;  %v729_v58 = vadd.f32 %v6891_v50, %v7546_v15  ;;  %v7656_v50 = vsel %vm7578_vm3, %v7564_v25, %v2945_v54  ;;  %v6886_v22 = vpop.f32.mrf.mxu1 }
  0xdf   : > { %v720_v61 = vpop.f32.mrf.mxu0  ;;  %10476 = vst [vmem:[#allocation8_spill] sm:$0xff] %v7656_v50 }
  0xe0   : > { %v559_v4 = vpack.c.bf16 %v558_v56, %v557_v55  ;;  %v849_v5 = vmul.f32 0.1, %v729_v58  ;;  %v721_v6 = vadd.f32 %v7546_v15, %v720_v61  ;;  %v7667_v56 = vsel %vm7578_vm3, %v7564_v25, %v2951_v17 }
  0xe1   : > { %v6892_v9 = vpop.f32.mrf.mxu0  ;;  %10477 = vst [vmem:[#allocation9_spill] sm:$0xff] %v7667_v56 }
  0xe2   : > { %v564_v24 = vmul.bf16 0.0, %v559_v4  ;;  %v881_v32 = vmax.f32 %v729_v58, %v849_v5  ;;  %v847_v37 = vmul.f32 0.1, %v721_v6  ;;  %v732_v38 = vadd.f32 %v6892_v9, %v7546_v15 }
  0xe3   : > { %v723_v40 = vpop.f32.mrf.mxu0 }
  0xe4   : > { %v6324_v58 = vcombine.low %v564_v24, %v564_v24  ;;  %v6325_v61 = vcombine.high %v564_v24, %v564_v24  ;;  %v6670_v62 = vpack.c.bf16 %v881_v32, %v881_v32  ;;  %v879_v4 = vmax.f32 %v721_v6, %v847_v37 }
  0xe5   : > { %v850_v5 = vmul.f32 0.1, %v732_v38  ;;  %v724_v54 = vadd.f32 %v7546_v15, %v723_v40  ;;  %v6895_v9 = vpop.f32.mrf.mxu0 }
  0xe6   : > { %v941_v12 = vshrl.u32 %v6324_v58, 16  ;;  %v944_v55 = vshll.u32 %v6324_v58, 16  ;;  %v949_v46 = vshrl.u32 %v6325_v61, 16  ;;  %v952_v19 = vshll.u32 %v6325_v61, 16 }
  0xe7   : > { %v1069_v7 = vshrl.u32 %v6670_v62, 16  ;;  %v6668_v24 = vpack.c.bf16 %v879_v4, %v879_v4  ;;  %v882_v32 = vmax.f32 %v732_v38, %v850_v5  ;;  %v736_v6 = vpop.f32.mrf.mxu0  ;;  %v1072_v10 = vshll.u32 %v6670_v62, 16  ;;  %v963_v38 = vld [vmem:[#allocation2] sm:$0xf] }
  0xe8   : > { %v943_v40 = vrot.slane %v941_v12, 7  ;;  %v951_v0 = vrot.slane %v949_v46, 7  ;;  %v848_v22 = vmul.f32 0.1, %v724_v54  ;;  %v745_v17 = vadd.f32 %v6895_v9, %v7546_v15 }
  0xe9   : > { %v1071_v58 = vrot.slane %v1069_v7, 7  ;;  %v1052_v4 = vshrl.u32 %v6668_v24, 16  ;;  %v6671_v5 = vpack.c.bf16 %v882_v32, %v882_v32  ;;  %v6896_v59 = vpop.f32.mrf.mxu0  ;;  %v1055_v62 = vshll.u32 %v6668_v24, 16 }
  0xea   : > { %v946_v52 = vor.u32 %v944_v55, %v943_v40  ;;  %v947_v51 = vrot.slane %v943_v40, 4  ;;  %v954_v12 = vor.u32 %v952_v19, %v951_v0  ;;  %v956_v46 = vrot.slane %v951_v0, 4 }
  0xeb   : > { %v1078_v48 = vshrl.u32 %v6671_v5, 16  ;;  %v739_v43 = vpop.f32.mrf.mxu0  ;;  %v1074_v0 = vor.u32 %v1072_v10, %v1071_v58  ;;  %v1054_v24 = vrot.slane %v1052_v4, 7  ;;  %v1081_v40 = vshll.u32 %v6671_v5, 16 }
  0xec   : > { %v955_v9 = vsel %vm7677_vm12, %v947_v51, %v954_v12  ;;  %v969_v19 = vsel %vm7500_vm5, %v956_v46, %v968_v63  ;;  %v964_v55 = vsel %vm7683_vm13, %v946_v52, %v963_v38  ;;  %v880_v7 = vmax.f32 %v724_v54, %v848_v22 }
  0xed   : > { %967 = vst.msk [vmem:[#allocation2 + $0x4] sm:$0xf] %vm10340_vm10, %v955_v9  ;;  %970 = vst [vmem:[#allocation2 + $0x8] sm:$0x1] %v969_v19  ;;  %v7704_v32 = vrot.slane %v1078_v48, 7  ;;  %v6899_v30 = vpop.f32.mrf.mxu0  ;;  %v737_v12 = vadd.f32 %v7546_v15, %v736_v6  ;;  %v748_v10 = vadd.f32 %v6896_v59, %v7546_v15  ;;  %v740_v63 = vadd.f32 %v7546_v15, %v739_v43 }
  0xee   : > { %965 = vst [vmem:[#allocation2] sm:$0xf] %v964_v55  ;;  %v853_v51 = vmul.f32 0.1, %v745_v17  ;;  %v1076_v52 = vrot.slane %v1071_v58, 4  ;;  %v6669_v38 = vpack.c.bf16 %v880_v7, %v880_v7  ;;  %v761_v46 = vadd.f32 %v6899_v30, %v7546_v15 }
  0xef   : > { %v1083_v42 = vor.u32 %v1081_v40, %v7704_v32  ;;  %v752_v9 = vpop.f32.mrf.mxu0  ;;  %v851_v48 = vmul.f32 0.1, %v737_v12  ;;  %v854_v19 = vmul.f32 0.1, %v748_v10  ;;  %v852_v5 = vmul.f32 0.1, %v740_v63 }
  0xf0   : > { %v885_v4 = vmax.f32 %v745_v17, %v853_v51  ;;  %v1057_v54 = vor.u32 %v1055_v62, %v1054_v24  ;;  %v1060_v6 = vshrl.u32 %v6669_v38, 16  ;;  %v857_v55 = vmul.f32 0.1, %v761_v46 }
  0xf1   : > { %v1084_v22 = vsel %vm7677_vm12, %v1076_v52, %v1083_v42  ;;  %v6900_v59 = vpop.f32.mrf.mxu0  ;;  %v883_v58 = vmax.f32 %v737_v12, %v851_v48  ;;  %v886_v40 = vmax.f32 %v748_v10, %v854_v19  ;;  %v884_v7 = vmax.f32 %v740_v63, %v852_v5 }
  0xf2   : > { %1376 = vst.msk [vmem:[#allocation2 + $0x14] sm:$0xf] %vm10340_vm10, %v1084_v22  ;;  %v6674_v43 = vpack.c.bf16 %v885_v4, %v885_v4  ;;  %v1058_v17 = vrot.slane %v1054_v24, 4  ;;  %v1062_v62 = vrot.slane %v1060_v6, 7  ;;  %v1063_v51 = vshll.u32 %v6669_v38, 16 }
  0xf3   : > { %v889_v25 = vmax.f32 %v761_v46, %v857_v55  ;;  %v755_v52 = vpop.f32.mrf.mxu0  ;;  %v6672_v33 = vpack.c.bf16 %v883_v58, %v883_v58  ;;  %v6675_v23 = vpack.c.bf16 %v886_v40, %v886_v40  ;;  %v753_v4 = vadd.f32 %v7546_v15, %v752_v9 }
  0xf4   : > { %v1371_v42 = vld [vmem:[#allocation2 + $0x8] sm:$0xf]  ;;  %v1105_v14 = vshrl.u32 %v6674_v43, 16  ;;  %v1065_v10 = vor.u32 %v1063_v51, %v1062_v62  ;;  %v1067_v63 = vrot.slane %v1062_v62, 4  ;;  %v6673_v28 = vpack.c.bf16 %v884_v7, %v884_v7 }
  0xf5   : > { %v1372_v12 = vsel %vm7683_vm13, %v1057_v54, %v1371_v42  ;;  %v6903_v48 = vpop.f32.mrf.mxu0  ;;  %v1087_v24 = vshrl.u32 %v6672_v33, 16  ;;  %v1114_v5 = vshrl.u32 %v6675_v23, 16  ;;  %v764_v38 = vadd.f32 %v6900_v59, %v7546_v15 }
  0xf6   : > { %1373 = vst [vmem:[#allocation2 + $0x8] sm:$0xf] %v1372_v12  ;;  %v1107_v19 = vrot.slane %v1105_v14, 7  ;;  %v1066_v46 = vsel %vm7677_vm12, %v1058_v17, %v1065_v10  ;;  %v1075_v22 = vsel %vm7677_vm12, %v1067_v63, %v1074_v0  ;;  %v1108_v9 = vshll.u32 %v6674_v43, 16 }
  0xf7   : > { %v1096_v6 = vshrl.u32 %v6673_v28, 16  ;;  %v768_v55 = vpop.f32.mrf.mxu0  ;;  %1374 = vst.msk [vmem:[#allocation2 + $0xc] sm:$0xf] %vm10340_vm10, %v1066_v46  ;;  %1375 = vst.msk [vmem:[#allocation2 + $0x10] sm:$0xf] %vm10340_vm10, %v1075_v22  ;;  %v1089_v54 = vrot.slane %v1087_v24, 7  ;;  %v6678_v62 = vpack.c.bf16 %v889_v25, %v889_v25 }
  0xf8   : > { %v1090_v58 = vshll.u32 %v6672_v33, 16  ;;  %v7730_v14 = vrot.slane %v1114_v5, 7  ;;  %v1117_v40 = vshll.u32 %v6675_v23, 16  ;;  %v1099_v59 = vshll.u32 %v6673_v28, 16 }
  0xf9   : > { %v1098_v7 = vrot.slane %v1096_v6, 7  ;;  %v855_v51 = vmul.f32 0.1, %v753_v4  ;;  %v6904_v17 = vpop.f32.mrf.mxu0  ;;  %v1085_v42 = vrot.slane %v7704_v32, 4  ;;  %v1112_v0 = vrot.slane %v1107_v19, 4 }
  0xfa   : > { %v1092_v43 = vor.u32 %v1090_v58, %v1089_v54  ;;  %v1119_v12 = vor.u32 %v1117_v40, %v7730_v14  ;;  %v1110_v10 = vor.u32 %v1108_v9, %v1107_v19  ;;  %v1094_v63 = vrot.slane %v1089_v54, 4  ;;  %v1925_v6 = vld [vmem:[#allocation2] sm:$0xf] }
  0xfb   : > { %v1101_v46 = vor.u32 %v1099_v59, %v1098_v7  ;;  %v1103_v24 = vrot.slane %v1098_v7, 4  ;;  %v887_v25 = vmax.f32 %v753_v4, %v855_v51  ;;  %v858_v28 = vmul.f32 0.1, %v764_v38  ;;  %v771_v5 = vpop.f32.mrf.mxu0  ;;  %v1926_v59 = vld [vmem:[#allocation2 + $0x4] sm:$0xf] }
  0xfc   : > { %v1093_v33 = vsel %vm7677_vm12, %v1085_v42, %v1092_v43  ;;  %v1120_v23 = vsel %vm7677_vm12, %v1112_v0, %v1119_v12  ;;  %v1141_v22 = vshrl.u32 %v6678_v62, 16  ;;  %v756_v9 = vadd.f32 %v7546_v15, %v755_v52 }
  0xfd   : > { %1377 = vst.msk [vmem:[#allocation2 + $0x18] sm:$0xf] %vm10340_vm10, %v1093_v33  ;;  %1380 = vst.msk [vmem:[#allocation2 + $0x24] sm:$0xf] %vm10340_vm10, %v1120_v23  ;;  %v1102_v32 = vsel %vm7677_vm12, %v1094_v63, %v1101_v46  ;;  %v1111_v19 = vsel %vm7677_vm12, %v1103_v24, %v1110_v10  ;;  %v10485_v4 = vmov 0  ;;  %v6676_v54 = vpack.c.bf16 %v887_v25, %v887_v25 }
  0xfe   : > { %v10486_v4 = vsel %vm7748_vm14, 4294967295, %v10485_v4  ;;  %1378 = vst.msk [vmem:[#allocation2 + $0x1c] sm:$0xf] %vm10340_vm10, %v1102_v32  ;;  %1379 = vst.msk [vmem:[#allocation2 + $0x20] sm:$0xf] %vm10340_vm10, %v1111_v19  ;;  %v890_v58 = vmax.f32 %v764_v38, %v858_v28  ;;  %v777_v40 = vadd.f32 %v6903_v48, %v7546_v15  ;;  %v769_v7 = vadd.f32 %v7546_v15, %v768_v55  ;;  %v6907_v38 = vpop.f32.mrf.mxu0 }
  0xff   : > { %10487 = vst [vmem:[#allocation11_spill] sm:$0xff] %v10486_v4  ;;  %v1121_v52 = vrot.slane %v7730_v14, 4  ;;  %v1144_v51 = vshll.u32 %v6678_v62, 16  ;;  %v856_v30 = vmul.f32 0.1, %v756_v9  ;;  %v7759_v42 = vadd.f32 %v7546_v15, %v7650_v41 }
 0x100   : > { %v1123_v0 = vshrl.u32 %v6676_v54, 16  ;;  %v6679_v43 = vpack.c.bf16 %v890_v58, %v890_v58  ;;  %v861_v12 = vmul.f32 0.1, %v777_v40  ;;  %v2053_v10 = vsel %vm7748_vm14, %v1925_v6, 0  ;;  %v784_v4 = vpop.f32.mrf.mxu0 }
 0x101   : > { %v10488_v48 = vand.u32 15, %v7552_v18  ;;  %v1143_v14 = vrot.slane %v1141_v22, 7  ;;  %v888_v62 = vmax.f32 %v756_v9, %v856_v30  ;;  %v859_v63 = vmul.f32 0.1, %v769_v7 }
 0x102   : > { %v2054_v41 = vsel %vm7529_vm11, %v1926_v59, 0  ;;  %v10491_v46 = vand.u32 15, %v7559_v21  ;;  %v1125_v33 = vrot.slane %v1123_v0, 7  ;;  %v1126_v23 = vshll.u32 %v6676_v54, 16 }
 0x103   : > { %vm7765_vm15 = vcmp.ne.s32.totalorder %v10488_v48, 0  ;;  %v1150_v25 = vshrl.u32 %v6679_v43, 16  ;;  %v893_v18 = vmax.f32 %v777_v40, %v861_v12  ;;  %v6677_v28 = vpack.c.bf16 %v888_v62, %v888_v62 }
 0x104   : > { %vm7773_vm0 = vcmp.ne.s32.totalorder %v10491_v46, 0  ;;  %v891_v32 = vmax.f32 %v769_v7, %v859_v63  ;;  %v6394_v19 = vcombine.low %v2053_v10, %v2054_v41  ;;  %v780_v22 = vadd.f32 %v6904_v17, %v7546_v15  ;;  %vm7806_vm1 = vmpackc.low %vm7765_vm15, %vm7765_vm15 }
 0x105   : > { %v1128_v9 = vor.u32 %v1126_v23, %v1125_v33  ;;  %v1152_v58 = vrot.slane %v1150_v25, 7  ;;  %v1153_v30 = vshll.u32 %v6679_v43, 16  ;;  %v7778_v48 = vpack.c.bf16 %v893_v18, %v893_v18  ;;  %vm7826_vm4 = vmpackc.low %vm7773_vm0, %vm7773_vm0 }
 0x106   : > { %v1146_v21 = vor.u32 %v1144_v51, %v1143_v14  ;;  %v1132_v46 = vshrl.u32 %v6677_v28, 16  ;;  %v6680_v3 = vpack.c.bf16 %v891_v32, %v891_v32  ;;  %6957 = vmatprep.mubr.msk.bf16.mxu0 %vm10341_vm6, %v6394_v19  ;;  %v862_v0 = vmul.f32 0.1, %v780_v22 }
 0x107   : > { %v1148_v54 = vrot.slane %v1143_v14, 4  ;;  %v1129_v40 = vsel %vm7677_vm12, %v1121_v52, %v1128_v9  ;;  %v1130_v7 = vrot.slane %v1125_v33, 4  ;;  %v1155_v12 = vor.u32 %v1153_v30, %v1152_v58  ;;  %v6908_v14 = vpop.f32.mrf.mxu0  ;;  %v7794_v30 = vld [vmem:[#allocation2 + $0x8] sm:$0xf] }
 0x108   : > { %1381 = vst.msk [vmem:[#allocation2 + $0x28] sm:$0xf] %vm10340_vm10, %v1129_v40  ;;  %v1134_v17 = vrot.slane %v1132_v46, 7  ;;  %v1135_v10 = vshll.u32 %v6677_v28, 16  ;;  %v1177_v43 = vshrl.u32 %v7778_v48, 16  ;;  %v1159_v62 = vshrl.u32 %v6680_v3, 16 }
 0x109   : > { %v1156_v51 = vsel %vm7677_vm12, %v1148_v54, %v1155_v12  ;;  %v1162_v63 = vshll.u32 %v6680_v3, 16  ;;  %v894_v41 = vmax.f32 %v780_v22, %v862_v0  ;;  %v772_v23 = vadd.f32 %v7546_v15, %v771_v5  ;;  %v7801_v0 = vld [vmem:[#allocation2 + $0xc] sm:$0xf]  ;;  %v7821_v40 = vld [vmem:[#allocation2 + $0x10] sm:$0xf] }
 0x10a   : > { %1384 = vst.msk [vmem:[#allocation2 + $0x34] sm:$0xf] %vm10340_vm10, %v1156_v51  ;;  %v1137_v52 = vor.u32 %v1135_v10, %v1134_v17  ;;  %v1139_v33 = vrot.slane %v1134_v17, 4  ;;  %v7789_v25 = vrot.slane %v1159_v62, 7  ;;  %v793_v18 = vadd.f32 %v6907_v38, %v7546_v15  ;;  %10501 = vst [vmem:[#allocation14_spill] sm:$0xff] %v7821_v40 }
 0x10b   : > { %v1157_v28 = vrot.slane %v1152_v58, 4  ;;  %v7792_v32 = vcombine.low %v1925_v6, %v1926_v59  ;;  %v6683_v19 = vpack.c.bf16 %v894_v41, %v894_v41  ;;  %v860_v9 = vmul.f32 0.1, %v772_v23  ;;  %v7843_v41 = vld [vmem:[#allocation2 + $0x14] sm:$0xf] }
 0x10c   : > { %v1138_v3 = vsel %vm7677_vm12, %v1130_v7, %v1137_v52  ;;  %v1147_v5 = vsel %vm7677_vm12, %v1139_v33, %v1146_v21  ;;  %v1179_v22 = vrot.slane %v1177_v43, 7  ;;  %v1164_v46 = vor.u32 %v1162_v63, %v7789_v25 }
 0x10d   : > { %v10494_v6 = vmov 0  ;;  %v10497_v59 = vsel %vm7578_vm3, %v7568_v26, %v7548_v16  ;;  %v10498_v38 = vmov 0  ;;  %1382 = vst.msk [vmem:[#allocation2 + $0x2c] sm:$0xf] %vm10340_vm10, %v1138_v3  ;;  %1383 = vst.msk [vmem:[#allocation2 + $0x30] sm:$0xf] %vm10340_vm10, %v1147_v5  ;;  %v892_v21 = vmax.f32 %v772_v23, %v860_v9  ;;  %v787_v26 = vpop.f32.mrf.mxu0 }
 0x10e   : > { %v10495_v6 = vsel %vm7806_vm1, 4294967295, %v10494_v6  ;;  %vm7815_vm9 = vcmp.ne.s16.totalorder %v10497_v59, 0  ;;  %v1186_v58 = vshrl.u32 %v6683_v19, 16  ;;  %v1189_v55 = vshll.u32 %v6683_v19, 16 }
 0x10f   : > { %10496 = vst [vmem:[#allocation12_spill] sm:$0xff] %v10495_v6  ;;  %v10499_v38 = vsel %vm7815_vm9, 4294967295, %v10498_v38  ;;  %v865_v54 = vmul.f32 0.1, %v793_v18  ;;  %v10502_v7 = vmov 0  ;;  %v1165_v12 = vsel %vm7677_vm12, %v1157_v28, %v1164_v46  ;;  %v6911_v5 = vpop.f32.mrf.mxu0 }
 0x110   : > { %10500 = vst [vmem:[#allocation13_spill] sm:$0xff] %v10499_v38  ;;  %v10503_v7 = vsel %vm7826_vm4, 4294967295, %v10502_v7  ;;  %v785_v17 = vadd.f32 %v7546_v15, %v784_v4  ;;  %v796_v10 = vadd.f32 %v6908_v14, %v7546_v15  ;;  %v2055_v43 = vsel %vm7806_vm1, %v7794_v30, 0  ;;  %1385 = vst.msk [vmem:[#allocation2 + $0x38] sm:$0xf] %vm10340_vm10, %v1165_v12 }
 0x111   : > { %10504 = vst [vmem:[#allocation15_spill] sm:$0xff] %v10503_v7  ;;  %v7838_v24 = vrot.slane %v1186_v58, 7  ;;  %v6681_v62 = vpack.c.bf16 %v892_v21, %v892_v21  ;;  %v897_v51 = vmax.f32 %v793_v18, %v865_v54  ;;  %v2056_v63 = vsel %vm7529_vm11, %v7801_v0, 0  ;;  %v7937_v7 = vld [vmem:[#allocation2 + $0x20] sm:$0xf] }
 0x112   : > { %v863_v23 = vmul.f32 0.1, %v785_v17  ;;  %v866_v4 = vmul.f32 0.1, %v796_v10  ;;  %v6395_v52 = vcombine.low %v2055_v43, %v2056_v63  ;;  %v2057_v14 = vsel %vm7826_vm4, %v7821_v40, 0 }
 0x113   : > { %v10505_v33 = vand.u32 15, %v7571_v27  ;;  %v1180_v18 = vshll.u32 %v7778_v48, 16  ;;  %v1184_v19 = vrot.slane %v1179_v22, 4  ;;  %v1191_v9 = vor.u32 %v1189_v55, %v7838_v24 }
 0x114   : > { %v1168_v3 = vshrl.u32 %v6681_v62, 16  ;;  %v6686_v46 = vpack.c.bf16 %v897_v51, %v897_v51  ;;  %v895_v59 = vmax.f32 %v785_v17, %v863_v23  ;;  %v898_v58 = vmax.f32 %v796_v10, %v866_v4  ;;  %6958 = vmatmul.mubr.msk.bf16.vlgmr.msra.gmra.mxu0 %vm10341_vm6, %v6395_v52  ;;  %v800_v52 = vpop.f32.mrf.mxu0 }
 0x115   : > { %vm7850_vm15 = vcmp.ne.s32.totalorder %v10505_v33, 0  ;;  %v2058_v27 = vsel %vm7529_vm11, %v7843_v41, 0  ;;  %v1192_v21 = vsel %vm7677_vm12, %v1184_v19, %v1191_v9  ;;  %v1171_v12 = vshll.u32 %v6681_v62, 16 }
 0x116   : > { %v1170_v54 = vrot.slane %v1168_v3, 7  ;;  %v6396_v48 = vcombine.low %v2057_v14, %v2058_v27  ;;  %1388 = vst.msk [vmem:[#allocation2 + $0x44] sm:$0xf] %vm10340_vm10, %v1192_v21  ;;  %v1213_v55 = vshrl.u32 %v6686_v46, 16  ;;  %v1216_v43 = vshll.u32 %v6686_v46, 16  ;;  %vm7901_vm8 = vmpackc.low %vm7850_vm15, %vm7850_vm15 }
 0x117   : > { %v6684_v63 = vpack.c.bf16 %v895_v59, %v895_v59  ;;  %v6687_v51 = vpack.c.bf16 %v898_v58, %v898_v58  ;;  %v1182_v17 = vor.u32 %v1180_v18, %v1179_v22  ;;  %v1166_v10 = vrot.slane %v7789_v25, 4 }
 0x118   : > { %v1173_v23 = vor.u32 %v1171_v12, %v1170_v54  ;;  %v1175_v4 = vrot.slane %v1170_v54, 4  ;;  %6961 = vmatprep.mubr.msk.bf16.mxu0 %vm10341_vm6, %v6396_v48  ;;  %v1193_v33 = vrot.slane %v7838_v24, 4  ;;  %v1215_v19 = vrot.slane %v1213_v55, 7  ;;  %v6912_v12 = vpop.f32.mrf.mxu0 }
 0x119   : > { %v1195_v9 = vshrl.u32 %v6684_v63, 16  ;;  %v1222_v62 = vshrl.u32 %v6687_v51, 16  ;;  %v1198_v46 = vshll.u32 %v6684_v63, 16  ;;  %vm10342_vm0 = vsmask.f32 7424 }
 0x11a   : > { %v1174_v14 = vsel %vm7677_vm12, %v1166_v10, %v1173_v23  ;;  %v1183_v3 = vsel %vm7677_vm12, %v1175_v4, %v1182_v17  ;;  %v7875_v22 = vor.u32 %v1216_v43, %v1215_v19  ;;  %v1225_v59 = vshll.u32 %v6687_v51, 16  ;;  %v7895_v17 = vld [vmem:[#allocation2 + $0x18] sm:$0xf] }
 0x11b   : > { %1386 = vst.msk [vmem:[#allocation2 + $0x3c] sm:$0xf] %vm10340_vm10, %v1174_v14  ;;  %1387 = vst.msk [vmem:[#allocation2 + $0x40] sm:$0xf] %vm10340_vm10, %v1183_v3  ;;  %v7877_v24 = vrot.slane %v1195_v9, 7  ;;  %v7879_v18 = vrot.slane %v1222_v62, 7  ;;  %v788_v27 = vadd.f32 %v7546_v15, %v787_v26  ;;  %v809_v21 = vadd.f32 %v6911_v5, %v7546_v15 }
 0x11c   : > { %v1220_v58 = vrot.slane %v1215_v19, 4  ;;  %v6362_v54 = vcombine.low %v7794_v30, %v7801_v0  ;;  %v10508_v48 = vand.u32 15, %v7584_v31  ;;  %v2174_v26 = vshrl.u32 %v7792_v32, 16 }
 0x11d   : > { %v1200_v43 = vor.u32 %v1198_v46, %v7877_v24  ;;  %v1227_v51 = vor.u32 %v1225_v59, %v7879_v18  ;;  %v864_v5 = vmul.f32 0.1, %v788_v27  ;;  %v869_v10 = vmul.f32 0.1, %v809_v21  ;;  %v7912_v59 = vld [vmem:[#allocation2 + $0x1c] sm:$0xf] }
 0x11e   : > { %vm7887_vm2 = vcmp.ne.s32.totalorder %v10508_v48, 0  ;;  %v2176_v23 = vshll.u32 %v7792_v32, 16  ;;  %v2181_v4 = vshll.u32 %v6362_v54, 16  ;;  %v10511_v31 = vmov 0  ;;  %v803_v48 = vpop.f32.mrf.mxu0 }
 0x11f   : > { %v10512_v31 = vsel %vm7901_vm8, 4294967295, %v10511_v31  ;;  %v1201_v19 = vsel %vm7677_vm12, %v1193_v33, %v1200_v43  ;;  %v1228_v9 = vsel %vm7677_vm12, %v1220_v58, %v1227_v51  ;;  %v2185_v62 = vshrl.u32 %v6362_v54, 16 }
 0x120   : > { %10513 = vst [vmem:[#allocation16_spill] sm:$0xff] %v10512_v31  ;;  %v801_v14 = vadd.f32 %v7546_v15, %v800_v52  ;;  %1389 = vst.msk [vmem:[#allocation2 + $0x48] sm:$0xf] %vm10340_vm10, %v1201_v19  ;;  %v896_v32 = vmax.f32 %v788_v27, %v864_v5  ;;  %v901_v28 = vmax.f32 %v809_v21, %v869_v10  ;;  %v2178_v3 = vrot.slane %v2176_v23, 1 }
 0x121   : > { %1392 = vst.msk [vmem:[#allocation2 + $0x54] sm:$0xf] %vm10340_vm10, %v1228_v9  ;;  %v2183_v46 = vrot.slane %v2181_v4, 1  ;;  %v6363_v33 = vcombine.low %v7821_v40, %v7843_v41  ;;  %v812_v58 = vadd.f32 %v6912_v12, %v7546_v15  ;;  %v2059_v52 = vsel %vm7901_vm8, %v7895_v17, 0  ;;  %vm7942_vm10 = vmpackc.low %vm7887_vm2, %vm7887_vm2 }
 0x122   : > { %v867_v25 = vmul.f32 0.1, %v801_v14  ;;  %v6685_v54 = vpack.c.bf16 %v896_v32, %v896_v32  ;;  %v6690_v43 = vpack.c.bf16 %v901_v28, %v901_v28  ;;  %v2179_v51 = vor.u32 %v2178_v3, %v2174_v26  ;;  %v6915_v28 = vpop.f32.mrf.mxu0 }
 0x123   : > { %v2187_v27 = vor.u32 %v2185_v62, %v2183_v46  ;;  %v10514_v21 = vand.u32 15, %v7595_v35  ;;  %v2189_v23 = vshll.u32 %v6363_v33, 16  ;;  %v870_v4 = vmul.f32 0.1, %v812_v58 }
 0x124   : > { %v899_v10 = vmax.f32 %v801_v14, %v867_v25  ;;  %v2060_v12 = vsel %vm7529_vm11, %v7912_v59, 0  ;;  %v1204_v19 = vshrl.u32 %v6685_v54, 16  ;;  %v1207_v9 = vshll.u32 %v6685_v54, 16  ;;  %v816_v55 = vpop.f32.mrf.mxu0 }
 0x125   : > { %vm7922_vm15 = vcmp.ne.s32.totalorder %v10514_v21, 0  ;;  %v1249_v63 = vshrl.u32 %v6690_v43, 16  ;;  %v1252_v32 = vshll.u32 %v6690_v43, 16  ;;  %v2184_v26 = vsel %vm10342_vm0, %v2179_v51, %v2183_v46  ;;  %v7949_v46 = vld [vmem:[%s10317_s5 + $0x4] sm:$0x1] }
 0x126   : > { %v6688_v62 = vpack.c.bf16 %v899_v10, %v899_v10  ;;  %v2191_v35 = vrot.slane %v2189_v23, 1  ;;  %v902_v3 = vmax.f32 %v812_v58, %v870_v4  ;;  %v1206_v21 = vrot.slane %v1204_v19, 7  ;;  %6923 = vmatprep.mubr.msk.bf16.mxu1 %vm10341_vm6, %v2184_v26 }
 0x127   : > { %v1251_v31 = vrot.slane %v1249_v63, 7  ;;  %v6397_v25 = vcombine.low %v2059_v52, %v2060_v12  ;;  %v7933_v14 = vcombine.low %v7895_v17, %v7912_v59  ;;  %v1229_v40 = vrot.slane %v7879_v18, 4  ;;  %v7958_v12 = vld [vmem:[#allocation2 + $0x24] sm:$0xf] }
 0x128   : > { %v1231_v54 = vshrl.u32 %v6688_v62, 16  ;;  %v2192_v43 = vsel %vm10342_vm0, %v2187_v27, %v2191_v35  ;;  %v6691_v38 = vpack.c.bf16 %v902_v3, %v902_v3  ;;  %v10517_v63 = vmov 0 }
 0x129   : > { %v10518_v63 = vsel %vm7942_vm10, 4294967295, %v10517_v63  ;;  %v1209_v58 = vor.u32 %v1207_v9, %v1206_v21  ;;  %v1211_v18 = vrot.slane %v1206_v21, 4  ;;  %v7951_v52 = vor.u32 %v1252_v32, %v1251_v31  ;;  %6924 = vmatmul.mubr.msk.bf16.vlgmr.msra.gmra.mxu1 %vm10341_vm6, %v2192_v43  ;;  %6962 = vmatmul.mubr.msk.bf16.gmra.mxu0 %vm10341_vm6, %v6397_v25  ;;  %v6916_v43 = vpop.f32.mrf.mxu0 }
 0x12a   : > { %v1234_v51 = vshll.u32 %v6688_v62, 16  ;;  %v1256_v27 = vrot.slane %v1251_v31, 4  ;;  %v7955_v10 = vrot.slane %v1231_v54, 7  ;;  %6990 = vmatpush3.bf16.msra.mxu1 %v7617_v47  ;;  %v1258_v23 = vshrl.u32 %v6691_v38, 16 }
 0x12b   : > { %v2193_v4 = vshrl.u32 %v6363_v33, 16  ;;  %v10519_v19 = vand.u32 15, %v7598_v36  ;;  %v10522_v32 = vrot.slane %v7877_v24, 4  ;;  %v1219_v31 = vsel %vm7677_vm12, %v1211_v18, %v7875_v22 }
 0x12c   : > { %v2197_v47 = vshll.u32 %v7933_v14, 16  ;;  %v2061_v33 = vsel %vm7942_vm10, %v7937_v7, 0  ;;  %vm10523_vm6 = vcmask 1040384   ;;  %vm10524_vm0 = vcmask 11264  }
 0x12d   : > { %vm7962_vm2 = vcmp.ne.s32.totalorder %v10519_v19, 0  ;;  %v1210_v26 = vsel %vm7677_vm12, %v10522_v32, %v1209_v58  ;;  %7232 = vmatprep.subr.msk.bf16.mxu1 %vm10523_vm6, %v7949_v46  ;;  %vm10525_vm8 = vmmov %vm10524_vm0  ;;  %v1236_v36 = vor.u32 %v1234_v51, %v7955_v10  ;;  %v7982_v24 = vrot.slane %v1258_v23, 7  ;;  %v8005_v19 = vld [vmem:[#allocation2 + $0x2c] sm:$0xf] }
 0x12e   : > { %1390 = vst.msk [vmem:[#allocation2 + $0x4c] sm:$0xf] %vm10524_vm0, %v1210_v26  ;;  %v1261_v62 = vshll.u32 %v6691_v38, 16  ;;  %v2195_v3 = vor.u32 %v2193_v4, %v2191_v35  ;;  %v2199_v22 = vrot.slane %v2197_v47, 1  ;;  %v2062_v21 = vsel %vm7529_vm11, %v7958_v12, 0  ;;  %vm10530_vm6 = vmmov %vm10524_vm0 }
 0x12f   : > { %1391 = vst.msk [vmem:[#allocation2 + $0x50] sm:$0xf] %vm10525_vm8, %v1219_v31  ;;  %v804_v25 = vadd.f32 %v7546_v15, %v803_v48  ;;  %v825_v54 = vadd.f32 %v6915_v28, %v7546_v15  ;;  %v1237_v58 = vsel %vm7677_vm12, %v1229_v40, %v1236_v36  ;;  %v6398_v23 = vcombine.low %v2061_v33, %v2062_v21  ;;  %v7993_v38 = vld [vmem:[#allocation2 + $0x28] sm:$0xf]  ;;  %vm7998_vm8 = vmpackc.low %vm7922_vm15, %vm7922_vm15  ;;  %v819_v36 = vpop.f32.mrf.mxu0 }
 0x130   : > { %v1263_v51 = vor.u32 %v1261_v62, %v7982_v24  ;;  %10526 = vst [vmem:[#allocation17_spill] sm:$0xff] %v7993_v38  ;;  %v10527_v35 = vmov 0  ;;  %1393 = vst.msk [vmem:[#allocation2 + $0x58] sm:$0xf] %vm10530_vm6, %v1237_v58  ;;  %vm10531_vm0 = vsmask.f32 7424  ;;  %v817_v4 = vadd.f32 %v7546_v15, %v816_v55 }
 0x131   : > { %v10528_v35 = vsel %vm7998_vm8, 4294967295, %v10527_v35  ;;  %v2200_v48 = vsel %vm10531_vm0, %v2195_v3, %v2199_v22  ;;  %v868_v28 = vmul.f32 0.1, %v804_v25  ;;  %v873_v40 = vmul.f32 0.1, %v825_v54  ;;  %10532 = vst [vmem:[#allocation19_spill] sm:$0xff] %v8005_v19  ;;  %vm10535_vm15 = vmmov %vm10530_vm6 }
 0x132   : > { %10529 = vst [vmem:[#allocation18_spill] sm:$0xff] %v10528_v35  ;;  %v1264_v32 = vsel %vm7677_vm12, %v1256_v27, %v1263_v51  ;;  %vm10533_vm10 = vcmask 15360   ;;  %v6365_v5 = vcombine.low %v7937_v7, %v7958_v12  ;;  %v2201_v26 = vshrl.u32 %v7933_v14, 16  ;;  %vm8039_vm6 = vmpackc.low %vm7962_vm2, %vm7962_vm2 }
 0x133   : > { %6927 = vmatprep.mubr.msk.bf16.mxu1 %vm10533_vm10, %v2200_v48  ;;  %vm10534_vm9 = vmmov %vm10533_vm10  ;;  %v828_v31 = vadd.f32 %v6916_v43, %v7546_v15  ;;  %1396 = vst.msk [vmem:[#allocation2 + $0x64] sm:$0xf] %vm10535_vm15, %v1264_v32  ;;  %v900_v47 = vmax.f32 %v804_v25, %v868_v28  ;;  %v905_v55 = vmax.f32 %v825_v54, %v873_v40  ;;  %v871_v33 = vmul.f32 0.1, %v817_v4 }
 0x134   : > { %6965 = vmatprep.mubr.msk.bf16.mxu0 %vm10534_vm9, %v6398_v23  ;;  %v2063_v27 = vsel %vm7998_vm8, %v7993_v38, 0  ;;  %v2203_v62 = vor.u32 %v2201_v26, %v2199_v22  ;;  %v2205_v3 = vshll.u32 %v6365_v5, 16  ;;  %v2064_v58 = vsel %vm7529_vm11, %v8005_v19, 0  ;;  %vm10543_vm15 = vmmov %vm10534_vm9 }
 0x135   : > { %v874_v21 = vmul.f32 0.1, %v828_v31  ;;  %v10536_v14 = vand.u32 15, %v7602_v39  ;;  %v6689_v25 = vpack.c.bf16 %v900_v47, %v900_v47  ;;  %v6694_v54 = vpack.c.bf16 %v905_v55, %v905_v55 }
 0x136   : > { %v903_v51 = vmax.f32 %v817_v4, %v871_v33  ;;  %v6399_v23 = vcombine.low %v2063_v27, %v2064_v58  ;;  %v1265_v48 = vrot.slane %v7982_v24, 4  ;;  %v2207_v28 = vrot.slane %v2205_v3, 1  ;;  %v6919_v24 = vpop.f32.mrf.mxu0  ;;  %v8046_v58 = vld [vmem:[#allocation2 + $0x34] sm:$0xf] }
 0x137   : > { %vm8024_vm10 = vcmp.ne.s32.totalorder %v10536_v14, 0  ;;  %v906_v22 = vmax.f32 %v828_v31, %v874_v21  ;;  %v8031_v40 = vcombine.low %v7993_v38, %v8005_v19  ;;  %v1240_v32 = vshrl.u32 %v6689_v25, 16  ;;  %v8034_v14 = vld [vmem:[#allocation2 + $0x30] sm:$0xf]  ;;  %10544 = vst [vmem:[#allocation22_spill] sm:$0xff] %v8046_v58 }
 0x138   : > { %v1285_v26 = vshrl.u32 %v6694_v54, 16  ;;  %v1288_v18 = vshll.u32 %v6694_v54, 16  ;;  %6966 = vmatmul.mubr.msk.bf16.gmra.mxu0 %vm10534_vm9, %v6399_v23  ;;  %v2209_v39 = vshrl.u32 %v6365_v5, 16  ;;  %10539 = vst [vmem:[#allocation20_spill] sm:$0xff] %v8034_v14  ;;  %v10540_v4 = vmov 0 }
 0x139   : > { %v10541_v4 = vsel %vm8039_vm6, 4294967295, %v10540_v4  ;;  %v1243_v31 = vshll.u32 %v6689_v25, 16  ;;  %v6692_v47 = vpack.c.bf16 %v903_v51, %v903_v51  ;;  %v2208_v55 = vsel %vm10531_vm0, %v2203_v62, %v2207_v28 }
 0x13a   : > { %10542 = vst [vmem:[#allocation21_spill] sm:$0xff] %v10541_v4  ;;  %v6695_v33 = vpack.c.bf16 %v906_v22, %v906_v22  ;;  %v1242_v27 = vrot.slane %v1240_v32, 7  ;;  %v1287_v3 = vrot.slane %v1285_v26, 7  ;;  %6928 = vmatmul.mubr.msk.bf16.gmra.mxu1 %vm10543_vm15, %v2208_v55  ;;  %v2211_v5 = vor.u32 %v2209_v39, %v2207_v28  ;;  %v832_v32 = vpop.f32.mrf.mxu0 }
 0x13b   : > { %v2213_v21 = vshll.u32 %v8031_v40, 16  ;;  %v1267_v9 = vshrl.u32 %v6692_v47, 16  ;;  %v1270_v54 = vshll.u32 %v6692_v47, 16  ;;  %v2065_v25 = vsel %vm8039_vm6, %v8034_v14, 0 }
 0x13c   : > { %v1294_v23 = vshrl.u32 %v6695_v33, 16  ;;  %v1245_v51 = vor.u32 %v1243_v31, %v1242_v27  ;;  %v1247_v38 = vrot.slane %v1242_v27, 4  ;;  %v8051_v62 = vor.u32 %v1288_v18, %v1287_v3 }
 0x13d   : > { %v1297_v22 = vshll.u32 %v6695_v33, 16  ;;  %v8053_v26 = vrot.slane %v1267_v9, 7  ;;  %v2215_v39 = vrot.slane %v2213_v21, 1  ;;  %v2066_v47 = vsel %vm7529_vm11, %v8046_v58, 0 }
 0x13e   : > { %v8055_v28 = vrot.slane %v1294_v23, 7  ;;  %v10545_v55 = vrot.slane %v7955_v10, 4  ;;  %v1255_v18 = vsel %vm7677_vm12, %v1247_v38, %v7951_v52  ;;  %v6400_v31 = vcombine.low %v2065_v25, %v2066_v47 }
 0x13f   : > { %v820_v33 = vadd.f32 %v7546_v15, %v819_v36  ;;  %vm10546_vm2 = vcmask 11264   ;;  %v1292_v27 = vrot.slane %v1287_v3, 4  ;;  %v1272_v21 = vor.u32 %v1270_v54, %v8053_v26  ;;  %v8079_v15 = vld [vmem:[%s10316_s4] ss:$0 sm:$0xff]  ;;  %v8082_v36 = vld [vmem:[#allocation2 + $0x38] sm:$0xf] }
 0x140   : > { %v1246_v19 = vsel %vm7677_vm12, %v10545_v55, %v1245_v51  ;;  %vm10547_vm9 = vmmov %vm10546_vm2  ;;  %v1299_v10 = vor.u32 %v1297_v22, %v8055_v28  ;;  %v2216_v23 = vsel %vm10531_vm0, %v2211_v5, %v2215_v39  ;;  %6969 = vmatprep.mubr.msk.bf16.mxu0 %vm10543_vm15, %v6400_v31  ;;  %v613_v52 = vmul.f32 0.1, %v7759_v42  ;;  %v8105_v55 = vld [vmem:[#allocation2 + $0x3c] sm:$0xf] }
 0x141   : > { %1394 = vst.msk [vmem:[#allocation2 + $0x5c] sm:$0xf] %vm10546_vm2, %v1246_v19  ;;  %v872_v51 = vmul.f32 0.1, %v820_v33  ;;  %v841_v38 = vadd.f32 %v8079_v15, %v6919_v24  ;;  %v6920_v19 = vpop.f32.mrf.mxu0  ;;  %vm8087_vm2 = vmpackc.low %vm8024_vm10, %vm8024_vm10  ;;  %v10548_v3 = vmov 0  ;;  %v1273_v5 = vsel %vm7677_vm12, %v1265_v48, %v1272_v21 }
 0x142   : > { %1395 = vst.msk [vmem:[#allocation2 + $0x60] sm:$0xf] %vm10547_vm9, %v1255_v18  ;;  %v10549_v3 = vsel %vm8087_vm2, 4294967295, %v10548_v3  ;;  %v1300_v54 = vsel %vm7677_vm12, %v1292_v27, %v1299_v10  ;;  %vm10551_vm9 = vmmov %vm10543_vm15  ;;  %v833_v24 = vadd.f32 %v8079_v15, %v832_v32  ;;  %v8099_v25 = vcombine.low %v8034_v14, %v8046_v58 }
 0x143   : > { %10550 = vst [vmem:[#allocation23_spill] sm:$0xff] %v10549_v3  ;;  %6931 = vmatprep.mubr.msk.bf16.mxu1 %vm10551_vm9, %v2216_v23  ;;  %vm10552_vm0 = vcmask 11264   ;;  %v904_v43 = vmax.f32 %v820_v33, %v872_v51  ;;  %v615_v22 = vmax.f32 %v7759_v42, %v613_v52  ;;  %v877_v47 = vmul.f32 0.1, %v841_v38 }
 0x144   : > { %1397 = vst.msk [vmem:[#allocation2 + $0x68] sm:$0xf] %vm10552_vm0, %v1273_v5  ;;  %vm10553_vm10 = vmmov %vm10552_vm0  ;;  %v2217_v48 = vshrl.u32 %v8031_v40, 16  ;;  %v10554_v18 = vand.u32 15, %v7611_v44  ;;  %v875_v31 = vmul.f32 0.1, %v833_v24  ;;  %v844_v21 = vadd.f32 %v8079_v15, %v6920_v19 }
 0x145   : > { %1400 = vst.msk [vmem:[#allocation2 + $0x74] sm:$0xf] %vm10553_vm10, %v1300_v54  ;;  %v2221_v27 = vshll.u32 %v8099_v25, 16  ;;  %v2067_v42 = vsel %vm8087_vm2, %v8082_v36, 0  ;;  %v6693_v33 = vpack.c.bf16 %v904_v43, %v904_v43  ;;  %v10557_v40 = vmax.f32 %v7640_v11, %v7671_v13 }
 0x146   : > { %vm8109_vm15 = vcmp.ne.s32.totalorder %v10554_v18, 0  ;;  %v909_v23 = vmax.f32 %v841_v38, %v877_v47  ;;  %v2219_v44 = vor.u32 %v2217_v48, %v2215_v39  ;;  %v907_v51 = vmax.f32 %v833_v24, %v875_v31 }
 0x147   : > { %v616_v10 = vpack.c.bf16 %v615_v22, %v10557_v40  ;;  %v8121_v52 = vrot.slane %v2221_v27, 1  ;;  %v878_v5 = vmul.f32 0.1, %v844_v21  ;;  %v2068_v54 = vsel %vm7529_vm11, %v8105_v55, 0  ;;  %vm8168_vm8 = vmpackc.low %vm8109_vm15, %vm8109_vm15 }
 0x148   : > { %v1276_v19 = vshrl.u32 %v6693_v33, 16  ;;  %v1279_v18 = vshll.u32 %v6693_v33, 16  ;;  %v6698_v58 = vpack.c.bf16 %v909_v23, %v909_v23  ;;  %v10558_v43 = vand.u32 15, %v7614_v45 }
 0x149   : > { %v621_v9 = vmul.bf16 0.0, %v616_v10  ;;  %v6696_v11 = vpack.c.bf16 %v907_v51, %v907_v51  ;;  %vm10561_vm0 = vsmask.f32 7424  ;;  %v910_v39 = vmax.f32 %v844_v21, %v878_v5 }
 0x14a   : > { %vm8128_vm9 = vcmp.ne.s32.totalorder %v10558_v43, 0  ;;  %v2224_v13 = vsel %vm10561_vm0, %v2219_v44, %v8121_v52  ;;  %v6401_v38 = vcombine.low %v2067_v42, %v2068_v54  ;;  %v1278_v24 = vrot.slane %v1276_v19, 7 }
 0x14b   : > { %v6358_v22 = vcombine.low %v621_v9, %v621_v9  ;;  %v6359_v47 = vcombine.high %v621_v9, %v621_v9  ;;  %v1321_v48 = vshrl.u32 %v6698_v58, 16  ;;  %vm10562_vm10 = vcmask 15360  }
 0x14c   : > { %6932 = vmatmul.mubr.msk.bf16.gmra.mxu1 %vm10562_vm10, %v2224_v13  ;;  %v10563_v31 = vand.u32 15, %v7621_v49  ;;  %v1324_v27 = vshll.u32 %v6698_v58, 16  ;;  %v1303_v33 = vshrl.u32 %v6696_v11, 16  ;;  %v1306_v40 = vshll.u32 %v6696_v11, 16  ;;  %vm10566_vm6 = vmmov %vm10562_vm10 }
 0x14d   : > { %v6699_v10 = vpack.c.bf16 %v910_v39, %v910_v39  ;;  %6970 = vmatmul.mubr.msk.bf16.gmra.mxu0 %vm10566_vm6, %v6401_v38  ;;  %v1281_v21 = vor.u32 %v1279_v18, %v1278_v24  ;;  %v1283_v42 = vrot.slane %v1278_v24, 4  ;;  %v1414_v23 = vshrl.u32 %v6358_v22, 16  ;;  %v1437_v38 = vld [vmem:[#allocation2 + $0x90] sm:$0x1] }
 0x14e   : > { %vm8137_vm2 = vcmp.ne.s32.totalorder %v10563_v31, 0  ;;  %v1417_v44 = vshll.u32 %v6358_v22, 16  ;;  %v10567_v9 = vand.u32 15, %v7626_v53  ;;  %v1422_v49 = vshrl.u32 %v6359_v47, 16  ;;  %v8163_v22 = vld [vmem:[#allocation2 + $0x40] sm:$0xf] }
 0x14f   : > { %v1425_v5 = vshll.u32 %v6359_v47, 16  ;;  %v1323_v54 = vrot.slane %v1321_v48, 7  ;;  %v8148_v19 = vrot.slane %v1303_v33, 7  ;;  %v10570_v58 = vrot.slane %v8053_v26, 4  ;;  %v8174_v33 = vld [vmem:[#allocation2 + $0x44] sm:$0xf] }
 0x150   : > { %vm8144_vm0 = vcmp.ne.s32.totalorder %v10567_v9, 0  ;;  %v1291_v18 = vsel %vm7677_vm12, %v1283_v42, %v8051_v62  ;;  %v1416_v11 = vrot.slane %v1414_v23, 7  ;;  %v1330_v53 = vshrl.u32 %v6699_v10, 16  ;;  %v1405_v23 = vld [vmem:[#allocation2 + $0x88] sm:$0x1] }
 0x151   : > { %v1282_v43 = vsel %vm7677_vm12, %v10570_v58, %v1281_v21  ;;  %v1301_v13 = vrot.slane %v8055_v28, 4  ;;  %vm10571_vm6 = vcmask 11264   ;;  %v1424_v39 = vrot.slane %v1422_v49, 7 }
 0x152   : > { %1398 = vst.msk [vmem:[#allocation2 + $0x6c] sm:$0xf] %vm10571_vm6, %v1282_v43  ;;  %vm10572_vm10 = vmmov %vm10571_vm6  ;;  %v8160_v24 = vor.u32 %v1324_v27, %v1323_v54  ;;  %v1308_v26 = vor.u32 %v1306_v40, %v8148_v19  ;;  %v10573_v62 = vmov 0  ;;  %v8172_v28 = vor.u32 %v1417_v44, %v1416_v11 }
 0x153   : > { %1399 = vst.msk [vmem:[#allocation2 + $0x70] sm:$0xf] %vm10572_vm10, %v1291_v18  ;;  %v10574_v62 = vsel %vm8168_vm8, 4294967295, %v10573_v62  ;;  %v1420_v47 = vrot.slane %v1416_v11, 4  ;;  %v1328_v48 = vrot.slane %v1323_v54, 4  ;;  %v1332_v31 = vrot.slane %v1330_v53, 7  ;;  %vm8205_vm10 = vmpackc.low %vm8128_vm9, %vm8128_vm9 }
 0x154   : > { %10575 = vst [vmem:[#allocation24_spill] sm:$0xff] %v10574_v62  ;;  %v1427_v27 = vor.u32 %v1425_v5, %v1424_v39  ;;  %v1429_v21 = vrot.slane %v1424_v39, 4  ;;  %v1309_v40 = vsel %vm7677_vm12, %v1301_v13, %v1308_v26  ;;  %v1333_v42 = vshll.u32 %v6699_v10, 16  ;;  %v835_v10 = vpop.f32.mrf.mxu0  ;;  %v8198_v11 = vld [vmem:[#allocation2 + $0x48] sm:$0xf]  ;;  %vm10585_vm9 = vmmov %vm10571_vm6 }
 0x155   : > { %v10576_v32 = vand.u32 15, %v7633_v1  ;;  %1401 = vst.msk [vmem:[#allocation2 + $0x78] sm:$0xf] %vm10571_vm6, %v1309_v40  ;;  %v1337_v44 = vrot.slane %v1332_v31, 4  ;;  %v6368_v49 = vcombine.low %v8082_v36, %v8105_v55  ;;  %v2225_v5 = vshrl.u32 %v8099_v25, 16 }
 0x156   : > { %v2069_v54 = vsel %vm8168_vm8, %v8163_v22, 0  ;;  %v1428_v1 = vsel %vm7677_vm12, %v1420_v47, %v1427_v27  ;;  %v1438_v58 = vsel %vm7500_vm5, %v1429_v21, %v1437_v38  ;;  %v1335_v43 = vor.u32 %v1333_v42, %v1332_v31  ;;  %v8200_v53 = vld [vmem:[#allocation2 + $0x4c] sm:$0xf]  ;;  %v8218_v21 = vld [vmem:[#allocation2 + $0x50] sm:$0xf] }
 0x157   : > { %vm8180_vm15 = vcmp.ne.s32.totalorder %v10576_v32, 0  ;;  %v2070_v18 = vsel %vm7529_vm11, %v8174_v33, 0  ;;  %v10579_v25 = vmov 0  ;;  %1436 = vst.msk [vmem:[#allocation2 + $0x8c] sm:$0xf] %vm10571_vm6, %v1428_v1  ;;  %v1406_v13 = vsel %vm7500_vm5, %v1337_v44, %v1405_v23  ;;  %vm8223_vm5 = vmpackc.low %vm8137_vm2, %vm8137_vm2 }
 0x158   : > { %v10580_v25 = vsel %vm8205_vm10, 4294967295, %v10579_v25  ;;  %1439 = vst [vmem:[#allocation2 + $0x90] sm:$0x1] %v1438_v58  ;;  %v2227_v39 = vor.u32 %v2225_v5, %v8121_v52  ;;  %v2229_v38 = vshll.u32 %v6368_v49, 16  ;;  %v6402_v26 = vcombine.low %v2069_v54, %v2070_v18  ;;  %1407 = vst [vmem:[#allocation2 + $0x88] sm:$0x1] %v1406_v13 }
 0x159   : > { %10581 = vst [vmem:[#allocation25_spill] sm:$0xff] %v10580_v25  ;;  %v1336_v47 = vsel %vm7677_vm12, %v1328_v48, %v1335_v43  ;;  %v836_v14 = vadd.f32 %v8079_v15, %v835_v10  ;;  %v6369_v31 = vcombine.low %v8163_v22, %v8174_v33  ;;  %v2233_v27 = vshrl.u32 %v6368_v49, 16  ;;  %v8237_v40 = vld [vmem:[#allocation2 + $0x54] sm:$0xf]  ;;  %v8240_v49 = vld [vmem:[#allocation2 + $0x58] sm:$0xf] }
 0x15a   : > { %v10583_v57 = vsel %vm8223_vm5, 4294967295, %v10582_v57  ;;  %1404 = vst.msk [vmem:[#allocation2 + $0x84] sm:$0xf] %vm10585_vm9, %v1336_v47  ;;  %v2231_v52 = vrot.slane %v2229_v38, 1  ;;  %vm10586_vm6 = vcmask 15360   ;;  %v2071_v15 = vsel %vm8205_vm10, %v8198_v11, 0  ;;  %vm8245_vm9 = vmpackc.low %vm8144_vm0, %vm8144_vm0 }
 0x15b   : > { %10584 = vst [vmem:[#allocation26_spill] sm:$0xff] %v10583_v57  ;;  %6973 = vmatprep.mubr.msk.bf16.mxu0 %vm10586_vm6, %v6402_v26  ;;  %v2072_v48 = vsel %vm7529_vm11, %v8200_v53, 0  ;;  %v6370_v45 = vcombine.low %v8198_v11, %v8200_v53  ;;  %v876_v42 = vmul.f32 0.1, %v836_v14  ;;  %v2237_v23 = vshll.u32 %v6369_v31, 16 }
 0x15c   : > { %v6403_v32 = vcombine.low %v2071_v15, %v2072_v48  ;;  %v2241_v44 = vshrl.u32 %v6369_v31, 16  ;;  %v10587_v5 = vmov 0  ;;  %v10590_v54 = vand.u32 15, %v7644_v20 }
 0x15d   : > { %v10588_v5 = vsel %vm8245_vm9, 4294967295, %v10587_v5  ;;  %vm10593_vm2 = vsmask.f32 7424  ;;  %v2235_v58 = vor.u32 %v2233_v27, %v2231_v52  ;;  %v2245_v43 = vshll.u32 %v6370_v45, 16 }
 0x15e   : > { %10589 = vst [vmem:[#allocation27_spill] sm:$0xff] %v10588_v5  ;;  %vm8251_vm6 = vcmp.ne.s32.totalorder %v10590_v54, 0  ;;  %v2232_v1 = vsel %vm10593_vm2, %v2227_v39, %v2231_v52  ;;  %v2073_v18 = vsel %vm8223_vm5, %v8218_v21, 0  ;;  %vm10594_vm10 = vcmask 15360   ;;  %v8266_v39 = vld [vmem:[#allocation2 + $0x5c] sm:$0xf] }
 0x15f   : > { %6935 = vmatprep.mubr.msk.bf16.mxu1 %vm10594_vm10, %v2232_v1  ;;  %v908_v51 = vmax.f32 %v836_v14, %v876_v42  ;;  %v2239_v13 = vrot.slane %v2237_v23, 1  ;;  %vm10595_vm0 = vmmov %vm10594_vm10  ;;  %v2074_v20 = vsel %vm7529_vm11, %v8237_v40, 0  ;;  %v6371_v38 = vcombine.low %v8218_v21, %v8237_v40  ;;  %v1441_v14 = vld [vmem:[#allocation2 + $0x90] sm:$0x1]  ;;  %v8272_v23 = vld [vmem:[#allocation2 + $0x64] sm:$0xf] }
 0x160   : > { %6974 = vmatmul.mubr.msk.bf16.gmra.mxu0 %vm10595_vm0, %v6403_v32  ;;  %v2247_v26 = vrot.slane %v2245_v43, 1  ;;  %v6404_v47 = vcombine.low %v2073_v18, %v2074_v20  ;;  %v2249_v31 = vshrl.u32 %v6370_v45, 16  ;;  %v2075_v27 = vsel %vm8245_vm9, %v8240_v49, 0  ;;  %vm10596_vm10 = vmmov %vm10593_vm2  ;;  %v1433_v54 = vld [vmem:[#allocation2 + $0x88] sm:$0xf] }
 0x161   : > { %v6697_v52 = vpack.c.bf16 %v908_v51, %v908_v51  ;;  %v2240_v15 = vsel %vm10596_vm10, %v2235_v58, %v2239_v13  ;;  %v2243_v48 = vor.u32 %v2241_v44, %v2239_v13  ;;  %v2253_v42 = vshll.u32 %v6371_v38, 16  ;;  %vm10597_vm2 = vmmov %vm10595_vm0  ;;  %v8283_v44 = vld [vmem:[#allocation2 + $0x60] sm:$0xf] }
 0x162   : > { %v1442_v32 = vsel %vm7507_vm7, 0, %v1441_v14  ;;  %6936 = vmatmul.mubr.msk.bf16.gmra.mxu1 %vm10597_vm2, %v2240_v15  ;;  %6977 = vmatprep.mubr.msk.bf16.mxu0 %vm10595_vm0, %v6404_v47  ;;  %v2251_v45 = vor.u32 %v2249_v31, %v2247_v26  ;;  %v2076_v1 = vsel %vm7529_vm11, %v8266_v39, 0  ;;  %v6372_v58 = vcombine.low %v8240_v49, %v8266_v39  ;;  %vm8288_vm10 = vmpackc.low %vm8180_vm15, %vm8180_vm15 }
 0x163   : > { %v10599_v60 = vsel %vm8288_vm10, 4294967295, %v10598_v60  ;;  %1443 = vst [vmem:[#allocation2 + $0x90] sm:$0x1] %v1442_v32  ;;  %v1434_v43 = vsel %vm7683_vm13, %v8172_v28, %v1433_v54  ;;  %v1312_v18 = vshrl.u32 %v6697_v52, 16  ;;  %v1315_v51 = vshll.u32 %v6697_v52, 16  ;;  %vm10602_vm2 = vmmov %vm10595_vm0 }
 0x164   : > { %10600 = vst [vmem:[#allocation28_spill] sm:$0xff] %v10599_v60  ;;  %vm10601_vm7 = vsmask.f32 7424  ;;  %1435 = vst [vmem:[#allocation2 + $0x88] sm:$0xf] %v1434_v43  ;;  %v2255_v20 = vrot.slane %v2253_v42, 1  ;;  %v6405_v47 = vcombine.low %v2075_v27, %v2076_v1  ;;  %v6373_v28 = vcombine.low %v8283_v44, %v8272_v23 }
 0x165   : > { %v2248_v13 = vsel %vm10601_vm7, %v2243_v48, %v2247_v26  ;;  %v2257_v9 = vshrl.u32 %v6371_v38, 16  ;;  %v2261_v31 = vshll.u32 %v6372_v58, 16  ;;  %v1314_v14 = vrot.slane %v1312_v18, 7  ;;  %v8306_v26 = vld [vmem:[#allocation2 + $0x6c] sm:$0xf]  ;;  %vm8334_vm9 = vmpackc.low %vm8251_vm6, %vm8251_vm6 }
 0x166   : > { %6939 = vmatprep.mubr.msk.bf16.mxu1 %vm10602_vm2, %v2248_v13  ;;  %v2077_v15 = vsel %vm8288_vm10, %v8283_v44, 0  ;;  %v2078_v61 = vsel %vm7529_vm11, %v8272_v23, 0  ;;  %10603 = vst [vmem:[#allocation29_spill] sm:$0xff] %v8306_v26  ;;  %v1310_v38 = vrot.slane %v8148_v19, 4  ;;  %v2265_v54 = vshrl.u32 %v6372_v58, 16 }
 0x167   : > { %v2259_v27 = vor.u32 %v2257_v9, %v2255_v20  ;;  %v2263_v52 = vrot.slane %v2261_v31, 1  ;;  %v6406_v48 = vcombine.low %v2077_v15, %v2078_v61  ;;  %v1317_v42 = vor.u32 %v1315_v51, %v1314_v14  ;;  %v8311_v43 = vld [vmem:[#allocation2 + $0x68] sm:$0xf]  ;;  %v8340_v9 = vld [vmem:[#allocation2 + $0x70] sm:$0xf] }
 0x168   : > { %v1319_v32 = vrot.slane %v1314_v14, 4  ;;  %6978 = vmatmul.mubr.msk.bf16.gmra.mxu0 %vm10595_vm0, %v6405_v47  ;;  %v2269_v1 = vshll.u32 %v6373_v28, 16  ;;  %10604 = vst [vmem:[#allocation30_spill] sm:$0xff] %v8311_v43  ;;  %v10605_v18 = vsel %vm7578_vm3, %v7635_v2, %v7548_v16  ;;  %v10606_v13 = vmov 0  ;;  %10616 = vst [vmem:[#allocation33_spill] sm:$0xff] %v8340_v9 }
 0x169   : > { %vm8318_vm7 = vcmp.ne.s16.totalorder %v10605_v18, 0  ;;  %vm10380_vm2 = vcmp.ne.s16.totalorder %v7667_v56, 0  ;;  %vm10609_vm13 = vcmp.ne.s16.totalorder %v7592_v34, 0  ;;  %vm10610_vm0 = vsmask.f32 7424 }
 0x16a   : > { %v10607_v13 = vsel %vm8318_vm7, 4294967295, %v10606_v13  ;;  %v8326_v19 = vsel %vm10609_vm13, %v7843_v41, 0  ;;  %v2256_v58 = vsel %vm10610_vm0, %v2251_v45, %v2255_v20  ;;  %vm10611_vm15 = vmmov %vm10610_vm0  ;;  %vm10612_vm10 = vcmask 15360   ;;  %v8342_v41 = vld [vmem:[#allocation2 + $0x74] sm:$0xf] }
 0x16b   : > { %10608 = vst [vmem:[#allocation31_spill] sm:$0xff] %v10607_v13  ;;  %v2264_v51 = vsel %vm10611_vm15, %v2259_v27, %v2263_v52  ;;  %6981 = vmatprep.mubr.msk.bf16.mxu0 %vm10612_vm10, %v6406_v48  ;;  %v10613_v2 = vmov 0  ;;  %v6374_v47 = vcombine.low %v8311_v43, %v8306_v26  ;;  %10617 = vst [vmem:[#allocation34_spill] sm:$0xff] %v8342_v41  ;;  %v1318_v45 = vsel %vm7677_vm12, %v1310_v38, %v1317_v42  ;;  %v10621_v27 = vld [vmem:[#allocation7_spill] sm:$0xff]  ;;  %v2811_v48 = vld [vmem:[#allocation2] sm:$0xe] }
 0x16c   : > { %v10614_v2 = vsel %vm8334_vm9, 4294967295, %v10613_v2  ;;  %v1327_v20 = vsel %vm7677_vm12, %v1319_v32, %v8160_v24  ;;  %v2267_v10 = vor.u32 %v2265_v54, %v2263_v52  ;;  %v2271_v31 = vrot.slane %v2269_v1, 1  ;;  %v3467_v32 = vld [vmem:[#allocation2 + $0x8] sm:$0xf]  ;;  %v3474_v13 = vld [vmem:[#allocation2 + $0x24] sm:$0xf] }
 0x16d   : > { %10615 = vst [vmem:[#allocation32_spill] sm:$0xff] %v10614_v2  ;;  %vm10618_vm6 = vcmask 11264   ;;  %vm10620_vm15 = vcmask 15360   ;;  %v2080_v14 = vsel %vm7529_vm11, %v8306_v26, 0  ;;  %v2273_v15 = vshrl.u32 %v6373_v28, 16 }
 0x16e   : > { %1402 = vst.msk [vmem:[#allocation2 + $0x7c] sm:$0xf] %vm10618_vm6, %v1318_v45  ;;  %vm10619_vm10 = vmmov %vm10618_vm6  ;;  %6940 = vmatmul.mubr.msk.bf16.gmra.mxu1 %vm10620_vm15, %v2256_v58  ;;  %v2277_v61 = vshll.u32 %v6374_v47, 16  ;;  %v10622_v38 = vand.u32 15, %v10621_v27  ;;  %v2079_v37 = vsel %vm8334_vm9, %v8311_v43, 0  ;;  %v10624_v24 = vmov 0 }
 0x16f   : > { %1403 = vst.msk [vmem:[#allocation2 + $0x80] sm:$0xf] %vm10619_vm10, %v1327_v20  ;;  %vm10623_vm0 = vmmov %vm10620_vm15  ;;  %v2082_v52 = vsel %vm7529_vm11, %v8342_v41, 0  ;;  %v6375_v28 = vcombine.low %v8340_v9, %v8342_v41  ;;  %v2281_v42 = vshrl.u32 %v6374_v47, 16  ;;  %v2275_v54 = vor.u32 %v2273_v15, %v2271_v31  ;;  %v10627_v58 = vld [vmem:[#allocation3_spill] sm:$0xff] }
 0x170   : > { %vm1889_vm13 = vcmp.ne.s32.totalorder %v10622_v38, 0  ;;  %6943 = vmatprep.mubr.msk.bf16.mxu1 %vm10623_vm0, %v2264_v51  ;;  %v2279_v1 = vrot.slane %v2277_v61, 1  ;;  %v1475_v51 = vadd.s32 240, %v10627_v58  ;;  %v3468_v45 = vld [vmem:[#allocation2 + $0xc] sm:$0xf]  ;;  %v6407_v27 = vcombine.low %v2079_v37, %v2080_v14  ;;  %vm10632_vm15 = vmmov %vm10623_vm0 }
 0x171   : > { %vm8361_vm12 = vmpackc.low %vm1889_vm13, %vm1889_vm13  ;;  %vm10628_vm6 = vsmask.f32 7424  ;;  %v2285_v34 = vshll.u32 %v6375_v28, 16  ;;  %v3499_v15 = vsel %vm7748_vm14, %v3467_v32, 0  ;;  %v8381_v61 = vld [vmem:[%s10317_s5 + $0x5] sm:$0x1] }
 0x172   : > { %v10625_v24 = vsel %vm8361_vm12, 4294967295, %v10624_v24  ;;  %v2081_v18 = vsel %vm8361_vm12, %v8340_v9, 0  ;;  %v2272_v20 = vsel %vm10628_vm6, %v2267_v10, %v2271_v31  ;;  %vm10629_vm10 = vmmov %vm10628_vm6  ;;  %v2283_v26 = vor.u32 %v2281_v42, %v2279_v1  ;;  %10631 = vst [vmem:[#allocation3_spill] sm:$0xff] %v8381_v61  ;;  %6982 = vmatmul.mubr.msk.bf16.gmra.mxu0 %vm10632_vm15, %v6407_v27  ;;  %v7311_v31 = vld [vmem:[%s10317_s5 + $0x3] sm:$0x1] }
 0x173   : > { %10626 = vst [vmem:[#allocation7_spill] sm:$0xff] %v10625_v24  ;;  %v6408_v38 = vcombine.low %v2081_v18, %v2082_v52  ;;  %v2280_v43 = vsel %vm10629_vm10, %v2275_v54, %v2279_v1  ;;  %v1691_v41 = vand.u32 15, %v1475_v51  ;;  %v2287_v9 = vrot.slane %v2285_v34, 1  ;;  %v3469_v52 = vld [vmem:[#allocation2 + $0x10] sm:$0xf]  ;;  %vm10635_vm6 = vmmov %vm10632_vm15 }
 0x174   : > { %v3500_v10 = vsel %vm7529_vm11, %v3468_v45, 0  ;;  %vm10633_vm13 = vcmask 1040384   ;;  %vm10634_vm0 = vcmp.ne.s16.totalorder %v7548_v16, 0  ;;  %v8393_v42 = vld [vmem:[#allocation2 + $0x78] sm:$0xf]  ;;  %vm10636_vm15 = vcmp.ne.s16.totalorder %v7656_v50, 0 }
 0x175   : > { %v3662_v14 = vsel %vm10633_vm13, %v7311_v31, 0  ;;  %v3071_v37 = vsel %vm10634_vm0, %v2811_v48, 0  ;;  %6985 = vmatprep.mubr.msk.bf16.mxu0 %vm10635_vm6, %v6408_v38  ;;  %vm1891_vm10 = vcmp.ne.s32.totalorder %v1691_v41, 0  ;;  %v7312_v34 = vld [vmem:[#allocation2 + $0x4] sm:$0xf]  ;;  %v3073_v54 = vsel %vm8318_vm7, %v7794_v30, 0 }
 0x176   : > { %7024 = vmatpush3.bf16.msra.mxu0 %v3662_v14  ;;  %v3072_v32 = vsel %vm10636_vm15, %v7312_v34, 0  ;;  %v3074_v1 = vsel %vm10380_vm2, %v7801_v0, 0  ;;  %v8403_v48 = vld [vmem:[#allocation2 + $0x7c] sm:$0xf]  ;;  %vm8405_vm13 = vmpackc.low %vm1891_vm10, %vm1891_vm10  ;;  %v10637_v18 = vmov 0  ;;  %v2289_v41 = vshrl.u32 %v6375_v28, 16  ;;  %6944 = vmatmul.mubr.msk.bf16.gmra.mxu1 %vm10635_vm6, %v2272_v20 }
 0x177   : > { %v10638_v18 = vsel %vm8405_vm13, 4294967295, %v10637_v18  ;;  %v6461_v51 = vcombine.low %v3499_v15, %v3500_v10  ;;  %v8409_v45 = vld [vmem:[#allocation2 + $0x80] sm:$0x1]  ;;  %v6427_v27 = vcombine.low %v3071_v37, %v3072_v32  ;;  %v6428_v38 = vcombine.low %v3073_v54, %v3074_v1  ;;  %v3470_v15 = vld [vmem:[#allocation2 + $0x14] sm:$0xf]  ;;  %vm10643_vm10 = vmmov %vm10635_vm6 }
 0x178   : > { %10639 = vst [vmem:[#allocation35_spill] sm:$0xff] %v10638_v18  ;;  %10640 = vst [vmem:[#allocation36_spill] sm:$0xff] %v8409_v45  ;;  %vm10641_vm0 = vcmask 1040384   ;;  %vm10642_vm15 = vsmask.f32 7424  ;;  %v2084_v0 = vsel %vm7529_vm11, %v8403_v48, 0  ;;  %v6376_v31 = vcombine.low %v8393_v42, %v8403_v48  ;;  %6947 = vmatprep.mubr.msk.bf16.mxu1 %vm10643_vm10, %v2280_v43 }
 0x179   : > { %7233 = vmatprep.subr.msk.bf16.mxu0 %vm10641_vm0, %v8381_v61  ;;  %v2288_v30 = vsel %vm10642_vm15, %v2283_v26, %v2287_v9  ;;  %v6377_v28 = vcombine.low %v8409_v45, %v8409_v45  ;;  %v3472_v10 = vld [vmem:[#allocation2 + $0x1c] sm:$0xf]  ;;  %v2291_v14 = vor.u32 %v2289_v41, %v2287_v9  ;;  %vm10381_vm0 = vcmask 1046528   ;;  %v3471_v34 = vld [vmem:[#allocation2 + $0x18] sm:$0xf]  ;;  %vm10653_vm2 = vmmov %vm10635_vm6 }
 0x17a   : > { %v3190_v37 = vrot.slane %v6427_v27, 1  ;;  %v3191_v20 = vrot.slane %v6428_v38, 1  ;;  %v2083_v26 = vsel %vm8405_vm13, %v8393_v42, 0  ;;  %v2293_v32 = vshll.u32 %v6376_v31, 16  ;;  %v3473_v9 = vld [vmem:[#allocation2 + $0x20] sm:$0xf] }
 0x17b   : > { %v2301_v54 = vshll.u32 %v6377_v28, 16  ;;  %v3501_v1 = vsel %vm7806_vm1, %v3469_v52, 0  ;;  %v6409_v47 = vcombine.low %v2083_v26, %v2084_v0  ;;  %v2297_v45 = vshrl.u32 %v6376_v31, 16  ;;  %v10645_v0 = vld [vmem:[#allocation13_spill] sm:$0xff]  ;;  %v10647_v31 = vld [vmem:[#allocation14_spill] sm:$0xff] }
 0x17c   : > { %v8429_v61 = vsel %vm10381_vm0, %v3190_v37, %v3191_v20  ;;  %v3504_v43 = vsel %vm7529_vm11, %v3472_v10, 0  ;;  %v2295_v41 = vrot.slane %v2293_v32, 1  ;;  %v3502_v38 = vsel %vm7529_vm11, %v3470_v15, 0  ;;  %v10649_v10 = vld [vmem:[#allocation10_spill] sm:$0xff]  ;;  %v3861_v24 = vld [vmem:[#allocation2 + $0x18] sm:$0xf] }
 0x17d   : > { %v2303_v27 = vrot.slane %v2301_v54, 1  ;;  %v3503_v28 = vsel %vm7826_vm4, %v3471_v34, 0  ;;  %6986 = vmatmul.mubr.msk.bf16.gmra.mxu0 %vm10635_vm6, %v6409_v47  ;;  %v6462_v52 = vcombine.low %v3501_v1, %v3502_v38  ;;  %vm10646_vm15 = vnez %v10645_v0  ;;  %v10650_v54 = vld [vmem:[#allocation4_spill] sm:$0xff]  ;;  %v3476_v15 = vld [vmem:[#allocation2 + $0x2c] sm:$0xf] }
 0x17e   : > { %v10648_v37 = vsel %vm10646_vm15, %v10647_v31, 0  ;;  %v1530_v32 = vand.u32 15, %v10649_v10  ;;  %v10651_v6 = vrot.slane %v10650_v54, 7  ;;  %vm10652_vm10 = vsmask.f32 7424  ;;  %7025 = vmatprep.mubr.msk.bf16.mxu0 %vm10653_vm2, %v6461_v51  ;;  %v10654_v1 = vld [vmem:[#allocation16_spill] sm:$0xff] }
 0x17f   : > { %v8443_v26 = vcombine.low %v10648_v37, %v8326_v19  ;;  %v2296_v56 = vsel %vm10652_vm10, %v2291_v14, %v2295_v41  ;;  %v2299_v34 = vor.u32 %v2297_v45, %v2295_v41  ;;  %v6463_v47 = vcombine.low %v3503_v28, %v3504_v43  ;;  %v3475_v0 = vld [vmem:[#allocation2 + $0x28] sm:$0xf]  ;;  %v3478_v37 = vld [vmem:[#allocation2 + $0x34] sm:$0xf]  ;;  %vm10656_vm10 = vmmov %vm10653_vm2 }
 0x180   : > { %v2959_v50 = vrot.slane %v10651_v6, 4  ;;  %vm10655_vm6 = vnez %v10654_v1  ;;  %vm1900_vm0 = vcmp.ne.s32.totalorder %v1530_v32, 15  ;;  %v3506_v6 = vsel %vm7529_vm11, %v3474_v13, 0  ;;  %6948 = vmatmul.mubr.msk.bf16.gmra.mxu1 %vm10656_vm10, %v2288_v30  ;;  %v3477_v43 = vld [vmem:[#allocation2 + $0x30] sm:$0xf]  ;;  %vm10660_vm1 = vmmov %vm10656_vm10 }
 0x181   : > { %v3505_v38 = vsel %vm10655_vm6, %v3473_v9, 0  ;;  %v3193_v31 = vrot.slane %v8443_v26, 1  ;;  %vm10657_vm2 = vcmask 1040384   ;;  %vm2883_vm4 = vmpackc.low %vm1900_vm0, %vm1900_vm0  ;;  %v10658_v45 = vmov 0  ;;  %6951 = vmatprep.mubr.msk.bf16.mxu1 %vm10660_vm1, %v2296_v56  ;;  %v3479_v28 = vld [vmem:[#allocation2 + $0x38] sm:$0xf] }
 0x182   : > { %v2961_v19 = vsel %vm7578_vm3, %v2959_v50, %v7548_v16  ;;  %v8461_v51 = vsel %vm10657_vm2, %v7949_v46, 0  ;;  %v8467_v14 = vcombine.low %v3505_v38, %v3506_v6  ;;  %v3508_v50 = vsel %vm7529_vm11, %v3476_v15, 0  ;;  %v3480_v54 = vld [vmem:[#allocation2 + $0x3c] sm:$0xf]  ;;  %v10666_v38 = vld [vmem:[#allocation5_spill] sm:$0xff]  ;;  %v10777_v18 = vld [vmem:[#allocation6_spill] sm:$0xff] }
 0x183   : > { %vm8463_vm6 = vcmp.ne.s16.totalorder %v2961_v19, 0  ;;  %vm10661_vm14 = vsmask.f32 7424  ;;  %vm10662_vm10 = vcmask 1046528   ;;  %v10663_v30 = vmov 0  }
 0x184   : > { %v10659_v45 = vsel %vm8463_vm6, 4294967295, %v10658_v45  ;;  %v2304_v13 = vsel %vm10661_vm14, %v2299_v34, %v2303_v27  ;;  %v8476_v46 = vsel %vm10662_vm10, %v3191_v20, %v3193_v31  ;;  %v2915_v9 = vsel %vm2883_vm4, 65537, %v10663_v30  ;;  %vm10668_vm10 = vmmov %vm10660_vm1 }
 0x185   : > { %vm10664_vm0 = vnez %v10518_v63  ;;  %v2963_v10 = vrot.slane %v2915_v9, 7  ;;  %v3077_v32 = vsel %vm8463_vm6, %v7895_v17, 0  ;;  %v1454_v56 = vadd.s32 72, %v10627_v58  ;;  %7026 = vmatmul.mubr.msk.bf16.vlgmr.msra.gmra.mxu0 %vm10660_vm1, %v6462_v52 }
 0x186   : > { %v3507_v41 = vsel %vm10664_vm0, %v3475_v0, 0  ;;  %v1456_v27 = vadd.s32 88, %v10627_v58  ;;  %vm10665_vm14 = vnez %v10528_v35  ;;  %v3510_v34 = vsel %vm7529_vm11, %v3478_v37, 0  ;;  %7029 = vmatprep.mubr.msk.bf16.mxu0 %vm10668_vm10, %v6463_v47 }
 0x187   : > { %v6465_v15 = vcombine.low %v3507_v41, %v3508_v50  ;;  %v3509_v20 = vsel %vm10665_vm14, %v3477_v43, 0  ;;  %v1458_v0 = vadd.s32 104, %v10627_v58  ;;  %v8494_v19 = vsel %vm7578_vm3, %v10666_v38, %v2963_v10 }
 0x188   : > { %v1544_v17 = vand.u32 15, %v1454_v56  ;;  %v2965_v6 = vrot.slane %v2963_v10, 4  ;;  %v1558_v9 = vand.u32 15, %v1456_v27  ;;  %vm10385_vm4 = vcmp.ne.s16.totalorder %v8494_v19, 0 }
 0x189   : > { %vm10667_vm2 = vnez %v10541_v4  ;;  %v3512_v37 = vsel %vm7529_vm11, %v3480_v54, 0  ;;  %v1572_v43 = vand.u32 15, %v1458_v0  ;;  %v3078_v41 = vsel %vm10385_vm4, %v7912_v59, 0  ;;  %v3481_v54 = vld [vmem:[#allocation2 + $0x40] sm:$0xf] }
 0x18a   : > { %v3511_v50 = vsel %vm10667_vm2, %v3479_v28, 0  ;;  %vm1902_vm14 = vcmp.ne.s32.totalorder %v1544_v17, 15  ;;  %v2967_v52 = vsel %vm7578_vm3, %v2965_v6, %v7548_v16  ;;  %vm8509_vm1 = vcmp.ne.s32.totalorder %v1558_v9, 15  ;;  %v3482_v28 = vld [vmem:[#allocation2 + $0x44] sm:$0xf] }
 0x18b   : > { %v8513_v56 = vcombine.low %v3077_v32, %v3078_v41  ;;  %vm2885_vm2 = vmpackc.low %vm1902_vm14, %vm1902_vm14  ;;  %vm8515_vm0 = vcmp.ne.s16.totalorder %v2967_v52, 0  ;;  %vm8519_vm10 = vcmp.ne.s32.totalorder %v1572_v43, 15  ;;  %v1460_v59 = vadd.s32 120, %v10627_v58 }
 0x18c   : > { %vm10675_vm4 = vcmask 15360   ;;  %v2917_v0 = vsel %vm2885_vm2, 65537, %v10663_v30  ;;  %v3079_v32 = vsel %vm8515_vm0, %v7937_v7, 0  ;;  %vm2887_vm14 = vmpackc.low %vm8509_vm1, %vm8509_vm1  ;;  %v8532_v17 = vcombine.low %v3509_v20, %v3510_v34 }
 0x18d   : > { %6952 = vmatmul.mubr.msk.bf16.gmra.mxu1 %vm10675_vm4, %v2304_v13  ;;  %v8534_v6 = vcombine.low %v3511_v50, %v3512_v37  ;;  %vm10676_vm6 = vmmov %vm10675_vm4  ;;  %v3195_v9 = vrot.slane %v8513_v56, 1  ;;  %v2969_v13 = vrot.slane %v2917_v0, 7  ;;  %v2919_v43 = vsel %vm2887_vm14, 65537, %v10663_v30 }
 0x18e   : > { %6991 = vmatprep.mubr.msk.bf16.mxu1 %vm10676_vm6, %v8429_v61  ;;  %vm2889_vm4 = vmpackc.low %vm8519_vm10, %vm8519_vm10  ;;  %v1586_v7 = vand.u32 15, %v1460_v59  ;;  %v2975_v41 = vrot.slane %v2919_v43, 7  ;;  %vm10677_vm2 = vnez %v10549_v3  ;;  %v3514_v34 = vsel %vm7529_vm11, %v3482_v28, 0  ;;  %v3483_v43 = vld [vmem:[#allocation2 + $0x48] sm:$0xf] }
 0x18f   : > { %v2921_v52 = vsel %vm2889_vm4, 65537, %v10663_v30  ;;  %v3513_v20 = vsel %vm10677_vm2, %v3481_v54, 0  ;;  %vm10678_vm6 = vcmask 1046528   ;;  %v8554_v50 = vsel %vm7578_vm3, %v10666_v38, %v2969_v13  ;;  %v10685_v54 = vld [vmem:[#allocation19_spill] sm:$0xff] }
 0x190   : > { %v3196_v61 = vsel %vm10678_vm6, %v3193_v31, %v3195_v9  ;;  %v2971_v37 = vrot.slane %v2969_v13, 4  ;;  %v2981_v10 = vrot.slane %v2921_v52, 7  ;;  %vm10394_vm1 = vcmp.ne.s16.totalorder %v8554_v50, 0 }
 0x191   : > { %v8560_v56 = vsel %vm7578_vm3, %v10666_v38, %v2975_v41  ;;  %v2977_v47 = vrot.slane %v2975_v41, 4  ;;  %vm8562_vm10 = vcmp.ne.s32.totalorder %v1586_v7, 15  ;;  %vm10681_vm14 = vcmask 15360   ;;  %v3484_v7 = vld [vmem:[#allocation2 + $0x4c] sm:$0xf]  ;;  %v10686_v41 = vld [vmem:[#allocation17_spill] sm:$0xff] }
 0x192   : > { %7030 = vmatmul.mubr.msk.bf16.gmra.mxu0 %vm10681_vm14, %v8467_v14  ;;  %v3080_v26 = vsel %vm10394_vm1, %v7958_v12, 0  ;;  %v2973_v31 = vsel %vm7578_vm3, %v2971_v37, %v7548_v16  ;;  %vm10388_vm4 = vcmp.ne.s16.totalorder %v8560_v56, 0  ;;  %v8578_v59 = vsel %vm7578_vm3, %v10666_v38, %v2981_v10  ;;  %vm2891_vm6 = vmpackc.low %vm8562_vm10, %vm8562_vm10  ;;  %v8606_v37 = vld [vmem:[%s10317_s5 + $0x6] sm:$0x1] }
 0x193   : > { %7033 = vmatprep.mubr.msk.bf16.mxu0 %vm10681_vm14, %v6465_v15  ;;  %v6431_v14 = vcombine.low %v3079_v32, %v3080_v26  ;;  %vm8584_vm2 = vcmp.ne.s16.totalorder %v2973_v31, 0  ;;  %v10682_v12 = vmov 0  ;;  %v3082_v0 = vsel %vm10388_vm4, %v10685_v54, 0  ;;  %v10690_v26 = vld [vmem:[#allocation20_spill] sm:$0xff]  ;;  %v10691_v54 = vld [vmem:[#allocation22_spill] sm:$0xff] }
 0x194   : > { %v10683_v12 = vsel %vm8584_vm2, 4294967295, %v10682_v12  ;;  %v2979_v13 = vsel %vm7578_vm3, %v2977_v47, %v7548_v16  ;;  %v3081_v52 = vsel %vm8584_vm2, %v10686_v41, 0  ;;  %v10687_v15 = vmov 0 }
 0x195   : > { %10684 = vst [vmem:[#allocation14_spill] sm:$0xff] %v10683_v12  ;;  %vm8597_vm10 = vcmp.ne.s16.totalorder %v2979_v13, 0  ;;  %vm10393_vm14 = vcmp.ne.s16.totalorder %v8578_v59, 0  ;;  %v2923_v32 = vsel %vm2891_vm6, 65537, %v10663_v30  ;;  %vm10689_vm4 = vcmask 15360  }
 0x196   : > { %v10688_v15 = vsel %vm8597_vm10, 4294967295, %v10687_v15  ;;  %6992 = vmatmul.mubr.msk.bf16.vlgmr.msra.gmra.mxu1 %vm10689_vm4, %v8476_v46  ;;  %v3197_v47 = vrot.slane %v6431_v14, 1  ;;  %v6432_v28 = vcombine.low %v3081_v52, %v3082_v0  ;;  %v3083_v31 = vsel %vm8597_vm10, %v10690_v26, 0  ;;  %vm10692_vm6 = vmmov %vm10689_vm4 }
 0x197   : > { %v3084_v13 = vsel %vm10393_vm14, %v10691_v54, 0  ;;  %7058 = vmatpush3.bf16.msra.mxu1 %v8461_v51  ;;  %6995 = vmatprep.mubr.msk.bf16.mxu1 %vm10692_vm6, %v3196_v61  ;;  %v2983_v3 = vrot.slane %v2981_v10, 4  ;;  %v2987_v4 = vrot.slane %v2923_v32, 7  ;;  %v6468_v35 = vcombine.low %v3513_v20, %v3514_v34 }
 0x198   : > { %v6433_v41 = vcombine.low %v3083_v31, %v3084_v13  ;;  %v3199_v1 = vrot.slane %v6432_v28, 1  ;;  %v3515_v46 = vsel %vm8168_vm8, %v3483_v43, 0  ;;  %v3516_v14 = vsel %vm7529_vm11, %v3484_v7, 0  ;;  %v3485_v7 = vld [vmem:[#allocation2 + $0x50] sm:$0xf] }
 0x199   : > { %v1462_v0 = vadd.s32 136, %v10627_v58  ;;  %vm10693_vm4 = vcmask 1040384   ;;  %v2985_v51 = vsel %vm7578_vm3, %v2983_v3, %v7548_v16  ;;  %v8631_v20 = vsel %vm7578_vm3, %v10666_v38, %v2987_v4  ;;  %v3486_v28 = vld [vmem:[#allocation2 + $0x54] sm:$0xf]  ;;  %v3488_v31 = vld [vmem:[#allocation2 + $0x5c] sm:$0xf] }
 0x19a   : > { %7234 = vmatprep.subr.msk.bf16.mxu1 %vm10693_vm4, %v8606_v37  ;;  %v3201_v52 = vrot.slane %v6433_v41, 1  ;;  %10694 = vst [vmem:[#allocation10_spill] sm:$0xff] %v8631_v20  ;;  %v2989_v34 = vrot.slane %v2987_v4, 4  ;;  %vm10695_vm6 = vcmask 1046528   ;;  %vm8634_vm14 = vcmp.ne.s16.totalorder %v2985_v51, 0 }
 0x19b   : > { %v3198_v61 = vsel %vm10695_vm6, %v3195_v9, %v3197_v47  ;;  %v10696_v10 = vmov 0  ;;  %vm10396_vm1 = vcmp.ne.s16.totalorder %v8631_v20, 0  ;;  %v1600_v43 = vand.u32 15, %v1462_v0  ;;  %v3487_v41 = vld [vmem:[#allocation2 + $0x58] sm:$0xf] }
 0x19c   : > { %v10697_v10 = vsel %vm8634_vm14, 4294967295, %v10696_v10  ;;  %vm10698_vm4 = vcmask 15360   ;;  %v3085_v3 = vsel %vm8634_vm14, %v8082_v36, 0  ;;  %v3086_v4 = vsel %vm10396_vm1, %v8105_v55, 0 }
 0x19d   : > { %7034 = vmatmul.mubr.msk.bf16.gmra.mxu0 %vm10698_vm4, %v8532_v17  ;;  %v6469_v9 = vcombine.low %v3515_v46, %v3516_v14  ;;  %v2991_v32 = vsel %vm7578_vm3, %v2989_v34, %v7548_v16  ;;  %vm10699_vm6 = vmmov %vm10698_vm4  ;;  %v8652_v26 = vcombine.low %v3085_v3, %v3086_v4  ;;  %vm1910_vm4 = vcmp.ne.s32.totalorder %v1600_v43, 15  ;;  %v8676_v43 = vld [vmem:[#allocation2 + $0x60] sm:$0xf] }
 0x19e   : > { %7037 = vmatprep.mubr.msk.bf16.mxu0 %vm10699_vm6, %v8534_v6  ;;  %vm8654_vm8 = vcmp.ne.s16.totalorder %v2991_v32, 0  ;;  %v10700_v17 = vmov 0  ;;  %v1464_v36 = vadd.s32 152, %v10627_v58  ;;  %vm10703_vm1 = vcmask 1046528   ;;  %vm2893_vm14 = vmpackc.low %vm1910_vm4, %vm1910_vm4 }
 0x19f   : > { %v10701_v17 = vsel %vm8654_vm8, 4294967295, %v10700_v17  ;;  %v3200_v55 = vsel %vm10703_vm1, %v3197_v47, %v3199_v1  ;;  %vm10704_vm10 = vmmov %vm10703_vm1  ;;  %v3087_v13 = vsel %vm8654_vm8, %v8163_v22, 0  ;;  %vm10705_vm6 = vnez %v10580_v25 }
 0x1a0   : > { %10702 = vst [vmem:[#allocation4_spill] sm:$0xff] %v10701_v17  ;;  %v3202_v54 = vsel %vm10704_vm10, %v3199_v1, %v3201_v52  ;;  %v3517_v6 = vsel %vm10705_vm6, %v3485_v7, 0  ;;  %vm10706_vm2 = vcmask 15360   ;;  %v3203_v46 = vrot.slane %v8652_v26, 1 }
 0x1a1   : > { %6996 = vmatmul.mubr.msk.bf16.gmra.mxu1 %vm10706_vm2, %v3198_v61  ;;  %v2925_v14 = vsel %vm2893_vm14, 65537, %v10663_v30  ;;  %v1614_v0 = vand.u32 15, %v1464_v36  ;;  %v3518_v47 = vsel %vm7529_vm11, %v3486_v28, 0  ;;  %vm10707_vm1 = vmmov %vm10706_vm2  ;;  %v3520_v22 = vsel %vm7529_vm11, %v3488_v31, 0  ;;  %v8686_v36 = vld [vmem:[#allocation2 + $0x64] sm:$0xf] }
 0x1a2   : > { %6999 = vmatprep.mubr.msk.bf16.mxu1 %vm10707_vm1, %v3200_v55  ;;  %v2993_v1 = vrot.slane %v2925_v14, 7  ;;  %v1466_v51 = vadd.s32 168, %v10627_v58  ;;  %v1468_v34 = vadd.s32 184, %v10627_v58  ;;  %vm10708_vm2 = vmmov %vm10704_vm10  ;;  %v6470_v7 = vcombine.low %v3517_v6, %v3518_v47  ;;  %v8693_v6 = vld [vmem:[#allocation2 + $0x68] sm:$0xf] }
 0x1a3   : > { %v3204_v61 = vsel %vm10708_vm2, %v3201_v52, %v3203_v46  ;;  %vm1912_vm10 = vcmp.ne.s32.totalorder %v1614_v0, 15  ;;  %v3519_v3 = vsel %vm8223_vm5, %v3487_v41, 0  ;;  %vm10710_vm1 = vnez %v10588_v5 }
 0x1a4   : > { %v8684_v4 = vsel %vm7578_vm3, %v10666_v38, %v2993_v1  ;;  %vm2895_vm14 = vmpackc.low %vm1912_vm10, %vm1912_vm10  ;;  %v2995_v32 = vrot.slane %v2993_v1, 4  ;;  %v1628_v28 = vand.u32 15, %v1466_v51  ;;  %v1642_v26 = vand.u32 15, %v1468_v34 }
 0x1a5   : > { %10709 = vst [vmem:[#allocation5_spill] sm:$0xff] %v8684_v4  ;;  %vm10404_vm4 = vcmp.ne.s16.totalorder %v8684_v4, 0  ;;  %v2927_v52 = vsel %vm2895_vm14, 65537, %v10663_v30  ;;  %v6471_v31 = vcombine.low %v3519_v3, %v3520_v22  ;;  %v3521_v55 = vsel %vm10710_vm1, %v8676_v43, 0 }
 0x1a6   : > { %vm10711_vm2 = vcmask 15360   ;;  %v3088_v41 = vsel %vm10404_vm4, %v8174_v33, 0  ;;  %v2997_v14 = vsel %vm7578_vm3, %v2995_v32, %v7548_v16  ;;  %v2999_v0 = vrot.slane %v2927_v52, 7 }
 0x1a7   : > { %7038 = vmatmul.mubr.msk.bf16.gmra.mxu0 %vm10711_vm2, %v6468_v35  ;;  %vm1914_vm10 = vcmp.ne.s32.totalorder %v1628_v28, 15  ;;  %vm10712_vm14 = vmmov %vm10711_vm2  ;;  %v6435_v47 = vcombine.low %v3087_v13, %v3088_v41  ;;  %vm8703_vm6 = vcmp.ne.s16.totalorder %v2997_v14, 0  ;;  %v10713_v1 = vmov 0 }
 0x1a8   : > { %7041 = vmatprep.mubr.msk.bf16.mxu0 %vm10712_vm14, %v6469_v9  ;;  %v10714_v1 = vsel %vm8703_vm6, 4294967295, %v10713_v1  ;;  %vm2897_vm1 = vmpackc.low %vm1914_vm10, %vm1914_vm10  ;;  %vm1916_vm5 = vcmp.ne.s32.totalorder %v1642_v26, 15  ;;  %v3522_v35 = vsel %vm7529_vm11, %v8686_v36, 0  ;;  %v8713_v33 = vsel %vm7578_vm3, %v10666_v38, %v2999_v0  ;;  %v3492_v9 = vld [vmem:[#allocation2 + $0x6c] sm:$0xf] }
 0x1a9   : > { %10715 = vst [vmem:[#allocation19_spill] sm:$0xff] %v10714_v1  ;;  %10716 = vst [vmem:[#allocation17_spill] sm:$0xff] %v8713_v33  ;;  %v2929_v22 = vsel %vm2897_vm1, 65537, %v10663_v30  ;;  %v3001_v51 = vrot.slane %v2999_v0, 4  ;;  %vm10717_vm14 = vnez %v10599_v60  ;;  %vm10718_vm10 = vcmask 15360  }
 0x1aa   : > { %vm2899_vm2 = vmpackc.low %vm1916_vm5, %vm1916_vm5  ;;  %v3523_v13 = vsel %vm10717_vm14, %v8693_v6, 0  ;;  %7000 = vmatmul.mubr.msk.bf16.gmra.mxu1 %vm10718_vm10, %v3202_v54  ;;  %v3205_v34 = vrot.slane %v6435_v47, 1  ;;  %vm10407_vm4 = vcmp.ne.s16.totalorder %v8713_v33, 0  ;;  %v3005_v43 = vrot.slane %v2929_v22, 7  ;;  %v3493_v22 = vld [vmem:[#allocation2 + $0x70] sm:$0xf] }
 0x1ab   : > { %v2931_v3 = vsel %vm2899_vm2, 65537, %v10663_v30  ;;  %vm10719_vm8 = vmmov %vm10718_vm10  ;;  %v3089_v32 = vsel %vm8703_vm6, %v8198_v11, 0  ;;  %v3090_v28 = vsel %vm10407_vm4, %v8200_v53, 0  ;;  %v3003_v54 = vsel %vm7578_vm3, %v3001_v51, %v7548_v16 }
 0x1ac   : > { %7003 = vmatprep.mubr.msk.bf16.mxu1 %vm10719_vm8, %v3204_v61  ;;  %v3011_v26 = vrot.slane %v2931_v3, 7  ;;  %v6436_v36 = vcombine.low %v3089_v32, %v3090_v28  ;;  %v8735_v52 = vsel %vm7578_vm3, %v10666_v38, %v3005_v43  ;;  %vm8737_vm8 = vcmp.ne.s16.totalorder %v3003_v54, 0  ;;  %vm10726_vm4 = vmmov %vm10718_vm10  ;;  %v3494_v32 = vld [vmem:[#allocation2 + $0x74] sm:$0xf] }
 0x1ad   : > { %10720 = vst [vmem:[#allocation20_spill] sm:$0xff] %v8735_v52  ;;  %v10721_v61 = vmov 0  ;;  %v3524_v11 = vsel %vm7529_vm11, %v3492_v9, 0  ;;  %vm10408_vm5 = vcmp.ne.s16.totalorder %v8735_v52, 0  ;;  %v3091_v53 = vsel %vm8737_vm8, %v8218_v21, 0 }
 0x1ae   : > { %v10722_v61 = vsel %vm8737_vm8, 4294967295, %v10721_v61  ;;  %v3007_v6 = vrot.slane %v3005_v43, 4  ;;  %v8750_v41 = vsel %vm7578_vm3, %v10666_v38, %v3011_v26  ;;  %vm10725_vm1 = vcmask 1046528  }
 0x1af   : > { %10723 = vst [vmem:[#allocation22_spill] sm:$0xff] %v10722_v61  ;;  %10724 = vst [vmem:[#allocation37_spill] sm:$0xff] %v8750_v41  ;;  %v3206_v14 = vsel %vm10725_vm1, %v3203_v46, %v3205_v34  ;;  %v3207_v0 = vrot.slane %v6436_v36, 1  ;;  %v3092_v47 = vsel %vm10408_vm5, %v8237_v40, 0  ;;  %vm10409_vm2 = vcmp.ne.s16.totalorder %v8750_v41, 0  ;;  %7042 = vmatmul.mubr.msk.bf16.gmra.mxu0 %vm10718_vm10, %v6470_v7 }
 0x1b0   : > { %v6437_v51 = vcombine.low %v3091_v53, %v3092_v47  ;;  %v3009_v21 = vsel %vm7578_vm3, %v3007_v6, %v7548_v16  ;;  %v3094_v9 = vsel %vm10409_vm2, %v8266_v39, 0  ;;  %v1470_v46 = vadd.s32 200, %v10627_v58  ;;  %7045 = vmatprep.mubr.msk.bf16.mxu0 %vm10726_vm4, %v6471_v31  ;;  %vm10730_vm10 = vmmov %vm10726_vm4  ;;  %v3496_v6 = vld [vmem:[#allocation2 + $0x7c] sm:$0xf] }
 0x1b1   : > { %v3208_v43 = vsel %vm10725_vm1, %v3205_v34, %v3207_v0  ;;  %vm8767_vm5 = vcmp.ne.s16.totalorder %v3009_v21, 0  ;;  %v10727_v40 = vmov 0  ;;  %v3013_v7 = vrot.slane %v3011_v26, 4 }
 0x1b2   : > { %v10728_v40 = vsel %vm8767_vm5, 4294967295, %v10727_v40  ;;  %v1472_v3 = vadd.s32 216, %v10627_v58  ;;  %v3209_v28 = vrot.slane %v6437_v51, 1  ;;  %v3093_v54 = vsel %vm8767_vm5, %v8240_v49, 0  ;;  %7004 = vmatmul.mubr.msk.bf16.gmra.mxu1 %vm10730_vm10, %v3206_v14  ;;  %v3495_v51 = vld [vmem:[#allocation2 + $0x78] sm:$0xf] }
 0x1b3   : > { %10729 = vst [vmem:[#allocation38_spill] sm:$0xff] %v10728_v40  ;;  %v1656_v39 = vand.u32 15, %v1470_v46  ;;  %v3525_v36 = vsel %vm8334_vm9, %v3493_v22, 0  ;;  %v8778_v31 = vcombine.low %v3093_v54, %v3094_v9  ;;  %v6472_v34 = vcombine.low %v3521_v55, %v3522_v35  ;;  %7007 = vmatprep.mubr.msk.bf16.mxu1 %vm10726_vm4, %v3208_v43  ;;  %v8797_v43 = vld [vmem:[#allocation2 + $0x80] sm:$0xf] }
 0x1b4   : > { %v3015_v26 = vsel %vm7578_vm3, %v3013_v7, %v7548_v16  ;;  %v1670_v53 = vand.u32 15, %v1472_v3  ;;  %v3210_v47 = vsel %vm10725_vm1, %v3207_v0, %v3209_v28  ;;  %v10731_v49 = vmov 0 }
 0x1b5   : > { %vm1918_vm2 = vcmp.ne.s32.totalorder %v1656_v39, 15  ;;  %vm8785_vm14 = vcmp.ne.s16.totalorder %v3015_v26, 0  ;;  %v3526_v14 = vsel %vm7529_vm11, %v3494_v32, 0  ;;  %v3211_v55 = vrot.slane %v8778_v31, 1 }
 0x1b6   : > { %v10732_v49 = vsel %vm8785_vm14, 4294967295, %v10731_v49  ;;  %v6473_v35 = vcombine.low %v3523_v13, %v3524_v11  ;;  %vm2901_vm10 = vmpackc.low %vm1918_vm2, %vm1918_vm2  ;;  %vm1920_vm9 = vcmp.ne.s32.totalorder %v1670_v53, 15  ;;  %v6474_v22 = vcombine.low %v3525_v36, %v3526_v14 }
 0x1b7   : > { %10733 = vst [vmem:[#allocation39_spill] sm:$0xff] %v10732_v49  ;;  %v2933_v21 = vsel %vm2901_vm10, 65537, %v10663_v30  ;;  %vm2903_vm4 = vmpackc.low %vm1920_vm9, %vm1920_vm9  ;;  %v3528_v0 = vsel %vm7529_vm11, %v3496_v6, 0  ;;  %v1474_v9 = vadd.s32 232, %v10627_v58  ;;  %v1476_v46 = vadd.s32 248, %v10627_v58 }
 0x1b8   : > { %v3212_v7 = vsel %vm10725_vm1, %v3209_v28, %v3211_v55  ;;  %v3017_v3 = vrot.slane %v2933_v21, 7  ;;  %v3095_v13 = vsel %vm8785_vm14, %v8283_v44, 0  ;;  %v2935_v11 = vsel %vm2903_vm4, 65537, %v10663_v30  ;;  %v3857_v21 = vld [vmem:[#allocation2 + $0x8] sm:$0xf] }
 0x1b9   : > { %vm10734_vm2 = vcmask 15360   ;;  %v3023_v32 = vrot.slane %v2935_v11, 7  ;;  %v3527_v54 = vsel %vm8361_vm12, %v3495_v51, 0  ;;  %v1684_v39 = vand.u32 15, %v1474_v9 }
 0x1ba   : > { %7046 = vmatmul.mubr.msk.bf16.gmra.mxu0 %vm10734_vm2, %v6472_v34  ;;  %v1698_v36 = vand.u32 15, %v1476_v46  ;;  %vm10735_vm9 = vmmov %vm10734_vm2  ;;  %v8811_v58 = vsel %vm7578_vm3, %v10666_v38, %v3017_v3  ;;  %v3019_v28 = vrot.slane %v3017_v3, 4  ;;  %v6475_v31 = vcombine.low %v3527_v54, %v3528_v0  ;;  %v10744_v0 = vld [vmem:[#allocation30_spill] sm:$0xff] }
 0x1bb   : > { %7049 = vmatprep.mubr.msk.bf16.mxu0 %vm10735_vm9, %v6473_v35  ;;  %10736 = vst [vmem:[#allocation40_spill] sm:$0xff] %v8811_v58  ;;  %vm10417_vm10 = vcmp.ne.s16.totalorder %v8811_v58, 0  ;;  %v8820_v34 = vsel %vm7578_vm3, %v10666_v38, %v3023_v32  ;;  %vm1922_vm4 = vcmp.ne.s32.totalorder %v1684_v39, 15  ;;  %v3025_v26 = vrot.slane %v3023_v32, 4  ;;  %vm10738_vm1 = vmmov %vm10734_vm2 }
 0x1bc   : > { %10737 = vst [vmem:[#allocation41_spill] sm:$0xff] %v8820_v34  ;;  %7008 = vmatmul.mubr.msk.bf16.gmra.mxu1 %vm10738_vm1, %v3210_v47  ;;  %v3096_v53 = vsel %vm10417_vm10, %v8272_v23, 0  ;;  %v3021_v6 = vsel %vm7578_vm3, %v3019_v28, %v7548_v16  ;;  %vm10416_vm2 = vcmp.ne.s16.totalorder %v8820_v34, 0  ;;  %vm2905_vm9 = vmpackc.low %vm1922_vm4, %vm1922_vm4  ;;  %vm1924_vm12 = vcmp.ne.s32.totalorder %v1698_v36, 15  ;;  %v10743_v47 = vld [vmem:[#allocation29_spill] sm:$0xff] }
 0x1bd   : > { %vm10739_vm14 = vmmov %vm10738_vm1  ;;  %v6439_v14 = vcombine.low %v3095_v13, %v3096_v53  ;;  %vm8831_vm8 = vcmp.ne.s16.totalorder %v3021_v6, 0  ;;  %v10740_v35 = vmov 0  ;;  %v3098_v51 = vsel %vm10416_vm2, %v10743_v47, 0  ;;  %v3858_v13 = vld [vmem:[#allocation2 + $0xc] sm:$0xf]  ;;  %v10749_v53 = vld [vmem:[#allocation33_spill] sm:$0xff] }
 0x1be   : > { %7011 = vmatprep.mubr.msk.bf16.mxu1 %vm10739_vm14, %v3212_v7  ;;  %v10741_v35 = vsel %vm8831_vm8, 4294967295, %v10740_v35  ;;  %v2937_v23 = vsel %vm2905_vm9, 65537, %v10663_v30  ;;  %vm2907_vm1 = vmpackc.low %vm1924_vm12, %vm1924_vm12  ;;  %v3097_v9 = vsel %vm8831_vm8, %v10744_v0, 0  ;;  %v3027_v46 = vsel %vm7578_vm3, %v3025_v26, %v7548_v16  ;;  %v4351_v36 = vld [vmem:[#allocation2 + $0x8] sm:$0xe] }
 0x1bf   : > { %10742 = vst [vmem:[#allocation42_spill] sm:$0xff] %v10741_v35  ;;  %v3029_v7 = vrot.slane %v2937_v23, 7  ;;  %v2939_v3 = vsel %vm2907_vm1, 65537, %v10663_v30  ;;  %v3213_v11 = vrot.slane %v6439_v14, 1  ;;  %v6440_v32 = vcombine.low %v3097_v9, %v3098_v51  ;;  %v3859_v23 = vld [vmem:[#allocation2 + $0x10] sm:$0xf] }
 0x1c0   : > { %vm8846_vm14 = vcmp.ne.s16.totalorder %v3027_v46, 0  ;;  %v10745_v54 = vmov 0  ;;  %v3035_v39 = vrot.slane %v2939_v3, 7  ;;  %v8858_v30 = vcombine.low %v3857_v21, %v3858_v13  ;;  %v3860_v0 = vld [vmem:[#allocation2 + $0x14] sm:$0xf]  ;;  %v10754_v9 = vld [vmem:[#allocation34_spill] sm:$0xff] }
 0x1c1   : > { %v10746_v54 = vsel %vm8846_vm14, 4294967295, %v10745_v54  ;;  %v8853_v28 = vsel %vm7578_vm3, %v10666_v38, %v3029_v7  ;;  %v3099_v26 = vsel %vm8846_vm14, %v10749_v53, 0  ;;  %v3031_v6 = vrot.slane %v3029_v7, 4  ;;  %v3498_v3 = vld [vmem:[#allocation2 + $0x84] sm:$0xf] }
 0x1c2   : > { %10747 = vst [vmem:[#allocation29_spill] sm:$0xff] %v10746_v54  ;;  %10748 = vst [vmem:[#allocation30_spill] sm:$0xff] %v8853_v28  ;;  %vm10750_vm12 = vcmask 1046528   ;;  %v3215_v47 = vrot.slane %v6440_v32, 1  ;;  %vm10751_vm4 = vcmask 15360   ;;  %vm10421_vm9 = vcmp.ne.s16.totalorder %v8853_v28, 0 }
 0x1c3   : > { %v3214_v14 = vsel %vm10750_vm12, %v3211_v55, %v3213_v11  ;;  %7050 = vmatmul.mubr.msk.bf16.gmra.mxu0 %vm10751_vm4, %v6474_v22  ;;  %v8866_v51 = vsel %vm7578_vm3, %v10666_v38, %v3035_v39  ;;  %vm10753_vm1 = vmmov %vm10751_vm4  ;;  %v3100_v21 = vsel %vm10421_vm9, %v10754_v9, 0  ;;  %v3033_v55 = vsel %vm7578_vm3, %v3031_v6, %v7548_v16  ;;  %v10760_v32 = vld [vmem:[#allocation8_spill] sm:$0xff] }
 0x1c4   : > { %10752 = vst [vmem:[#allocation33_spill] sm:$0xff] %v8866_v51  ;;  %7053 = vmatprep.mubr.msk.bf16.mxu0 %vm10753_vm1, %v6475_v31  ;;  %vm10420_vm12 = vcmp.ne.s16.totalorder %v8866_v51, 0  ;;  %vm10755_vm4 = vcmp.ne.s16.totalorder %v7548_v16, 0  ;;  %vm10756_vm2 = vcmask 1046528   ;;  %v6441_v46 = vcombine.low %v3099_v26, %v3100_v21  ;;  %7012 = vmatmul.mubr.msk.bf16.gmra.mxu1 %vm10753_vm1, %v3214_v14  ;;  %v10763_v26 = vld [vmem:[#allocation9_spill] sm:$0xff] }
 0x1c5   : > { %v4352_v22 = vsel %vm10755_vm4, %v4351_v36, 0  ;;  %v3216_v38 = vsel %vm10756_vm2, %v3213_v11, %v3215_v47  ;;  %vm8879_vm10 = vcmp.ne.s16.totalorder %v3033_v55, 0  ;;  %v10757_v7 = vmov 0  ;;  %vm10765_vm4 = vmmov %vm10753_vm1  ;;  %v10766_v55 = vld [vmem:[#allocation3_spill] sm:$0xff] }
 0x1c6   : > { %v10758_v7 = vsel %vm8879_vm10, 4294967295, %v10757_v7  ;;  %v3102_v31 = vsel %vm10420_vm12, %v8403_v48, 0  ;;  %v3101_v29 = vsel %vm8879_vm10, %v8393_v42, 0  ;;  %vm10761_vm3 = vcmp.ne.s16.totalorder %v10760_v32, 0  ;;  %7015 = vmatprep.mubr.msk.bf16.mxu1 %vm10765_vm4, %v3216_v38  ;;  %v8902_v42 = vld [vmem:[%s10317_s5 + $0x7] sm:$0x1] }
 0x1c7   : > { %10759 = vst [vmem:[#allocation34_spill] sm:$0xff] %v10758_v7  ;;  %v4353_v36 = vsel %vm10761_vm3, %v3858_v13, 0  ;;  %v4354_v53 = vsel %vm8318_vm7, %v3859_v23, 0  ;;  %vm10764_vm2 = vcmp.ne.s16.totalorder %v10763_v26, 0  ;;  %v3217_v9 = vrot.slane %v6441_v46, 1 }
 0x1c8   : > { %v4355_v6 = vsel %vm10764_vm2, %v3860_v0, 0  ;;  %v8897_v48 = vcombine.low %v3101_v29, %v3102_v31  ;;  %v6528_v21 = vcombine.low %v4352_v22, %v4353_v36  ;;  %v3530_v13 = vsel %vm7529_vm11, %v3498_v3, 0  ;;  %v3862_v29 = vld [vmem:[#allocation2 + $0x1c] sm:$0xf]  ;;  %v3864_v36 = vld [vmem:[#allocation2 + $0x24] sm:$0xf] }
 0x1c9   : > { %v6529_v14 = vcombine.low %v4354_v53, %v4355_v6  ;;  %vm10767_vm1 = vcmask 1040384   ;;  %v8908_v2 = vrot.slane %v3035_v39, 4  ;;  %v10769_v38 = vsel %vm8405_vm13, %v8797_v43, 0  ;;  %v3863_v6 = vld [vmem:[#allocation2 + $0x20] sm:$0xf] }
 0x1ca   : > { %v4552_v44 = vsel %vm10767_vm1, %v10766_v55, 0  ;;  %v6476_v22 = vcombine.low %v10769_v38, %v3530_v13  ;;  %v4470_v46 = vrot.slane %v6528_v21, 1  ;;  %v3219_v53 = vrot.slane %v8897_v48, 1  ;;  %vm10770_vm2 = vmmov %vm10767_vm1  ;;  %v10774_v21 = vld [vmem:[#allocation36_spill] sm:$0xff]  ;;  %v3868_v55 = vld [vmem:[#allocation2 + $0x34] sm:$0xf] }
 0x1cb   : > { %10768 = vst [vmem:[#allocation8_spill] sm:$0xff] %v8908_v2  ;;  %v4471_v31 = vrot.slane %v6529_v14, 1  ;;  %7092 = vmatpush3.bf16.msra.mxu0 %v4552_v44  ;;  %vm10425_vm3 = vcmp.ne.s16.totalorder %v8908_v2, 0  ;;  %v3978_v3 = vshll.u32 %v8858_v30, 16  ;;  %vm10771_vm4 = vcmask 1046528  }
 0x1cc   : > { %7235 = vmatprep.subr.msk.bf16.mxu0 %vm10770_vm2, %v8902_v42  ;;  %v3218_v39 = vsel %vm10771_vm4, %v3215_v47, %v3217_v9  ;;  %vm10772_vm1 = vcmask 15360   ;;  %vm10773_vm12 = vmmov %vm10771_vm4  ;;  %v3103_v44 = vsel %vm10425_vm3, %v10774_v21, 0  ;;  %v6495_v14 = vcombine.low %v3859_v23, %v3860_v0 }
 0x1cd   : > { %7054 = vmatmul.mubr.msk.bf16.gmra.mxu0 %vm10772_vm1, %v6476_v22  ;;  %v4472_v43 = vsel %vm10773_vm12, %v4470_v46, %v4471_v31  ;;  %vm10775_vm9 = vmmov %vm10772_vm1  ;;  %v6443_v48 = vcombine.low %v3103_v44, %v3103_v44  ;;  %v3980_v13 = vrot.slane %v3978_v3, 1  ;;  %v4356_v38 = vsel %vm10646_vm15, %v3861_v24, 0  ;;  %7016 = vmatmul.mubr.msk.bf16.gmra.mxu1 %vm10772_vm1, %v3218_v39  ;;  %v3865_v3 = vld [vmem:[#allocation2 + $0x28] sm:$0xf]  ;;  %v3866_v44 = vld [vmem:[#allocation2 + $0x2c] sm:$0xf] }
 0x1ce   : > { %7093 = vmatprep.mubr.msk.bf16.mxu0 %vm10775_vm9, %v4472_v43  ;;  %vm10778_vm2 = vcmp.ne.s16.totalorder %v10777_v18, 0  ;;  %vm10779_vm4 = vnez %v10659_v45  ;;  %vm10780_vm12 = vcmp.ne.s16.totalorder %v8494_v19, 0  ;;  %v6496_v60 = vcombine.low %v3861_v24, %v3862_v29  ;;  %vm10782_vm9 = vmmov %vm10772_vm1 }
 0x1cf   : > { %v4357_v5 = vsel %vm10778_vm2, %v3862_v29, 0  ;;  %v4358_v22 = vsel %vm10779_vm4, %v3863_v6, 0  ;;  %v4359_v46 = vsel %vm10780_vm12, %v3864_v36, 0  ;;  %vm10781_vm3 = vcmask 1046528   ;;  %vm10788_vm13 = vmmov %vm10772_vm1 }
 0x1d0   : > { %v6530_v47 = vcombine.low %v4356_v38, %v4357_v5  ;;  %v3220_v23 = vsel %vm10781_vm3, %v3217_v9, %v3219_v53  ;;  %v6531_v0 = vcombine.low %v4358_v22, %v4359_v46  ;;  %v3976_v43 = vshrl.u32 %v8858_v30, 16  ;;  %v3867_v5 = vld [vmem:[#allocation2 + $0x30] sm:$0xf]  ;;  %vm10783_vm2 = vmmov %vm10781_vm3  ;;  %v3870_v46 = vld [vmem:[#allocation2 + $0x3c] sm:$0xf] }
 0x1d1   : > { %7019 = vmatprep.mubr.msk.bf16.mxu1 %vm10782_vm9, %v3220_v23  ;;  %v3983_v38 = vshll.u32 %v6495_v14, 16  ;;  %v3221_v25 = vrot.slane %v6443_v48, 1  ;;  %v3991_v62 = vshll.u32 %v6496_v60, 16  ;;  %v4360_v9 = vsel %vm8515_vm0, %v3865_v3, 0  ;;  %vm10786_vm9 = vmmov %vm10783_vm2 }
 0x1d2   : > { %v4473_v21 = vrot.slane %v6530_v47, 1  ;;  %v4475_v18 = vrot.slane %v6531_v0, 1  ;;  %v3981_v57 = vor.u32 %v3980_v13, %v3976_v43  ;;  %vm10784_vm3 = vcmp.ne.s16.totalorder %v8554_v50, 0  ;;  %v3871_v43 = vld [vmem:[#allocation2 + $0x40] sm:$0xf] }
 0x1d3   : > { %v4361_v29 = vsel %vm10784_vm3, %v3866_v44, 0  ;;  %vm10785_vm12 = vnez %v10683_v12  ;;  %vm10787_vm15 = vcmp.ne.s16.totalorder %v8560_v56, 0  ;;  %v3985_v13 = vrot.slane %v3983_v38, 1  ;;  %vm10789_vm3 = vmmov %vm10772_vm1 }
 0x1d4   : > { %v4474_v24 = vsel %vm10783_vm2, %v4471_v31, %v4473_v21  ;;  %v4362_v30 = vsel %vm10785_vm12, %v3867_v5, 0  ;;  %v4476_v39 = vsel %vm10786_vm9, %v4473_v21, %v4475_v18  ;;  %v6532_v47 = vcombine.low %v4360_v9, %v4361_v29  ;;  %v3869_v9 = vld [vmem:[#allocation2 + $0x38] sm:$0xf] }
 0x1d5   : > { %7094 = vmatmul.mubr.msk.bf16.vlgmr.msra.gmra.mxu0 %vm10772_vm1, %v4474_v24  ;;  %v4363_v48 = vsel %vm10787_vm15, %v3868_v55, 0  ;;  %v6497_v31 = vcombine.low %v3863_v6, %v3864_v36  ;;  %v3222_v23 = vsel %vm10783_vm2, %v3219_v53, %v3221_v25  ;;  %v3993_v0 = vrot.slane %v3991_v62, 1  ;;  %v3872_v6 = vld [vmem:[#allocation2 + $0x44] sm:$0xf] }
 0x1d6   : > { %7097 = vmatprep.mubr.msk.bf16.mxu0 %vm10788_vm13, %v4476_v39  ;;  %v6533_v22 = vcombine.low %v4362_v30, %v4363_v48  ;;  %7020 = vmatmul.mubr.msk.bf16.gmra.mxu1 %vm10789_vm3, %v3222_v23  ;;  %vm10790_vm12 = vsmask.f32 7424  ;;  %v4477_v12 = vrot.slane %v6532_v47, 1  ;;  %v6498_v21 = vcombine.low %v3865_v3, %v3866_v44  ;;  %vm10796_vm3 = vmmov %vm10772_vm1 }
 0x1d7   : > { %v3986_v24 = vsel %vm10790_vm12, %v3981_v57, %v3985_v13  ;;  %v3995_v29 = vshrl.u32 %v6496_v60, 16  ;;  %vm10791_vm13 = vcmp.ne.s16.totalorder %v8578_v59, 0  ;;  %v3999_v30 = vshll.u32 %v6497_v31, 16  ;;  %vm10794_vm12 = vmmov %vm10783_vm2 }
 0x1d8   : > { %7059 = vmatprep.mubr.msk.bf16.mxu1 %vm10772_vm1, %v3986_v24  ;;  %v4479_v38 = vrot.slane %v6533_v22, 1  ;;  %v4365_v36 = vsel %vm10791_vm13, %v3870_v46, 0  ;;  %vm10792_vm15 = vnez %v10697_v10  ;;  %v3987_v25 = vshrl.u32 %v6495_v14, 16  ;;  %vm10797_vm1 = vmmov %vm10794_vm12 }
 0x1d9   : > { %v4366_v62 = vsel %vm10792_vm15, %v3871_v43, 0  ;;  %v3997_v53 = vor.u32 %v3995_v29, %v3993_v0  ;;  %vm10793_vm9 = vnez %v10688_v15  ;;  %v4478_v3 = vsel %vm10794_vm12, %v4475_v18, %v4477_v12  ;;  %vm10799_vm15 = vmmov %vm10796_vm3  ;;  %v3874_v29 = vld [vmem:[#allocation2 + $0x4c] sm:$0xf] }
 0x1da   : > { %v4364_v57 = vsel %vm10793_vm9, %v3869_v9, 0  ;;  %v4007_v44 = vshll.u32 %v6498_v21, 16  ;;  %vm10795_vm2 = vcmp.ne.s16.totalorder %v8631_v20, 0  ;;  %v3989_v47 = vor.u32 %v3987_v25, %v3985_v13  ;;  %v8972_v13 = vld [vmem:[%s10317_s5 + $0x8] sm:$0x1] }
 0x1db   : > { %v6534_v39 = vcombine.low %v4364_v57, %v4365_v36  ;;  %v4367_v60 = vsel %vm10795_vm2, %v3872_v6, 0  ;;  %v4480_v48 = vsel %vm10797_vm1, %v4477_v12, %v4479_v38  ;;  %vm10798_vm13 = vcmask 1040384   ;;  %v3875_v57 = vld [vmem:[#allocation2 + $0x50] sm:$0xf]  ;;  %vm10801_vm2 = vmmov %vm10796_vm3  ;;  %v4756_v20 = vld [vmem:[#allocation2 + $0x34] sm:$0xf] }
 0x1dc   : > { %v6535_v22 = vcombine.low %v4366_v62, %v4367_v60  ;;  %v4942_v14 = vsel %vm10798_vm13, %v8606_v37, 0  ;;  %v4001_v23 = vrot.slane %v3999_v30, 1  ;;  %v6499_v24 = vcombine.low %v3867_v5, %v3868_v55  ;;  %v3873_v30 = vld [vmem:[#allocation2 + $0x48] sm:$0xf] }
 0x1dd   : > { %7098 = vmatmul.mubr.msk.bf16.gmra.mxu0 %vm10796_vm3, %v4478_v3  ;;  %vm10800_vm12 = vsmask.f32 7424  ;;  %v6500_v36 = vcombine.low %v3869_v9, %v3870_v46  ;;  %v4009_v62 = vrot.slane %v4007_v44, 1  ;;  %v4481_v37 = vrot.slane %v6534_v39, 1  ;;  %v3876_v46 = vld [vmem:[#allocation2 + $0x54] sm:$0xf] }
 0x1de   : > { %7101 = vmatprep.mubr.msk.bf16.mxu0 %vm10799_vm15, %v4480_v48  ;;  %v3994_v18 = vsel %vm10800_vm12, %v3989_v47, %v3993_v0  ;;  %vm10802_vm3 = vmmov %vm10800_vm12  ;;  %v4483_v55 = vrot.slane %v6535_v22, 1  ;;  %vm10804_vm1 = vcmp.ne.s16.totalorder %v8684_v4, 0  ;;  %v4011_v0 = vshrl.u32 %v6498_v21, 16  ;;  %v3879_v4 = vld [vmem:[#allocation2 + $0x60] sm:$0xf] }
 0x1df   : > { %7060 = vmatmul.mubr.msk.bf16.vlgmr.msra.gmra.mxu1 %vm10801_vm2, %v3994_v18  ;;  %v4002_v12 = vsel %vm10802_vm3, %v3997_v53, %v4001_v23  ;;  %vm10803_vm15 = vmmov %vm10801_vm2  ;;  %v4369_v5 = vsel %vm10804_vm1, %v3874_v29, 0  ;;  %v4015_v9 = vshll.u32 %v6499_v24, 16  ;;  %v4370_v25 = vsel %vm8703_vm6, %v3875_v57, 0 }
 0x1e0   : > { %7126 = vmatpush3.bf16.msra.mxu1 %v4942_v14  ;;  %7063 = vmatprep.mubr.msk.bf16.mxu1 %vm10803_vm15, %v4002_v12  ;;  %v4003_v53 = vshrl.u32 %v6497_v31, 16  ;;  %v4023_v3 = vshll.u32 %v6500_v36, 16  ;;  %vm10805_vm12 = vnez %v10701_v17  ;;  %v4013_v39 = vor.u32 %v4011_v0, %v4009_v62  ;;  %v3878_v12 = vld [vmem:[#allocation2 + $0x5c] sm:$0xf] }
 0x1e1   : > { %7236 = vmatprep.subr.msk.bf16.mxu1 %vm10798_vm13, %v8972_v13  ;;  %v4368_v44 = vsel %vm10805_vm12, %v3873_v30, 0  ;;  %vm10806_vm2 = vcmask 1046528   ;;  %vm10807_vm3 = vcmp.ne.s16.totalorder %v8713_v33, 0  ;;  %v4017_v18 = vrot.slane %v4015_v9, 1  ;;  %vm10809_vm13 = vmmov %vm10803_vm15 }
 0x1e2   : > { %v4482_v60 = vsel %vm10806_vm2, %v4479_v38, %v4481_v37  ;;  %v6536_v47 = vcombine.low %v4368_v44, %v4369_v5  ;;  %v4371_v48 = vsel %vm10807_vm3, %v3876_v46, 0  ;;  %v4005_v21 = vor.u32 %v4003_v53, %v4001_v23  ;;  %vm10808_vm1 = vmmov %vm10806_vm2  ;;  %v3877_v53 = vld [vmem:[#allocation2 + $0x58] sm:$0xf] }
 0x1e3   : > { %v4484_v22 = vsel %vm10808_vm1, %v4481_v37, %v4483_v55  ;;  %v6537_v14 = vcombine.low %v4370_v25, %v4371_v48  ;;  %v6501_v31 = vcombine.low %v3871_v43, %v3872_v6  ;;  %vm10810_vm6 = vsmask.f32 7424  ;;  %vm10811_vm2 = vmmov %vm10809_vm13  ;;  %v3880_v43 = vld [vmem:[#allocation2 + $0x64] sm:$0xf] }
 0x1e4   : > { %v4010_v1 = vsel %vm10810_vm6, %v4005_v21, %v4009_v62  ;;  %v4025_v0 = vrot.slane %v4023_v3, 1  ;;  %vm10812_vm12 = vmmov %vm10810_vm6  ;;  %v4485_v5 = vrot.slane %v6536_v47, 1  ;;  %v6502_v23 = vcombine.low %v3873_v30, %v3874_v29 }
 0x1e5   : > { %7102 = vmatmul.mubr.msk.bf16.gmra.mxu0 %vm10803_vm15, %v4482_v60  ;;  %v4018_v38 = vsel %vm10812_vm12, %v4013_v39, %v4017_v18  ;;  %vm10813_vm3 = vmmov %vm10811_vm2  ;;  %v4027_v37 = vshrl.u32 %v6500_v36, 16  ;;  %v4487_v25 = vrot.slane %v6537_v14, 1  ;;  %vm10814_vm15 = vcmp.ne.s16.totalorder %v8735_v52, 0  ;;  %v9172_v52 = vld [vmem:[#allocation2 + $0x44] sm:$0xf] }
 0x1e6   : > { %7105 = vmatprep.mubr.msk.bf16.mxu0 %vm10809_vm13, %v4484_v22  ;;  %v4373_v9 = vsel %vm10814_vm15, %v3878_v12, 0  ;;  %v4031_v6 = vshll.u32 %v6501_v31, 16  ;;  %v4374_v62 = vsel %vm8767_vm5, %v3879_v4, 0  ;;  %v4019_v3 = vshrl.u32 %v6499_v24, 16  ;;  %vm10816_vm12 = vmmov %vm10808_vm1  ;;  %v3882_v22 = vld [vmem:[#allocation2 + $0x6c] sm:$0xf] }
 0x1e7   : > { %7064 = vmatmul.mubr.msk.bf16.gmra.mxu1 %vm10811_vm2, %v4010_v1  ;;  %v4029_v44 = vor.u32 %v4027_v37, %v4025_v0  ;;  %vm10815_vm6 = vnez %v10722_v61  ;;  %v4486_v29 = vsel %vm10816_vm12, %v4483_v55, %v4485_v5  ;;  %v4039_v30 = vshll.u32 %v6502_v23, 16  ;;  %vm10818_vm13 = vmmov %vm10811_vm2 }
 0x1e8   : > { %7067 = vmatprep.mubr.msk.bf16.mxu1 %vm10813_vm3, %v4018_v38  ;;  %v4372_v1 = vsel %vm10815_vm6, %v3877_v53, 0  ;;  %vm10817_vm1 = vcmp.ne.s16.totalorder %v8750_v41, 0  ;;  %v4021_v60 = vor.u32 %v4019_v3, %v4017_v18  ;;  %vm10819_vm2 = vmmov %vm10816_vm12  ;;  %v4033_v21 = vrot.slane %v4031_v6, 1  ;;  %v3883_v38 = vld [vmem:[#allocation2 + $0x70] sm:$0xf] }
 0x1e9   : > { %v6538_v39 = vcombine.low %v4372_v1, %v4373_v9  ;;  %v4375_v36 = vsel %vm10817_vm1, %v3880_v43, 0  ;;  %v4488_v47 = vsel %vm10819_vm2, %v4485_v5, %v4487_v25  ;;  %v9009_v24 = vcombine.low %v3875_v57, %v3876_v46  ;;  %vm10821_vm12 = vmmov %vm10813_vm3  ;;  %v3881_v3 = vld [vmem:[#allocation2 + $0x68] sm:$0xf]  ;;  %v3884_v46 = vld [vmem:[#allocation2 + $0x74] sm:$0xf] }
 0x1ea   : > { %v9006_v48 = vcombine.low %v4374_v62, %v4375_v36  ;;  %vm10820_vm15 = vsmask.f32 7424  ;;  %v6504_v14 = vcombine.low %v3877_v53, %v3878_v12  ;;  %v4041_v37 = vrot.slane %v4039_v30, 1 }
 0x1eb   : > { %v4026_v55 = vsel %vm10820_vm15, %v4021_v60, %v4025_v0  ;;  %vm10822_vm1 = vmmov %vm10820_vm15  ;;  %v4489_v9 = vrot.slane %v6538_v39, 1  ;;  %vm10824_vm2 = vcmp.ne.s16.totalorder %v8811_v58, 0  ;;  %v4043_v6 = vshrl.u32 %v6502_v23, 16 }
 0x1ec   : > { %v4034_v18 = vsel %vm10822_vm1, %v4029_v44, %v4033_v21  ;;  %v4491_v5 = vrot.slane %v9006_v48, 1  ;;  %v4377_v57 = vsel %vm10824_vm2, %v3882_v22, 0  ;;  %v4047_v0 = vshll.u32 %v9009_v24, 16 }
 0x1ed   : > { %7106 = vmatmul.mubr.msk.bf16.gmra.mxu0 %vm10818_vm13, %v4486_v29  ;;  %vm10823_vm13 = vmmov %vm10813_vm3  ;;  %v4378_v12 = vsel %vm8831_vm8, %v3883_v38, 0  ;;  %v4035_v53 = vshrl.u32 %v6501_v31, 16  ;;  %v4055_v62 = vshll.u32 %v6504_v14, 16  ;;  %v4045_v1 = vor.u32 %v4043_v6, %v4041_v37  ;;  %v3887_v6 = vld [vmem:[#allocation2 + $0x80] sm:$0xf] }
 0x1ee   : > { %7109 = vmatprep.mubr.msk.bf16.mxu0 %vm10813_vm3, %v4488_v47  ;;  %vm10825_vm3 = vnez %v10732_v49  ;;  %vm10826_vm15 = vcmask 1046528   ;;  %vm10828_vm1 = vmmov %vm10823_vm13  ;;  %v3886_v47 = vld [vmem:[#allocation2 + $0x7c] sm:$0xf]  ;;  %v4049_v31 = vrot.slane %v4047_v0, 1  ;;  %v9031_v48 = vcombine.low %v3879_v4, %v3880_v43 }
 0x1ef   : > { %7068 = vmatmul.mubr.msk.bf16.gmra.mxu1 %vm10821_vm12, %v4026_v55  ;;  %v4376_v44 = vsel %vm10825_vm3, %v3881_v3, 0  ;;  %v4490_v29 = vsel %vm10826_vm15, %v4487_v25, %v4489_v9  ;;  %vm10827_vm12 = vcmp.ne.s16.totalorder %v8820_v34, 0  ;;  %v4037_v36 = vor.u32 %v4035_v53, %v4033_v21  ;;  %vm10830_vm2 = vmmov %vm10828_vm1  ;;  %v3885_v21 = vld [vmem:[#allocation2 + $0x78] sm:$0xf]  ;;  %v6925_v34 = vpop.f32.mrf.mxu1 }
 0x1f0   : > { %7071 = vmatprep.mubr.msk.bf16.mxu1 %vm10823_vm13, %v4034_v18  ;;  %v6540_v30 = vcombine.low %v4376_v44, %v4377_v57  ;;  %v4379_v39 = vsel %vm10827_vm12, %v3884_v46, 0  ;;  %vm10829_vm13 = vmmov %vm10826_vm15  ;;  %vm10831_vm8 = vcmask 1040384   ;;  %vm10832_vm15 = vsmask.f32 7424  ;;  %v9045_v44 = vpop.f32.mrf.mxu0 }
 0x1f1   : > { %v4492_v23 = vsel %vm10829_vm13, %v4489_v9, %v4491_v5  ;;  %v9028_v60 = vcombine.low %v4378_v12, %v4379_v39  ;;  %v5436_v25 = vsel %vm10831_vm8, %v8902_v42, 0  ;;  %v4042_v55 = vsel %vm10832_vm15, %v4037_v36, %v4041_v37  ;;  %vm10833_vm12 = vmmov %vm10828_vm1  ;;  %v3888_v37 = vld [vmem:[#allocation2 + $0x84] sm:$0xf] }
 0x1f2   : > { %v4057_v18 = vrot.slane %v4055_v62, 1  ;;  %v6506_v57 = vcombine.low %v3881_v3, %v3882_v22  ;;  %7160 = vmatpush3.bf16.msra.mxu0 %v5436_v25  ;;  %v4493_v12 = vrot.slane %v6540_v30, 1  ;;  %v6508_v0 = vcombine.low %v3885_v21, %v3886_v47  ;;  %vm10835_vm13 = vmmov %vm10830_vm2  ;;  %v5137_v62 = vld [vmem:[#allocation2 + $0x10] sm:$0xf] }
 0x1f3   : > { %v4059_v4 = vshrl.u32 %v6504_v14, 16  ;;  %v4495_v43 = vrot.slane %v9028_v60, 1  ;;  %v6507_v53 = vcombine.low %v3883_v38, %v3884_v46  ;;  %vm10836_vm8 = vcmp.ne.s16.totalorder %v8853_v28, 0  ;;  %v3889_v38 = vld [vmem:[#allocation2 + $0x88] sm:$0x1] }
 0x1f4   : > { %v4381_v42 = vsel %vm10836_vm8, %v3886_v47, 0  ;;  %v4063_v22 = vshll.u32 %v9031_v48, 16  ;;  %v4382_v3 = vsel %vm8879_vm10, %v3887_v6, 0  ;;  %v4071_v30 = vshll.u32 %v6506_v57, 16  ;;  %v9053_v60 = vld [vmem:[#allocation2 + $0x1c] sm:$0xf] }
 0x1f5   : > { %7110 = vmatmul.mubr.msk.bf16.gmra.mxu0 %vm10828_vm1, %v4490_v29  ;;  %vm10834_vm1 = vmmov %vm10832_vm15  ;;  %v4061_v29 = vor.u32 %v4059_v4, %v4057_v18  ;;  %v4380_v14 = vsel %vm8846_vm14, %v3885_v21, 0  ;;  %vm10838_vm15 = vcmp.ne.s16.totalorder %v8866_v51, 0  ;;  %v4079_v25 = vshll.u32 %v6507_v53, 16 }
 0x1f6   : > { %7113 = vmatprep.mubr.msk.bf16.mxu0 %vm10830_vm2, %v4492_v23  ;;  %v4050_v9 = vsel %vm10834_vm1, %v4045_v1, %v4049_v31  ;;  %v4051_v1 = vshrl.u32 %v9009_v24, 16  ;;  %vm10837_vm2 = vcmask 1046528   ;;  %v6542_v39 = vcombine.low %v4380_v14, %v4381_v42  ;;  %v9066_v42 = vld [vmem:[#allocation2 + $0x18] sm:$0xf] }
 0x1f7   : > { %7072 = vmatmul.mubr.msk.bf16.gmra.mxu1 %vm10833_vm12, %v4042_v55  ;;  %v4494_v46 = vsel %vm10837_vm2, %v4491_v5, %v4493_v12  ;;  %v4383_v36 = vsel %vm10838_vm15, %v3888_v37, 0  ;;  %v4087_v23 = vshll.u32 %v6508_v0, 16  ;;  %vm10839_vm1 = vmmov %vm10837_vm2  ;;  %v4065_v21 = vrot.slane %v4063_v22, 1 }
 0x1f8   : > { %7075 = vmatprep.mubr.msk.bf16.mxu1 %vm10835_vm13, %v4050_v9  ;;  %v4053_v47 = vor.u32 %v4051_v1, %v4049_v31  ;;  %v4496_v24 = vsel %vm10839_vm1, %v4493_v12, %v4495_v43  ;;  %v9057_v55 = vcombine.low %v4382_v3, %v4383_v36  ;;  %v9059_v9 = vld [vmem:[#allocation2 + $0x14] sm:$0xf]  ;;  %vm10840_vm13 = vmmov %vm10833_vm12  ;;  %v9062_v5 = vcombine.low %v3887_v6, %v3888_v37  ;;  %v9069_v1 = vpop.f32.mrf.mxu0 }
 0x1f9   : > { %vm10841_vm8 = vcmp.ne.s16.totalorder %v8908_v2, 0  ;;  %v6595_v31 = vcombine.low %v5137_v62, %v9059_v9  ;;  %vm10842_vm2 = vsmask.f32 7424  ;;  %v4073_v3 = vrot.slane %v4071_v30, 1  ;;  %vm10843_vm15 = vmmov %vm10833_vm12  ;;  %v9081_v30 = vld [vmem:[#allocation2 + $0x20] sm:$0xf] }
 0x1fa   : > { %v4384_v4 = vsel %vm10841_vm8, %v3889_v38, 0  ;;  %v4058_v12 = vsel %vm10842_vm2, %v4053_v47, %v4057_v18  ;;  %v9074_v14 = vcombine.low %v9066_v42, %v9053_v60  ;;  %v4067_v37 = vshrl.u32 %v9031_v48, 16  ;;  %vm10845_vm1 = vmmov %vm10840_vm13  ;;  %10846 = vst [vmem:[#allocation31_spill] sm:$0xff] %v9081_v30  ;;  %v9084_v7 = vpop.f32.mrf.mxu0 }
 0x1fb   : > { %v4497_v22 = vrot.slane %v6542_v39, 1  ;;  %v4075_v62 = vshrl.u32 %v6506_v57, 16  ;;  %v4081_v36 = vrot.slane %v4079_v25, 1  ;;  %v6544_v18 = vcombine.low %v4384_v4, %v4384_v4  ;;  %v9089_v57 = vld [vmem:[#allocation2 + $0x24] sm:$0xf]  ;;  %vm10849_vm8 = vmmov %vm10845_vm1 }
 0x1fc   : > { %v4091_v47 = vshrl.u32 %v6508_v0, 16  ;;  %v4095_v2 = vshll.u32 %v9062_v5, 16  ;;  %v5258_v51 = vshll.u32 %v6595_v31, 16  ;;  %v4083_v48 = vshrl.u32 %v6507_v53, 16  ;;  %10847 = vst [vmem:[#allocation9_spill] sm:$0xff] %v9089_v57 }
 0x1fd   : > { %7114 = vmatmul.mubr.msk.bf16.gmra.mxu0 %vm10833_vm12, %v4494_v46  ;;  %vm10844_vm12 = vmmov %vm10842_vm2  ;;  %v4089_v46 = vrot.slane %v4087_v23, 1  ;;  %v5263_v39 = vshll.u32 %v9074_v14, 16  ;;  %v9087_v23 = vld [vmem:[#allocation2 + $0x2c] sm:$0xf]  ;;  %v4069_v25 = vor.u32 %v4067_v37, %v4065_v21  ;;  %v9098_v53 = vld [vmem:[#allocation2 + $0x28] sm:$0xf] }
 0x1fe   : > { %7117 = vmatprep.mubr.msk.bf16.mxu0 %vm10840_vm13, %v4496_v24  ;;  %v4066_v6 = vsel %vm10844_vm12, %v4061_v29, %v4065_v21  ;;  %v4499_v24 = vrot.slane %v9057_v55, 1  ;;  %v4077_v29 = vor.u32 %v4075_v62, %v4073_v3  ;;  %vm10848_vm13 = vcmask 1046528   ;;  %v4747_v37 = vld [vmem:[#allocation2 + $0x10] sm:$0xf] }
 0x1ff   : > { %7076 = vmatmul.mubr.msk.bf16.gmra.mxu1 %vm10843_vm15, %v4058_v12  ;;  %v6510_v12 = vcombine.low %v3889_v38, %v3889_v38  ;;  %v4498_v55 = vsel %vm10848_vm13, %v4495_v43, %v4497_v22  ;;  %v4093_v4 = vor.u32 %v4091_v47, %v4089_v46  ;;  %vm10850_vm2 = vmmov %vm10848_vm13  ;;  %v4501_v38 = vrot.slane %v6544_v18, 1  ;;  %v9105_v47 = vpop.f32.mrf.mxu0 }
 0x200   : > { %7079 = vmatprep.mubr.msk.bf16.mxu1 %vm10845_vm1, %v4066_v6  ;;  %v4500_v0 = vsel %vm10850_vm2, %v4497_v22, %v4499_v24  ;;  %v4085_v6 = vor.u32 %v4083_v48, %v4081_v36  ;;  %v9096_v62 = vcombine.low %v9081_v30, %v9089_v57  ;;  %vm10851_vm15 = vmmov %vm10845_vm1  ;;  %v4097_v28 = vrot.slane %v4095_v2, 1  ;;  %v4750_v57 = vld [vmem:[#allocation2 + $0x1c] sm:$0xf]  ;;  %v9113_v30 = vld [vmem:[#allocation2 + $0x30] sm:$0xf] }
 0x201   : > { %v5260_v54 = vrot.slane %v5258_v51, 1  ;;  %v4103_v21 = vshll.u32 %v6510_v12, 16  ;;  %v9103_v43 = vcombine.low %v9098_v53, %v9087_v23  ;;  %v4074_v22 = vsel %vm10844_vm12, %v4069_v25, %v4073_v3  ;;  %vm10852_vm1 = vmmov %vm10844_vm12  ;;  %v9124_v35 = vpop.f32.mrf.mxu0 }
 0x202   : > { %v4082_v18 = vsel %vm10852_vm1, %v4077_v29, %v4081_v36  ;;  %v5265_v48 = vrot.slane %v5263_v39, 1  ;;  %vm10853_vm13 = vmmov %vm10849_vm8  ;;  %v5256_v51 = vshrl.u32 %v6595_v31, 16  ;;  %v4099_v12 = vshrl.u32 %v9062_v5, 16  ;;  %v10858_v29 = vld [vmem:[#allocation11_spill] sm:$0xff] }
 0x203   : > { %vm10855_vm2 = vmmov %vm10852_vm1  ;;  %vm10857_vm10 = vcmask 1046528   ;;  %v5267_v36 = vshrl.u32 %v9074_v14, 16  ;;  %vm10859_vm12 = vnez %v10858_v29  ;;  %v5271_v25 = vshll.u32 %v9096_v62, 16  ;;  %v4751_v29 = vld [vmem:[#allocation2 + $0x20] sm:$0xf] }
 0x204   : > { %v4098_v2 = vsel %vm10855_vm2, %v4093_v4, %v4097_v28  ;;  %v4502_v3 = vsel %vm10857_vm10, %v4499_v24, %v4501_v38  ;;  %v4779_v39 = vsel %vm10859_vm12, %v4747_v37, 0  ;;  %v5261_v31 = vor.u32 %v5260_v54, %v5256_v51  ;;  %v9128_v24 = vld [vmem:[#allocation2 + $0x4c] sm:$0xf]  ;;  %vm10862_vm10 = vmmov %vm10852_vm1 }
 0x205   : > { %7118 = vmatmul.mubr.msk.bf16.gmra.mxu0 %vm10849_vm8, %v4498_v55  ;;  %v4748_v55 = vld [vmem:[#allocation2 + $0x14] sm:$0xf]  ;;  %vm10854_vm8 = vmmov %vm10852_vm1  ;;  %v4101_v4 = vor.u32 %v4099_v12, %v4097_v28  ;;  %v4105_v5 = vrot.slane %v4103_v21, 1  ;;  %10860 = vst [vmem:[#allocation3_spill] sm:$0xff] %v9128_v24  ;;  %v5269_v14 = vor.u32 %v5267_v36, %v5265_v48  ;;  %v9133_v37 = vadd.f32 %v9045_v44, %v6925_v34  ;;  %v9139_v28 = vld [vmem:[#allocation2 + $0x38] sm:$0xf]  ;;  %v2392_v36 = vpop.f32.mrf.mxu1  ;;  %v9149_v34 = vpop.f32.mrf.mxu0 }
 0x206   : > { %7121 = vmatprep.mubr.msk.bf16.mxu0 %vm10851_vm15, %v4500_v0  ;;  %v4090_v0 = vsel %vm10854_vm8, %v4085_v6, %v4089_v46  ;;  %vm10856_vm15 = vmmov %vm10853_vm13  ;;  %v4749_v46 = vld [vmem:[#allocation2 + $0x18] sm:$0xf]  ;;  %v9121_v6 = vld [vmem:[#allocation2 + $0x3c] sm:$0xf]  ;;  %v4780_v38 = vsel %vm7529_vm11, %v4748_v55, 0  ;;  %v5266_v21 = vsel %vm10862_vm10, %v5261_v31, %v5265_v48  ;;  %v5275_v12 = vshrl.u32 %v9096_v62, 16 }
 0x207   : > { %7080 = vmatmul.mubr.msk.bf16.gmra.mxu1 %vm10853_vm13, %v4074_v22  ;;  %v5279_v22 = vshll.u32 %v9103_v43, 16  ;;  %10861 = vst [vmem:[#allocation36_spill] sm:$0xff] %v9133_v37  ;;  %v9142_v51 = vcombine.low %v4779_v39, %v4780_v38  ;;  %v9147_v55 = vcombine.low %v9139_v28, %v9121_v6  ;;  %v9151_v44 = vld [vmem:[#allocation2 + $0x40] sm:$0xf]  ;;  %v9153_v37 = vld [vmem:[#allocation2 + $0x48] sm:$0xf]  ;;  %vm10863_vm1 = vmmov %vm10853_vm13  ;;  %v9159_v62 = vadd.f32 %v9069_v1, %v2392_v36  ;;  %v6926_v40 = vpop.f32.mrf.mxu1 }
 0x208   : > { %7083 = vmatprep.mubr.msk.bf16.mxu1 %vm10856_vm15, %v4082_v18  ;;  %v9126_v18 = vld [vmem:[#allocation2 + $0x34] sm:$0xf]  ;;  %v5273_v58 = vrot.slane %v5271_v25, 1  ;;  %v4782_v48 = vsel %vm7529_vm11, %v4750_v57, 0  ;;  %v4752_v39 = vld [vmem:[#allocation2 + $0x24] sm:$0xf]  ;;  %v9163_v38 = vcombine.low %v9153_v37, %v9128_v24  ;;  %vm10865_vm13 = vmmov %vm10863_vm1  ;;  %v9178_v61 = vadd.f32 %v9084_v7, %v6926_v40 }
 0x209   : > { %v9137_v54 = vcombine.low %v9113_v30, %v9126_v18  ;;  %10864 = vst [vmem:[#allocation11_spill] sm:$0xff] %v9159_v62  ;;  %v4754_v31 = vld [vmem:[#allocation2 + $0x2c] sm:$0xf]  ;;  %vm10866_vm8 = vmmov %vm10855_vm2  ;;  %v5281_v41 = vrot.slane %v5279_v22, 1  ;;  %v10867_v25 = vld [vmem:[#allocation12_spill] sm:$0xff]  ;;  %vm10874_vm10 = vcmask 1040384  }
 0x20a   : > { %v9167_v49 = vsel %vm10866_vm8, %v4101_v4, %v4105_v5  ;;  %vm10868_vm2 = vnez %v10867_v25  ;;  %v10869_v1 = vld [vmem:[#allocation15_spill] sm:$0xff]  ;;  %10871 = vst [vmem:[#allocation12_spill] sm:$0xff] %v9178_v61  ;;  %v4755_v4 = vld [vmem:[#allocation2 + $0x30] sm:$0xf]  ;;  %vm10873_vm12 = vmmov %vm10863_vm1  ;;  %v9193_v22 = vsel %vm10874_vm10, %v8972_v13, 0  ;;  %v4784_v40 = vsel %vm7529_vm11, %v4752_v39, 0 }
 0x20b   : > { %v4781_v57 = vsel %vm10868_vm2, %v4749_v46, 0  ;;  %vm10870_vm15 = vnez %v10869_v1  ;;  %v5287_v62 = vshll.u32 %v9137_v54, 16  ;;  %v9186_v5 = vld [vmem:[#allocation2 + $0x50] sm:$0xf]  ;;  %v5295_v7 = vshll.u32 %v9147_v55, 16  ;;  %vm10886_vm10 = vmmov %vm10863_vm1 }
 0x20c   : > { %v4783_v36 = vsel %vm10870_vm15, %v4751_v29, 0  ;;  %10872 = vst [vmem:[#allocation15_spill] sm:$0xff] %v9186_v5  ;;  %v9189_v46 = vcombine.low %v4781_v57, %v4782_v48  ;;  %v2395_v29 = vpop.f32.mrf.mxu1  ;;  %v9198_v25 = vld [vmem:[#allocation2 + $0x5c] sm:$0xf]  ;;  %v5277_v61 = vor.u32 %v5275_v12, %v5273_v58  ;;  %v4753_v48 = vld [vmem:[#allocation2 + $0x28] sm:$0xf] }
 0x20d   : > { %7122 = vmatmul.mubr.msk.bf16.gmra.mxu0 %vm10863_vm1, %v4502_v3  ;;  %v5283_v3 = vshrl.u32 %v9103_v43, 16  ;;  %v9184_v43 = vcombine.low %v9151_v44, %v9172_v52  ;;  %10875 = vst [vmem:[#allocation43_spill] sm:$0xff] %v9198_v25  ;;  %v5311_v13 = vshll.u32 %v9163_v38, 16  ;;  %v9206_v57 = vld [vmem:[#allocation2 + $0x54] sm:$0xf]  ;;  %v9208_v39 = vcombine.low %v4783_v36, %v4784_v40 }
 0x20e   : > { %7161 = vmatprep.mubr.msk.bf16.mxu0 %vm10865_vm13, %v5266_v21  ;;  %v9180_v21 = vpop.f32.mrf.mxu0  ;;  %vm10876_vm13 = vmmov %vm10866_vm8  ;;  %10878 = vst [vmem:[#allocation45_spill] sm:$0xff] %v9206_v57  ;;  %v4786_v17 = vsel %vm7529_vm11, %v4754_v31, 0  ;;  %vm10880_vm8 = vnez %v10518_v63  ;;  %v4758_v36 = vld [vmem:[#allocation2 + $0x3c] sm:$0xf]  ;;  %v5299_v63 = vshrl.u32 %v9147_v55, 16  ;;  %v4788_v24 = vsel %vm7529_vm11, %v4756_v20, 0 }
 0x20f   : > { %7084 = vmatmul.mubr.msk.bf16.gmra.mxu1 %vm10873_vm12, %v4090_v0  ;;  %v5274_v1 = vsel %vm10876_vm13, %v5269_v14, %v5273_v58  ;;  %v9203_v0 = vadd.f32 %v9105_v47, %v2395_v29  ;;  %v5285_v33 = vor.u32 %v5283_v3, %v5281_v41  ;;  %v9216_v58 = vld [vmem:[#allocation2 + $0x58] sm:$0xf]  ;;  %v5289_v47 = vrot.slane %v5287_v62, 1  ;;  %vm10881_vm2 = vmmov %vm10876_vm13  ;;  %v9244_v55 = vld [vmem:[#allocation2 + $0x60] sm:$0xf] }
 0x210   : > { %7087 = vmatprep.mubr.msk.bf16.mxu1 %vm10863_vm1, %v4098_v2  ;;  %v9214_v2 = vcombine.low %v9186_v5, %v9206_v57  ;;  %10879 = vst [vmem:[#allocation46_spill] sm:$0xff] %v9216_v58  ;;  %v9218_v14 = vpop.f32.mrf.mxu0  ;;  %v4787_v12 = vsel %vm10880_vm8, %v4755_v4, 0  ;;  %v5303_v3 = vshll.u32 %v9184_v43, 16  ;;  %v9225_v40 = vcombine.low %v9216_v58, %v9198_v25  ;;  %v10882_v57 = vld [vmem:[#allocation16_spill] sm:$0xff]  ;;  %v4757_v5 = vld [vmem:[#allocation2 + $0x38] sm:$0xf]  ;;  %vm10884_vm12 = vmmov %vm10863_vm1 }
 0x211   : > { %10877 = vst [vmem:[#allocation44_spill] sm:$0xff] %v9203_v0  ;;  %v5282_v31 = vsel %vm10881_vm2, %v5277_v61, %v5281_v41  ;;  %v5291_v29 = vshrl.u32 %v9137_v54, 16  ;;  %v5297_v0 = vrot.slane %v5295_v7, 1  ;;  %vm10883_vm15 = vnez %v10882_v57  ;;  %v4759_v58 = vld [vmem:[#allocation2 + $0x40] sm:$0xf]  ;;  %vm10887_vm1 = vmmov %vm10881_vm2 }
 0x212   : > { %v4785_v62 = vsel %vm10883_vm15, %v4753_v48, 0  ;;  %v5313_v25 = vrot.slane %v5311_v13, 1  ;;  %v5290_v61 = vsel %vm10887_vm1, %v5285_v33, %v5289_v47  ;;  %v9239_v41 = vcombine.low %v4787_v12, %v4788_v24  ;;  %v4760_v7 = vld [vmem:[#allocation2 + $0x44] sm:$0xf]  ;;  %v9246_v48 = vpop.f32.mrf.mxu0  ;;  %vm10890_vm13 = vmmov %vm10886_vm10  ;;  %v6929_v24 = vpop.f32.mrf.mxu1 }
 0x213   : > { %v9233_v4 = vcombine.low %v4785_v62, %v4786_v17  ;;  %v4790_v54 = vsel %vm7529_vm11, %v4758_v36, 0  ;;  %v5293_v17 = vor.u32 %v5291_v29, %v5289_v47  ;;  %v5305_v20 = vrot.slane %v5303_v3, 1  ;;  %v10891_v36 = vld [vmem:[#allocation18_spill] sm:$0xff]  ;;  %v10893_v47 = vld [vmem:[#allocation21_spill] sm:$0xff]  ;;  %vm10895_vm15 = vmmov %vm10886_vm10 }
 0x214   : > { %10888 = vst [vmem:[#allocation47_spill] sm:$0xff] %v9239_v41  ;;  %v5315_v13 = vshrl.u32 %v9163_v38, 16  ;;  %v5327_v57 = vshll.u32 %v9225_v40, 16  ;;  %v5301_v33 = vor.u32 %v5299_v63, %v5297_v0  ;;  %v5307_v12 = vshrl.u32 %v9184_v43, 16  ;;  %v9259_v3 = vld [vmem:[#allocation2 + $0x48] sm:$0xf] }
 0x215   : > { %7162 = vmatmul.mubr.msk.bf16.vlgmr.msra.gmra.mxu0 %vm10884_vm12, %v5274_v1  ;;  %10885 = vst [vmem:[#allocation16_spill] sm:$0xff] %v9233_v4  ;;  %v5319_v1 = vshll.u32 %v9214_v2, 16  ;;  %vm10892_vm8 = vnez %v10891_v36  ;;  %vm10894_vm2 = vnez %v10893_v47  ;;  %vm10896_vm12 = vmmov %vm10887_vm1  ;;  %v9265_v41 = vadd.f32 %v9124_v35, %v6929_v24  ;;  %v9269_v43 = vld [vmem:[#allocation2 + $0x4c] sm:$0xf]  ;;  %v9271_v36 = vld [vmem:[#allocation2 + $0x64] sm:$0xf] }
 0x216   : > { %7165 = vmatprep.mubr.msk.bf16.mxu0 %vm10886_vm10, %v5282_v31  ;;  %v9250_v31 = vld [vmem:[#allocation2 + $0x6c] sm:$0xf]  ;;  %v4789_v62 = vsel %vm10892_vm8, %v4757_v5, 0  ;;  %v4791_v29 = vsel %vm10894_vm2, %v4759_v58, 0  ;;  %v5298_v38 = vsel %vm10896_vm12, %v5293_v17, %v5297_v0  ;;  %v9273_v5 = vld [vmem:[#allocation2 + $0x68] sm:$0xf]  ;;  %v2408_v58 = vpop.f32.mrf.mxu1  ;;  %v9288_v17 = vpop.f32.mrf.mxu0  ;;  %vm10899_vm10 = vmmov %vm10887_vm1 }
 0x217   : > { %10889 = vst [vmem:[#allocation48_spill] sm:$0xff] %v9250_v31  ;;  %7088 = vmatmul.mubr.msk.bf16.gmra.mxu1 %vm10890_vm13, %v9167_v49  ;;  %10897 = vst [vmem:[#allocation18_spill] sm:$0xff] %v9265_v41  ;;  %v5317_v49 = vor.u32 %v5315_v13, %v5313_v25  ;;  %v9267_v63 = vcombine.low %v4789_v62, %v4790_v54  ;;  %v4792_v47 = vsel %vm7529_vm11, %v4760_v7, 0  ;;  %v5321_v4 = vrot.slane %v5319_v1, 1  ;;  %v5631_v62 = vld [vmem:[#allocation2 + $0x10] sm:$0xe] }
 0x218   : > { %7127 = vmatprep.mubr.msk.bf16.mxu1 %vm10895_vm15, %v9142_v51  ;;  %v9279_v51 = vcombine.low %v9244_v55, %v9271_v36  ;;  %v9283_v35 = vcombine.low %v9273_v5, %v9250_v31  ;;  %v9286_v0 = vadd.f32 %v9149_v34, %v2408_v58  ;;  %v5309_v54 = vor.u32 %v5307_v12, %v5305_v20  ;;  %v6930_v1 = vpop.f32.mrf.mxu1  ;;  %vm10902_vm8 = vmmov %vm10899_vm10 }
 0x219   : > { %10898 = vst [vmem:[#allocation21_spill] sm:$0xff] %v9267_v63  ;;  %v9290_v13 = vcombine.low %v4791_v29, %v4792_v47  ;;  %v5329_v24 = vrot.slane %v5327_v57, 1  ;;  %v5306_v7 = vsel %vm10899_vm10, %v5301_v33, %v5305_v20  ;;  %v5323_v41 = vshrl.u32 %v9214_v2, 16  ;;  %v10900_v63 = vld [vmem:[#allocation23_spill] sm:$0xff]  ;;  %vm10903_vm2 = vmmov %vm10902_vm8 }
 0x21a   : > { %vm10901_vm1 = vnez %v10900_v63  ;;  %v4794_v34 = vsel %vm7529_vm11, %v9269_v43, 0  ;;  %v5314_v12 = vsel %vm10902_vm8, %v5309_v54, %v5313_v25  ;;  %v9303_v57 = vadd.f32 %v9180_v21, %v6930_v1  ;;  %vm10904_vm15 = vmmov %vm10890_vm13  ;;  %v2411_v33 = vpop.f32.mrf.mxu1  ;;  %v9317_v21 = vpop.f32.mrf.mxu0 }
 0x21b   : > { %v4793_v31 = vsel %vm10901_vm1, %v9259_v3, 0  ;;  %v9306_v20 = vsel %vm10903_vm2, %v5317_v49, %v5321_v4  ;;  %v5331_v2 = vshrl.u32 %v9225_v40, 16  ;;  %v5325_v29 = vor.u32 %v5323_v41, %v5321_v4  ;;  %vm10907_vm8 = vmmov %vm10903_vm2 }
 0x21c   : > { %v5335_v58 = vshll.u32 %v9279_v51, 16  ;;  %v5343_v47 = vshll.u32 %v9283_v35, 16  ;;  %vm10905_vm12 = vcmp.ne.s16.totalorder %v7548_v16, 0  ;;  %v9315_v25 = vadd.f32 %v9218_v14, %v2411_v33  ;;  %v6933_v15 = vpop.f32.mrf.mxu1 }
 0x21d   : > { %7166 = vmatmul.mubr.msk.bf16.gmra.mxu0 %vm10890_vm13, %v5290_v61  ;;  %v5632_v61 = vsel %vm10905_vm12, %v5631_v62, 0  ;;  %v9319_v49 = vor.u32 %v5331_v2, %v5329_v24  ;;  %v5339_v40 = vshrl.u32 %v9279_v51, 16  ;;  %vm10906_vm10 = vcmp.ne.s16.totalorder %v10760_v32, 0  ;;  %v9339_v32 = vld [vmem:[#allocation2 + $0x70] sm:$0xf] }
 0x21e   : > { %7169 = vmatprep.mubr.msk.bf16.mxu0 %vm10904_vm15, %v5298_v38  ;;  %v5633_v4 = vsel %vm10906_vm10, %v9059_v9, 0  ;;  %v9328_v41 = vsel %vm10907_vm8, %v5325_v29, %v5329_v24  ;;  %v5634_v16 = vsel %vm8318_vm7, %v9066_v42, 0  ;;  %vm10908_vm2 = vcmp.ne.s16.totalorder %v10763_v26, 0  ;;  %vm10909_vm15 = vmmov %vm10890_vm13  ;;  %v2719_v24 = vpop.f32.mrf.mxu0  ;;  %v9370_v62 = vld [vmem:[#allocation2 + $0x78] sm:$0xf] }
 0x21f   : > { %7128 = vmatmul.mubr.msk.bf16.vlgmr.msra.gmra.mxu1 %vm10890_vm13, %v9189_v46  ;;  %v5635_v14 = vsel %vm10908_vm2, %v9053_v60, 0  ;;  %v6629_v38 = vcombine.low %v5632_v61, %v5633_v4  ;;  %v5638_v46 = vsel %vm10779_vm4, %v9098_v53, 0  ;;  %vm10910_vm7 = vcmp.ne.s16.totalorder %v8494_v19, 0  ;;  %v5162_v53 = vld [vmem:[#allocation2 + $0x74] sm:$0xf]  ;;  %vm10915_vm10 = vmmov %vm10890_vm13 }
 0x220   : > { %7194 = vmatpush3.bf16.msra.mxu1 %v9193_v22  ;;  %7131 = vmatprep.mubr.msk.bf16.mxu1 %vm10909_vm15, %v9208_v39  ;;  %v9341_v9 = vcombine.low %v5634_v16, %v5635_v14  ;;  %v5639_v11 = vsel %vm10910_vm7, %v9087_v23, 0  ;;  %v5640_v26 = vsel %vm8515_vm0, %v9113_v30, 0  ;;  %v9352_v60 = vrot.slane %v5335_v58, 1  ;;  %v9356_v22 = vld [vmem:[#allocation2 + $0x7c] sm:$0xf]  ;;  %v10912_v23 = vld [vmem:[#allocation14_spill] sm:$0xff]  ;;  %vm10918_vm2 = vmmov %vm10915_vm10  ;;  %v9399_v61 = vpop.f32.mrf.mxu0 }
 0x221   : > { %v9354_v42 = vrot.slane %v5343_v47, 1  ;;  %v5750_v39 = vrot.slane %v6629_v38, 1  ;;  %v9358_v54 = vcombine.low %v5638_v46, %v5639_v11  ;;  %vm10911_vm4 = vcmp.ne.s16.totalorder %v8554_v50, 0  ;;  %v10920_v4 = vld [vmem:[#allocation3_spill] sm:$0xff]  ;;  %v10921_v16 = vld [vmem:[#allocation10_spill] sm:$0xff]  ;;  %v10924_v14 = vld [vmem:[#allocation4_spill] sm:$0xff] }
 0x222   : > { %v5751_v45 = vrot.slane %v9341_v9, 1  ;;  %v5641_v19 = vsel %vm10911_vm4, %v9126_v18, 0  ;;  %vm10913_vm12 = vnez %v10912_v23  ;;  %vm10914_vm0 = vcmp.ne.s16.totalorder %v8560_v56, 0  ;;  %v10926_v38 = vld [vmem:[#allocation45_spill] sm:$0xff]  ;;  %v10933_v23 = vld [vmem:[#allocation47_spill] sm:$0xff] }
 0x223   : > { %v5642_v27 = vsel %vm10913_vm12, %v9139_v28, 0  ;;  %v5643_v30 = vsel %vm10914_vm0, %v9121_v6, 0  ;;  %v5755_v1 = vrot.slane %v9358_v54, 1  ;;  %v6633_v2 = vcombine.low %v5640_v26, %v5641_v19  ;;  %v10927_v46 = vld [vmem:[#allocation5_spill] sm:$0xff]  ;;  %v10929_v26 = vld [vmem:[#allocation16_spill] sm:$0xff]  ;;  %vm10930_vm12 = vmmov %vm10918_vm2 }
 0x224   : > { %v6634_v33 = vcombine.low %v5642_v27, %v5643_v30  ;;  %v5644_v50 = vsel %vm10793_vm9, %v9151_v44, 0  ;;  %v9378_v18 = vcombine.low %v9339_v32, %v5162_v53  ;;  %v9382_v56 = vcombine.low %v9370_v62, %v9356_v22  ;;  %v9425_v30 = vpop.f32.mrf.mxu0 }
 0x225   : > { %7170 = vmatmul.mubr.msk.bf16.gmra.mxu0 %vm10915_vm10, %v5306_v7  ;;  %vm10916_vm13 = vcmask 1046528   ;;  %vm10917_vm8 = vcmp.ne.s16.totalorder %v8578_v59, 0  ;;  %v5757_v44 = vrot.slane %v6633_v2, 1  ;;  %vm10919_vm9 = vnez %v10697_v10  ;;  %v2424_v10 = vpop.f32.mrf.mxu1 }
 0x226   : > { %v9387_v6 = vsel %vm10916_vm13, %v5750_v39, %v5751_v45  ;;  %v5645_v28 = vsel %vm10917_vm8, %v9172_v52, 0  ;;  %7173 = vmatprep.mubr.msk.bf16.mxu0 %vm10918_vm2, %v5314_v12  ;;  %v5759_v7 = vrot.slane %v6634_v33, 1  ;;  %v5646_v58 = vsel %vm10919_vm9, %v9153_v37, 0  ;;  %v10923_v52 = vld [vmem:[#allocation15_spill] sm:$0xff]  ;;  %vm10931_vm0 = vmmov %vm10916_vm13  ;;  %v10935_v33 = vld [vmem:[#allocation46_spill] sm:$0xff] }
 0x227   : > { %v6635_v29 = vcombine.low %v5644_v50, %v5645_v28  ;;  %v9397_v47 = vadd.f32 %v9246_v48, %v6933_v15  ;;  %vm10922_vm15 = vcmp.ne.s16.totalorder %v10921_v16, 0  ;;  %vm10925_vm7 = vnez %v10924_v14  ;;  %7132 = vmatmul.mubr.msk.bf16.gmra.mxu1 %vm10930_vm12, %v10929_v26  ;;  %vm10932_vm10 = vmmov %vm10931_vm0  ;;  %v10936_v50 = vld [vmem:[#allocation19_spill] sm:$0xff]  ;;  %v6934_v16 = vpop.f32.mrf.mxu1 }
 0x228   : > { %v5647_v59 = vsel %vm10922_vm15, %v10920_v4, 0  ;;  %v5648_v12 = vsel %vm10925_vm7, %v10923_v52, 0  ;;  %vm10928_vm4 = vcmp.ne.s16.totalorder %v10927_v46, 0  ;;  %v9415_v37 = vsel %vm10931_vm0, %v5755_v1, %v5757_v44  ;;  %vm10934_vm13 = vmmov %vm10918_vm2  ;;  %v10938_v15 = vld [vmem:[#allocation43_spill] sm:$0xff]  ;;  %v10939_v4 = vld [vmem:[#allocation17_spill] sm:$0xff] }
 0x229   : > { %v5649_v11 = vsel %vm10928_vm4, %v10926_v38, 0  ;;  %v9418_v48 = vsel %vm10932_vm10, %v5757_v44, %v5759_v7  ;;  %v5761_v39 = vrot.slane %v6635_v29, 1  ;;  %v6636_v19 = vcombine.low %v5646_v58, %v5647_v59  ;;  %7135 = vmatprep.mubr.msk.bf16.mxu1 %vm10934_vm13, %v10933_v23  ;;  %vm10941_vm9 = vmmov %vm10931_vm0  ;;  %v10943_v38 = vld [vmem:[#allocation20_spill] sm:$0xff] }
 0x22a   : > { %v9423_v27 = vadd.f32 %v9288_v17, %v2424_v10  ;;  %v6637_v2 = vcombine.low %v5648_v12, %v5649_v11  ;;  %vm10937_vm8 = vnez %v10936_v50  ;;  %vm10940_vm2 = vcmp.ne.s16.totalorder %v10939_v4, 0  ;;  %v9448_v10 = vld [vmem:[#allocation2 + $0x80] sm:$0xf]  ;;  %vm10946_vm7 = vmmov %vm10931_vm0  ;;  %v9460_v50 = vpop.f32.mrf.mxu0 }
 0x22b   : > { %v5650_v28 = vsel %vm10937_vm8, %v10935_v33, 0  ;;  %v5651_v44 = vsel %vm10940_vm2, %v10938_v15, 0  ;;  %v9434_v29 = vsel %vm10941_vm9, %v5759_v7, %v5761_v39  ;;  %v5763_v58 = vrot.slane %v6636_v19, 1  ;;  %v2427_v7 = vpop.f32.mrf.mxu1  ;;  %v10947_v33 = vld [vmem:[#allocation48_spill] sm:$0xff]  ;;  %vm10950_vm4 = vmmov %vm10930_vm12 }
 0x22c   : > { %v6638_v59 = vcombine.low %v5650_v28, %v5651_v44  ;;  %v5652_v52 = vsel %vm10815_vm6, %v9244_v55, 0  ;;  %v9440_v14 = vadd.f32 %v9317_v21, %v6934_v16  ;;  %v5765_v12 = vrot.slane %v6637_v2, 1  ;;  %v10948_v21 = vld [vmem:[#allocation37_spill] sm:$0xff]  ;;  %vm10953_vm12 = vmmov %vm10950_vm4  ;;  %v5168_v16 = vld [vmem:[#allocation2 + $0x8c] sm:$0xf] }
 0x22d   : > { %vm10944_vm15 = vcmp.ne.s16.totalorder %v10943_v38, 0  ;;  %v5654_v26 = vsel %vm8767_vm5, %v9273_v5, 0  ;;  %v9451_v19 = vsel %vm10946_vm7, %v5761_v39, %v5763_v58  ;;  %vm10949_vm6 = vcmp.ne.s16.totalorder %v10948_v21, 0  ;;  %7174 = vmatmul.mubr.msk.bf16.gmra.mxu0 %vm10950_vm4, %v9306_v20  ;;  %v5166_v5 = vld [vmem:[#allocation2 + $0x84] sm:$0xf]  ;;  %vm10951_vm5 = vmmov %vm10931_vm0  ;;  %v10966_v21 = vld [vmem:[#allocation34_spill] sm:$0xff]  ;;  %v6937_v3 = vpop.f32.mrf.mxu1 }
 0x22e   : > { %v5653_v46 = vsel %vm10944_vm15, %v9271_v36, 0  ;;  %v5767_v23 = vrot.slane %v6638_v59, 1  ;;  %v5655_v2 = vsel %vm10949_vm6, %v10947_v33, 0  ;;  %v9458_v36 = vadd.f32 %v2719_v24, %v2427_v7  ;;  %v9462_v28 = vld [vmem:[#allocation2 + $0x88] sm:$0xf]  ;;  %7177 = vmatprep.mubr.msk.bf16.mxu0 %vm10953_vm12, %v9328_v41  ;;  %v10954_v59 = vld [vmem:[#allocation40_spill] sm:$0xff]  ;;  %vm10962_vm8 = vmmov %vm10950_vm4 }
 0x22f   : > { %v6639_v55 = vcombine.low %v5652_v52, %v5653_v46  ;;  %v9465_v15 = vsel %vm10951_vm5, %v5763_v58, %v5765_v12  ;;  %v6640_v39 = vcombine.low %v5654_v26, %v5655_v2  ;;  %v5656_v44 = vsel %vm10825_vm3, %v9339_v32, 0  ;;  %v10956_v52 = vld [vmem:[#allocation42_spill] sm:$0xff]  ;;  %v10958_v32 = vld [vmem:[#allocation41_spill] sm:$0xff]  ;;  %vm10963_vm2 = vmmov %vm10931_vm0 }
 0x230   : > { %v9473_v20 = vsel %vm10931_vm0, %v5765_v12, %v5767_v23  ;;  %vm10955_vm10 = vcmp.ne.s16.totalorder %v10954_v59, 0  ;;  %vm10957_vm13 = vnez %v10956_v52  ;;  %v9480_v38 = vld [vmem:[#allocation2 + $0x90] sm:$0x1]  ;;  %vm10959_vm3 = vcmp.ne.s16.totalorder %v10958_v32, 0  ;;  %v10961_v7 = vld [vmem:[#allocation21_spill] sm:$0xff]  ;;  %vm10968_vm7 = vmmov %vm10950_vm4 }
 0x231   : > { %v5769_v24 = vrot.slane %v6639_v55, 1  ;;  %v5657_v17 = vsel %vm10955_vm10, %v5162_v53, 0  ;;  %v5658_v58 = vsel %vm10957_vm13, %v9370_v62, 0  ;;  %v5771_v46 = vrot.slane %v6640_v39, 1  ;;  %7136 = vmatmul.mubr.msk.bf16.gmra.mxu1 %vm10962_vm8, %v10961_v7  ;;  %v10964_v62 = vld [vmem:[#allocation30_spill] sm:$0xff]  ;;  %v10970_v59 = vld [vmem:[#allocation33_spill] sm:$0xff]  ;;  %vm10974_vm5 = vmmov %vm10931_vm0 }
 0x232   : > { %v6641_v11 = vcombine.low %v5656_v44, %v5657_v17  ;;  %v5659_v41 = vsel %vm10959_vm3, %v9356_v22, 0  ;;  %v5660_v12 = vsel %vm8846_vm14, %v9448_v10, 0  ;;  %vm10965_vm9 = vcmp.ne.s16.totalorder %v10964_v62, 0  ;;  %7139 = vmatprep.mubr.msk.bf16.mxu1 %vm10968_vm7, %v9290_v13  ;;  %v9500_v22 = vpop.f32.mrf.mxu0  ;;  %v4763_v39 = vld [vmem:[#allocation2 + $0x50] sm:$0xf]  ;;  %vm10969_vm14 = vmmov %vm10931_vm0  ;;  %v10975_v62 = vld [vmem:[#allocation24_spill] sm:$0xff] }
 0x233   : > { %v9491_v53 = vsel %vm10963_vm2, %v5767_v23, %v5769_v24  ;;  %v6642_v55 = vcombine.low %v5658_v58, %v5659_v41  ;;  %v5661_v33 = vsel %vm10965_vm9, %v5166_v5, 0  ;;  %vm10967_vm15 = vnez %v10966_v21  ;;  %v10972_v41 = vld [vmem:[#allocation8_spill] sm:$0xff]  ;;  %v4764_v26 = vld [vmem:[#allocation2 + $0x54] sm:$0xf]  ;;  %vm10978_vm10 = vmmov %vm10963_vm2 }
 0x234   : > { %v5662_v2 = vsel %vm10967_vm15, %v9462_v28, 0  ;;  %v9503_v4 = vsel %vm10969_vm14, %v5769_v24, %v5771_v46  ;;  %v5773_v44 = vrot.slane %v6641_v11, 1  ;;  %v6643_v23 = vcombine.low %v5660_v12, %v5661_v33  ;;  %v6975_v21 = vpop.f32.mrf.mxu0  ;;  %vm10979_vm13 = vmmov %vm10968_vm7 }
 0x235   : > { %vm10971_vm6 = vcmp.ne.s16.totalorder %v10970_v59, 0  ;;  %v5341_v52 = vor.u32 %v5339_v40, %v9352_v60  ;;  %v5775_v58 = vrot.slane %v6642_v55, 1  ;;  %vm10973_vm4 = vcmp.ne.s16.totalorder %v10972_v41, 0  ;;  %vm10981_vm8 = vmmov %vm10963_vm2  ;;  %v4767_v41 = vld [vmem:[#allocation2 + $0x60] sm:$0xf] }
 0x236   : > { %v5663_v17 = vsel %vm10971_vm6, %v5168_v16, 0  ;;  %v5664_v13 = vsel %vm10973_vm4, %v9480_v38, 0  ;;  %v5351_v7 = vshll.u32 %v9378_v18, 16  ;;  %v9515_v24 = vsel %vm10974_vm5, %v5771_v46, %v5773_v44  ;;  %vm10982_vm2 = vmmov %vm10968_vm7 }
 0x237   : > { %v6644_v32 = vcombine.low %v5662_v2, %v5663_v17  ;;  %v5777_v11 = vrot.slane %v6643_v23, 1  ;;  %v6645_v12 = vcombine.low %v5664_v13, %v5664_v13  ;;  %vm10976_vm12 = vnez %v10975_v62  ;;  %vm10983_vm9 = vmmov %vm10974_vm5 }
 0x238   : > { %v4795_v33 = vsel %vm10976_vm12, %v4763_v39, 0  ;;  %vm10977_vm0 = vsmask.f32 7424  ;;  %v9523_v40 = vsel %vm10978_vm10, %v5773_v44, %v5775_v58  ;;  %v5359_v2 = vshll.u32 %v9382_v56, 16  ;;  %vm10984_vm15 = vmmov %vm10974_vm5 }
 0x239   : > { %v5338_v51 = vsel %vm10977_vm0, %v9319_v49, %v9352_v60  ;;  %v5779_v55 = vrot.slane %v6644_v32, 1  ;;  %vm10980_vm3 = vmmov %vm10977_vm0  ;;  %v9530_v23 = vsel %vm10981_vm8, %v5775_v58, %v5777_v11  ;;  %v5781_v39 = vrot.slane %v6645_v12, 1  ;;  %v4768_v12 = vld [vmem:[#allocation2 + $0x64] sm:$0xf] }
 0x23a   : > { %7178 = vmatmul.mubr.msk.bf16.gmra.mxu0 %vm10979_vm13, %v5338_v51  ;;  %v5346_v46 = vsel %vm10980_vm3, %v5341_v52, %v9354_v42  ;;  %v6569_v49 = vcombine.low %v4793_v31, %v4794_v34  ;;  %v4796_v60 = vsel %vm7529_vm11, %v4764_v26, 0  ;;  %v5347_v44 = vshrl.u32 %v9283_v35, 16  ;;  %v2748_v52 = vpop.f32.mrf.mxu0  ;;  %vm10985_vm1 = vmmov %vm10982_vm2  ;;  %v4766_v34 = vld [vmem:[#allocation2 + $0x5c] sm:$0xf] }
 0x23b   : > { %7181 = vmatprep.mubr.msk.bf16.mxu0 %vm10982_vm2, %v5346_v46  ;;  %v9545_v59 = vsel %vm10983_vm9, %v5777_v11, %v5779_v55  ;;  %v6570_v17 = vcombine.low %v4795_v33, %v4796_v60  ;;  %v5353_v58 = vrot.slane %v5351_v7, 1  ;;  %v6609_v43 = vcombine.low %v9448_v10, %v5166_v5  ;;  %vm10986_vm7 = vmmov %vm10985_vm1  ;;  %v2440_v5 = vpop.f32.mrf.mxu1  ;;  %v4765_v7 = vld [vmem:[#allocation2 + $0x58] sm:$0xf] }
 0x23c   : > { %v9549_v63 = vsel %vm10984_vm15, %v5779_v55, %v5781_v39  ;;  %7140 = vmatmul.mubr.msk.bf16.gmra.mxu1 %vm10985_vm1, %v6569_v49  ;;  %v5349_v31 = vor.u32 %v5347_v44, %v9354_v42  ;;  %v9554_v35 = vadd.f32 %v9399_v61, %v6937_v3  ;;  %v6976_v32 = vpop.f32.mrf.mxu0  ;;  %v5355_v13 = vshrl.u32 %v9378_v18, 16  ;;  %v10987_v55 = vld [vmem:[#allocation26_spill] sm:$0xff]  ;;  %vm10989_vm6 = vmmov %vm10977_vm0 }
 0x23d   : > { %7143 = vmatprep.mubr.msk.bf16.mxu1 %vm10986_vm7, %v6570_v17  ;;  %v5361_v26 = vrot.slane %v5359_v2, 1  ;;  %v9559_v10 = vcombine.low %v9462_v28, %v5168_v16  ;;  %v9562_v11 = vadd.f32 %v9425_v30, %v2440_v5  ;;  %v4798_v61 = vsel %vm7529_vm11, %v4766_v34, 0  ;;  %v6938_v51 = vpop.f32.mrf.mxu1  ;;  %v10990_v16 = vld [vmem:[#allocation25_spill] sm:$0xff]  ;;  %vm10992_vm5 = vmmov %vm10985_vm1  ;;  %v4770_v5 = vld [vmem:[#allocation2 + $0x6c] sm:$0xf] }
 0x23e   : > { %v2751_v42 = vpop.f32.mrf.mxu0  ;;  %v5357_v62 = vor.u32 %v5355_v13, %v5353_v58  ;;  %v5367_v33 = vshll.u32 %v6609_v43, 16  ;;  %vm10988_vm14 = vnez %v10987_v55  ;;  %v5354_v46 = vsel %vm10989_vm6, %v5349_v31, %v5353_v58  ;;  %vm10993_vm12 = vmmov %vm10977_vm0  ;;  %v4769_v55 = vld [vmem:[#allocation2 + $0x68] sm:$0xf] }
 0x23f   : > { %v4799_v18 = vsel %vm10988_vm14, %v4767_v41, 0  ;;  %v9570_v28 = vadd.f32 %v9460_v50, %v6938_v51  ;;  %vm10991_vm4 = vnez %v10990_v16  ;;  %v5375_v49 = vshll.u32 %v9559_v10, 16  ;;  %v2443_v60 = vpop.f32.mrf.mxu1  ;;  %vm10994_vm0 = vmmov %vm10985_vm1 }
 0x240   : > { %v4797_v30 = vsel %vm10991_vm4, %v4765_v7, 0  ;;  %v6979_v2 = vpop.f32.mrf.mxu0  ;;  %v5362_v39 = vsel %vm10993_vm12, %v5357_v62, %v5361_v26  ;;  %v4800_v17 = vsel %vm7529_vm11, %v4768_v12, 0  ;;  %v5363_v58 = vshrl.u32 %v9382_v56, 16  ;;  %vm10995_vm10 = vmmov %vm10994_vm0  ;;  %v4771_v12 = vld [vmem:[#allocation2 + $0x70] sm:$0xf] }
 0x241   : > { %v6571_v44 = vcombine.low %v4797_v30, %v4798_v61  ;;  %v9582_v50 = vadd.f32 %v9500_v22, %v2443_v60  ;;  %v6572_v3 = vcombine.low %v4799_v18, %v4800_v17  ;;  %v5369_v34 = vrot.slane %v5367_v33, 1  ;;  %v6941_v41 = vpop.f32.mrf.mxu1  ;;  %vm10996_vm13 = vmmov %vm10994_vm0 }
 0x242   : > { %7182 = vmatmul.mubr.msk.bf16.gmra.mxu0 %vm10992_vm5, %v5354_v46  ;;  %v2764_v31 = vpop.f32.mrf.mxu0  ;;  %v5365_v13 = vor.u32 %v5363_v58, %v5361_v26  ;;  %v6611_v7 = vcombine.low %v9480_v38, %v9480_v38  ;;  %v9587_v61 = vadd.f32 %v6975_v21, %v6941_v41  ;;  %v5371_v62 = vshrl.u32 %v6609_v43, 16  ;;  %v4772_v46 = vld [vmem:[#allocation2 + $0x74] sm:$0xf]  ;;  %v10997_v38 = vld [vmem:[#allocation28_spill] sm:$0xff]  ;;  %vm10999_vm8 = vmmov %vm10989_vm6 }
 0x243   : > { %7185 = vmatprep.mubr.msk.bf16.mxu0 %vm10994_vm0, %v5362_v39  ;;  %v5377_v22 = vrot.slane %v5375_v49, 1  ;;  %v2456_v51 = vpop.f32.mrf.mxu1  ;;  %v4802_v26 = vsel %vm7529_vm11, %v4770_v5, 0  ;;  %vm10998_vm3 = vnez %v10997_v38  ;;  %v11000_v43 = vld [vmem:[#allocation27_spill] sm:$0xff]  ;;  %vm11002_vm9 = vmmov %vm10994_vm0  ;;  %v4804_v41 = vsel %vm7529_vm11, %v4772_v46, 0  ;;  %v4775_v46 = vld [vmem:[#allocation2 + $0x80] sm:$0xf] }
 0x244   : > { %7144 = vmatmul.mubr.msk.bf16.gmra.mxu1 %vm10995_vm10, %v6571_v44  ;;  %v6980_v56 = vpop.f32.mrf.mxu0  ;;  %v9590_v18 = vadd.f32 %v2748_v52, %v2456_v51  ;;  %v5373_v16 = vor.u32 %v5371_v62, %v5369_v34  ;;  %v4803_v21 = vsel %vm10998_vm3, %v4771_v12, 0  ;;  %v5370_v39 = vsel %vm10999_vm8, %v5365_v13, %v5369_v34  ;;  %vm11003_vm15 = vmmov %vm10989_vm6  ;;  %v4774_v62 = vld [vmem:[#allocation2 + $0x7c] sm:$0xf] }
 0x245   : > { %7147 = vmatprep.mubr.msk.bf16.mxu1 %vm10996_vm13, %v6572_v3  ;;  %v6942_v30 = vpop.f32.mrf.mxu1  ;;  %v5383_v60 = vshll.u32 %v6611_v7, 16  ;;  %vm11001_vm2 = vnez %v11000_v43  ;;  %v5379_v5 = vshrl.u32 %v9559_v10, 16  ;;  %vm11004_vm1 = vmmov %vm10994_vm0  ;;  %v4773_v10 = vld [vmem:[#allocation2 + $0x78] sm:$0xf]  ;;  %v4806_v38 = vsel %vm7529_vm11, %v4774_v62, 0 }
 0x246   : > { %v2767_v33 = vpop.f32.mrf.mxu0  ;;  %v9597_v44 = vadd.f32 %v6976_v32, %v6942_v30  ;;  %v4801_v49 = vsel %vm11001_vm2, %v4769_v55, 0  ;;  %v5378_v17 = vsel %vm11003_vm15, %v5373_v16, %v5377_v22  ;;  %v6574_v32 = vcombine.low %v4803_v21, %v4804_v41  ;;  %vm11005_vm7 = vmmov %vm10994_vm0  ;;  %v4776_v21 = vld [vmem:[#allocation2 + $0x84] sm:$0xf]  ;;  %v11007_v43 = vld [vmem:[#allocation7_spill] sm:$0xff] }
 0x247   : > { %v2459_v58 = vpop.f32.mrf.mxu1  ;;  %v6573_v3 = vcombine.low %v4801_v49, %v4802_v26  ;;  %v5381_v12 = vor.u32 %v5379_v5, %v5377_v22  ;;  %v5385_v51 = vrot.slane %v5383_v60, 1  ;;  %vm11006_vm14 = vmmov %vm10994_vm0  ;;  %vm11008_vm6 = vnez %v11007_v43  ;;  %v11010_v49 = vld [vmem:[#allocation32_spill] sm:$0xff]  ;;  %v11016_v43 = vld [vmem:[#allocation31_spill] sm:$0xff] }
 0x248   : > { %v6983_v52 = vpop.f32.mrf.mxu0  ;;  %v9607_v34 = vadd.f32 %v2751_v42, %v2459_v58  ;;  %v4807_v22 = vsel %vm11008_vm6, %v4775_v46, 0  ;;  %vm11009_vm4 = vmmov %vm10999_vm8  ;;  %vm11011_vm5 = vnez %v11010_v49  ;;  %v4808_v41 = vsel %vm7529_vm11, %v4776_v21, 0 }
 0x249   : > { %v6945_v7 = vpop.f32.mrf.mxu1  ;;  %vm11012_vm12 = vmmov %vm10994_vm0 }
 0x24a   : > { %7186 = vmatmul.mubr.msk.bf16.gmra.mxu0 %vm11002_vm9, %v5370_v39  ;;  %v2780_v13 = vpop.f32.mrf.mxu0  ;;  %v9610_v55 = vadd.f32 %v6979_v2, %v6945_v7  ;;  %v5386_v2 = vsel %vm11009_vm4, %v5381_v12, %v5385_v51  ;;  %v4778_v12 = vld [vmem:[#allocation2 + $0x8c] sm:$0xf]  ;;  %vm11013_vm10 = vmmov %vm10994_vm0  ;;  %vm11025_vm9 = vcmask 1046528  }
 0x24b   : > { %7189 = vmatprep.mubr.msk.bf16.mxu0 %vm11004_vm1, %v5378_v17  ;;  %v2472_v16 = vpop.f32.mrf.mxu1  ;;  %v4805_v17 = vsel %vm11011_vm5, %v4773_v10, 0  ;;  %v4810_v21 = vsel %vm7529_vm11, %v4778_v12, 0  ;;  %vm11022_vm11 = vmmov %vm10994_vm0 }
 0x24c   : > { %7148 = vmatmul.mubr.msk.bf16.gmra.mxu1 %vm11005_vm7, %v6573_v3  ;;  %v6984_v26 = vpop.f32.mrf.mxu0  ;;  %v9613_v30 = vadd.f32 %v2764_v31, %v2472_v16  ;;  %v6575_v3 = vcombine.low %v4805_v17, %v4806_v38  ;;  %vm11023_vm2 = vmmov %vm10994_vm0 }
 0x24d   : > { %7151 = vmatprep.mubr.msk.bf16.mxu1 %vm11006_vm14, %v6574_v32  ;;  %v6946_v39 = vpop.f32.mrf.mxu1  ;;  %v6576_v32 = vcombine.low %v4807_v22, %v4808_v41  ;;  %v11017_v22 = vld [vmem:[#allocation13_spill] sm:$0xff]  ;;  %vm11026_vm15 = vmmov %vm10994_vm0 }
 0x24e   : > { %v2783_v42 = vpop.f32.mrf.mxu0  ;;  %v9620_v60 = vadd.f32 %v6980_v56, %v6946_v39  ;;  %v4777_v56 = vld [vmem:[#allocation2 + $0x88] sm:$0xf]  ;;  %v11014_v39 = vld [vmem:[#allocation35_spill] sm:$0xff]  ;;  %vm11018_vm3 = vnez %v11017_v22  ;;  %vm11027_vm1 = vmmov %vm11025_vm9 }
 0x24f   : > { %v2475_v31 = vpop.f32.mrf.mxu1  ;;  %vm11015_vm13 = vnez %v11014_v39  ;;  %vm11029_vm7 = vmmov %vm10994_vm0 }
 0x250   : > { %v6987_v58 = vpop.f32.mrf.mxu0  ;;  %v9627_v5 = vadd.f32 %v2767_v33, %v2475_v31  ;;  %v4809_v33 = vsel %vm11015_vm13, %v4777_v56, 0  ;;  %v11019_v31 = vld [vmem:[#allocation9_spill] sm:$0xff]  ;;  %vm11033_vm14 = vmmov %vm10994_vm0 }
 0x251   : > { %v6949_v62 = vpop.f32.mrf.mxu1  ;;  %vm11035_vm6 = vmmov %vm10994_vm0 }
 0x252   : > { %7190 = vmatmul.mubr.msk.bf16.gmra.mxu0 %vm11012_vm12, %v5386_v2  ;;  %v2796_v7 = vpop.f32.mrf.mxu0  ;;  %v9630_v51 = vadd.f32 %v6983_v52, %v6949_v62  ;;  %v5636_v2 = vsel %vm11018_vm3, %v11016_v43, 0  ;;  %vm11036_vm4 = vmmov %vm10994_vm0 }
 0x253   : > { %v2488_v16 = vpop.f32.mrf.mxu1  ;;  %vm11037_vm5 = vmmov %vm10994_vm0 }
 0x254   : > { %7152 = vmatmul.mubr.msk.bf16.gmra.mxu1 %vm10994_vm0, %v6575_v3  ;;  %v6988_v46 = vpop.f32.mrf.mxu0  ;;  %v9633_v10 = vadd.f32 %v2780_v13, %v2488_v16  ;;  %v11020_v3 = vld [vmem:[#allocation6_spill] sm:$0xff]  ;;  %vm11038_vm12 = vmmov %vm10994_vm0 }
 0x255   : > { %7155 = vmatprep.mubr.msk.bf16.mxu1 %vm11013_vm10, %v6576_v32  ;;  %v6950_v49 = vpop.f32.mrf.mxu1  ;;  %vm11021_vm8 = vcmp.ne.s16.totalorder %v11020_v3, 0  ;;  %v6577_v32 = vcombine.low %v4809_v33, %v4810_v21  ;;  %vm11039_vm10 = vmmov %vm10994_vm0 }
 0x256   : > { %v2799_v38 = vpop.f32.mrf.mxu0  ;;  %v9642_v52 = vadd.f32 %v6984_v26, %v6950_v49  ;;  %v5637_v13 = vsel %vm11021_vm8, %v11019_v31, 0  ;;  %vm11040_vm13 = vmmov %vm10994_vm0 }
 0x257   : > { %v2491_v41 = vpop.f32.mrf.mxu1  ;;  %v6631_v16 = vcombine.low %v5636_v2, %v5637_v13  ;;  %vm11041_vm3 = vmmov %vm10994_vm0 }
 0x258   : > { %v7027_v17 = vpop.f32.mrf.mxu0  ;;  %v9647_v62 = vadd.f32 %v2783_v42, %v2491_v41  ;;  %vm11042_vm8 = vmmov %vm10994_vm0 }
 0x259   : > { %v6953_v8 = vpop.f32.mrf.mxu1  ;;  %v5753_v49 = vrot.slane %v6631_v16, 1 }
 0x25a   : > { %v3698_v56 = vpop.f32.mrf.mxu0  ;;  %v9650_v12 = vadd.f32 %v6987_v58, %v6953_v8 }
 0x25b   : > { %v2504_v39 = vpop.f32.mrf.mxu1  ;;  %v5754_v58 = vsel %vm11025_vm9, %v5751_v45, %v5753_v49  ;;  %vm11045_vm9 = vmmov %vm10994_vm0 }
 0x25c   : > { %7156 = vmatmul.mubr.msk.bf16.gmra.mxu1 %vm11022_vm11, %v6577_v32  ;;  %v7028_v26 = vpop.f32.mrf.mxu0  ;;  %v9654_v43 = vadd.f32 %v2796_v7, %v2504_v39  ;;  %v11028_v7 = vld [vmem:[#allocation36_spill] sm:$0xff]  ;;  %vm11043_vm11 = vmmov %vm10994_vm0 }
 0x25d   : > { %7195 = vmatprep.mubr.msk.bf16.mxu1 %vm11023_vm2, %v9387_v6  ;;  %v6954_v31 = vpop.f32.mrf.mxu1  ;;  %v5756_v6 = vsel %vm11027_vm1, %v5753_v49, %v5755_v1  ;;  %v11031_v39 = vld [vmem:[#allocation12_spill] sm:$0xff]  ;;  %vm11044_vm2 = vmmov %vm10994_vm0 }
 0x25e   : > { %v3701_v22 = vpop.f32.mrf.mxu0  ;;  %v9656_v33 = vadd.f32 %v6988_v46, %v6954_v31 }
 0x25f   : > { %v2507_v21 = vpop.f32.mrf.mxu1 }
 0x260   : > { %v7031_v42 = vpop.f32.mrf.mxu0  ;;  %v9658_v2 = vadd.f32 %v2799_v38, %v2507_v21  ;;  %v11030_v38 = vld [vmem:[#allocation11_spill] sm:$0xff] }
 0x261   : > { %v6993_v13 = vpop.f32.mrf.mxu1 }
 0x262   : > { %11024 = vst [vmem:[#allocation23_spill] sm:$0xff] %v9658_v2  ;;  %v3714_v3 = vpop.f32.mrf.mxu0  ;;  %v3437_v41 = vadd.f32 %v6993_v13, %v11028_v7  ;;  %v11032_v2 = vld [vmem:[#allocation44_spill] sm:$0xff]  ;;  %v11034_v7 = vld [vmem:[#allocation18_spill] sm:$0xff] }
 0x263   : > { %v3308_v32 = vpop.f32.mrf.mxu1 }
 0x264   : > { %7196 = vmatmul.mubr.msk.bf16.vlgmr.msra.gmra.mxu1 %vm11026_vm15, %v5754_v58  ;;  %v7032_v46 = vpop.f32.mrf.mxu0  ;;  %v3435_v16 = vadd.f32 %v3308_v32, %v11030_v38  ;;  %v9670_v9 = vadd.f32 %v7027_v17, %v3437_v41  ;;  %vm11102_vm15 = vcmask 31744  }
 0x265   : > { %7199 = vmatprep.mubr.msk.bf16.mxu1 %vm11029_vm7, %v5756_v6  ;;  %v6994_v45 = vpop.f32.mrf.mxu1  ;;  %vm11103_vm1 = vmmov %vm11102_vm15 }
 0x266   : > { %v3717_v8 = vpop.f32.mrf.mxu0  ;;  %v3438_v31 = vadd.f32 %v6994_v45, %v11031_v39  ;;  %v9673_v58 = vadd.f32 %v3698_v56, %v3435_v16  ;;  %vm11104_vm7 = vmmov %vm11103_vm1 }
 0x267   : > { %v3311_v54 = vpop.f32.mrf.mxu1 }
 0x268   : > { %v7035_v21 = vpop.f32.mrf.mxu0  ;;  %v3436_v1 = vadd.f32 %v3311_v54, %v11032_v2  ;;  %v9676_v13 = vadd.f32 %v7028_v26, %v3438_v31 }
 0x269   : > { %v6997_v6 = vpop.f32.mrf.mxu1 }
 0x26a   : > { %v3730_v49 = vpop.f32.mrf.mxu0  ;;  %v3441_v32 = vadd.f32 %v6997_v6, %v11034_v7  ;;  %v9683_v41 = vadd.f32 %v3701_v22, %v3436_v1 }
 0x26b   : > { %v3324_v56 = vpop.f32.mrf.mxu1 }
 0x26c   : > { %7200 = vmatmul.mubr.msk.bf16.gmra.mxu1 %vm11033_vm14, %v9415_v37  ;;  %v7036_v17 = vpop.f32.mrf.mxu0  ;;  %v3439_v38 = vadd.f32 %v3324_v56, %v9286_v0  ;;  %v9686_v2 = vadd.f32 %v7031_v42, %v3441_v32  ;;  %vm11105_vm14 = vmmov %vm11103_vm1 }
 0x26d   : > { %7203 = vmatprep.mubr.msk.bf16.mxu1 %vm11035_vm6, %v9418_v48  ;;  %v6998_v26 = vpop.f32.mrf.mxu1  ;;  %vm11108_vm6 = vmmov %vm11103_vm1 }
 0x26e   : > { %v3733_v16 = vpop.f32.mrf.mxu0  ;;  %v3442_v45 = vadd.f32 %v6998_v26, %v9303_v57  ;;  %v9689_v31 = vadd.f32 %v3714_v3, %v3439_v38 }
 0x26f   : > { %v3327_v37 = vpop.f32.mrf.mxu1 }
 0x270   : > { %v7039_v39 = vpop.f32.mrf.mxu0  ;;  %v3440_v54 = vadd.f32 %v3327_v37, %v9315_v25  ;;  %v9692_v48 = vadd.f32 %v7032_v46, %v3442_v45 }
 0x271   : > { %v7001_v22 = vpop.f32.mrf.mxu1 }
 0x272   : > { %v3746_v6 = vpop.f32.mrf.mxu0  ;;  %v3445_v0 = vadd.f32 %v7001_v22, %v9397_v47  ;;  %v9699_v57 = vadd.f32 %v3717_v8, %v3440_v54 }
 0x273   : > { %v3340_v3 = vpop.f32.mrf.mxu1 }
 0x274   : > { %7204 = vmatmul.mubr.msk.bf16.gmra.mxu1 %vm11036_vm4, %v9434_v29  ;;  %v7040_v42 = vpop.f32.mrf.mxu0  ;;  %v3443_v1 = vadd.f32 %v3340_v3, %v9423_v27  ;;  %v9702_v25 = vadd.f32 %v7035_v21, %v3445_v0  ;;  %vm11109_vm4 = vmmov %vm11103_vm1 }
 0x275   : > { %7207 = vmatprep.mubr.msk.bf16.mxu1 %vm11037_vm5, %v9451_v19  ;;  %v7002_v46 = vpop.f32.mrf.mxu1  ;;  %vm11115_vm5 = vmmov %vm11103_vm1 }
 0x276   : > { %v3749_v7 = vpop.f32.mrf.mxu0  ;;  %v3446_v32 = vadd.f32 %v7002_v46, %v9440_v14  ;;  %v9705_v38 = vadd.f32 %v3730_v49, %v3443_v1 }
 0x277   : > { %v3343_v29 = vpop.f32.mrf.mxu1 }
 0x278   : > { %v7043_v56 = vpop.f32.mrf.mxu0  ;;  %v3444_v47 = vadd.f32 %v3343_v29, %v9458_v36  ;;  %v9708_v19 = vadd.f32 %v7036_v17, %v3446_v32 }
 0x279   : > { %v7005_v8 = vpop.f32.mrf.mxu1 }
 0x27a   : > { %v3762_v26 = vpop.f32.mrf.mxu0  ;;  %v3449_v27 = vadd.f32 %v7005_v8, %v9554_v35  ;;  %v9715_v14 = vadd.f32 %v3733_v16, %v3444_v47 }
 0x27b   : > { %v3356_v49 = vpop.f32.mrf.mxu1 }
 0x27c   : > { %7208 = vmatmul.mubr.msk.bf16.gmra.mxu1 %vm11038_vm12, %v9465_v15  ;;  %v7044_v21 = vpop.f32.mrf.mxu0  ;;  %v3447_v45 = vadd.f32 %v3356_v49, %v9562_v11  ;;  %v9718_v36 = vadd.f32 %v7039_v39, %v3449_v27  ;;  %vm11119_vm12 = vmmov %vm11103_vm1 }
 0x27d   : > { %7211 = vmatprep.mubr.msk.bf16.mxu1 %vm10994_vm0, %v9473_v20  ;;  %v7006_v17 = vpop.f32.mrf.mxu1  ;;  %vm11125_vm0 = vmmov %vm11103_vm1 }
 0x27e   : > { %v3765_v37 = vpop.f32.mrf.mxu0  ;;  %v3450_v54 = vadd.f32 %v7006_v17, %v9570_v28  ;;  %v9721_v0 = vadd.f32 %v3746_v6, %v3447_v45 }
 0x27f   : > { %v3359_v15 = vpop.f32.mrf.mxu1 }
 0x280   : > { %v7047_v22 = vpop.f32.mrf.mxu0  ;;  %v3448_v35 = vadd.f32 %v3359_v15, %v9582_v50  ;;  %v9724_v20 = vadd.f32 %v7040_v42, %v3450_v54 }
 0x281   : > { %v7009_v16 = vpop.f32.mrf.mxu1 }
 0x282   : > { %v3778_v3 = vpop.f32.mrf.mxu0  ;;  %v3453_v11 = vadd.f32 %v7009_v16, %v9587_v61  ;;  %v9731_v28 = vadd.f32 %v3749_v7, %v3448_v35 }
 0x283   : > { %v3372_v6 = vpop.f32.mrf.mxu1 }
 0x284   : > { %7212 = vmatmul.mubr.msk.bf16.gmra.mxu1 %vm11039_vm10, %v9491_v53  ;;  %v7048_v39 = vpop.f32.mrf.mxu0  ;;  %v3451_v1 = vadd.f32 %v3372_v6, %v9590_v18  ;;  %v9734_v50 = vadd.f32 %v7043_v56, %v3453_v11  ;;  %vm11131_vm10 = vmmov %vm11125_vm0 }
 0x285   : > { %7215 = vmatprep.mubr.msk.bf16.mxu1 %vm11040_vm13, %v9503_v4  ;;  %v7010_v42 = vpop.f32.mrf.mxu1  ;;  %vm11132_vm13 = vmmov %vm11125_vm0 }
 0x286   : > { %v3781_v46 = vpop.f32.mrf.mxu0  ;;  %v3454_v32 = vadd.f32 %v7010_v42, %v9597_v44  ;;  %v9737_v47 = vadd.f32 %v3762_v26, %v3451_v1 }
 0x287   : > { %v3375_v53 = vpop.f32.mrf.mxu1 }
 0x288   : > { %v7051_v29 = vpop.f32.mrf.mxu0  ;;  %v3452_v61 = vadd.f32 %v3375_v53, %v9607_v34  ;;  %v9740_v4 = vadd.f32 %v7044_v21, %v3454_v32 }
 0x289   : > { %v7013_v7 = vpop.f32.mrf.mxu1 }
 0x28a   : > { %v3794_v8 = vpop.f32.mrf.mxu0  ;;  %v3457_v18 = vadd.f32 %v7013_v7, %v9610_v55  ;;  %v9747_v44 = vadd.f32 %v3765_v37, %v3452_v61 }
 0x28b   : > { %v3388_v26 = vpop.f32.mrf.mxu1 }
 0x28c   : > { %7216 = vmatmul.mubr.msk.bf16.gmra.mxu1 %vm11041_vm3, %v9515_v24  ;;  %v7052_v56 = vpop.f32.mrf.mxu0  ;;  %v3455_v27 = vadd.f32 %v3388_v26, %v9613_v30  ;;  %v9750_v34 = vadd.f32 %v7047_v22, %v3457_v18  ;;  %vm11137_vm3 = vmmov %vm11125_vm0 }
 0x28d   : > { %7219 = vmatprep.mubr.msk.bf16.mxu1 %vm11042_vm8, %v9523_v40  ;;  %v7014_v21 = vpop.f32.mrf.mxu1  ;;  %vm11140_vm8 = vmmov %vm11125_vm0 }
 0x28e   : > { %v3797_v49 = vpop.f32.mrf.mxu0  ;;  %v3458_v45 = vadd.f32 %v7014_v21, %v9620_v60  ;;  %v9753_v54 = vadd.f32 %v3778_v3, %v3455_v27 }
 0x28f   : > { %v3391_v24 = vpop.f32.mrf.mxu1 }
 0x290   : > { %v7055_v17 = vpop.f32.mrf.mxu0  ;;  %v3456_v55 = vadd.f32 %v3391_v24, %v9627_v5  ;;  %v9756_v40 = vadd.f32 %v7048_v39, %v3458_v45 }
 0x291   : > { %v7017_v37 = vpop.f32.mrf.mxu1 }
 0x292   : > { %v3810_v15 = vpop.f32.mrf.mxu0  ;;  %v3461_v30 = vadd.f32 %v7017_v37, %v9630_v51  ;;  %v9763_v60 = vadd.f32 %v3781_v46, %v3456_v55 }
 0x293   : > { %v3404_v35 = vpop.f32.mrf.mxu1 }
 0x294   : > { %7220 = vmatmul.mubr.msk.bf16.gmra.mxu1 %vm11043_vm11, %v9530_v23  ;;  %v7056_v22 = vpop.f32.mrf.mxu0  ;;  %v3459_v3 = vadd.f32 %v3404_v35, %v9633_v10  ;;  %v9766_v5 = vadd.f32 %v7051_v29, %v3461_v30  ;;  %vm11146_vm11 = vmmov %vm11125_vm0 }
 0x295   : > { %7223 = vmatprep.mubr.msk.bf16.mxu1 %vm11044_vm2, %v9545_v59  ;;  %v7018_v11 = vpop.f32.mrf.mxu1  ;;  %vm11151_vm2 = vmmov %vm11125_vm0 }
 0x296   : > { %v3813_v16 = vpop.f32.mrf.mxu0  ;;  %v3462_v39 = vadd.f32 %v7018_v11, %v9642_v52  ;;  %v9771_v23 = vadd.f32 %v3794_v8, %v3459_v3 }
 0x297   : > { %v3407_v51 = vpop.f32.mrf.mxu1 }
 0x298   : > { %v9769_v6 = vpop.f32.mrf.mxu0  ;;  %v3460_v1 = vadd.f32 %v3407_v51, %v9647_v62  ;;  %v9776_v46 = vadd.f32 %v7052_v56, %v3462_v39 }
 0x299   : > { %v7021_v42 = vpop.f32.mrf.mxu1 }
 0x29a   : > { %v9774_v59 = vpop.f32.mrf.mxu0  ;;  %v3465_v10 = vadd.f32 %v7021_v42, %v9650_v12  ;;  %v9783_v52 = vadd.f32 %v3797_v49, %v3460_v1  ;;  %v11046_v12 = vld [vmem:[#allocation23_spill] sm:$0xff] }
 0x29b   : > { %v3420_v29 = vpop.f32.mrf.mxu1 }
 0x29c   : > { %7224 = vmatmul.mubr.msk.bf16.gmra.mxu1 %vm11045_vm9, %v9549_v63  ;;  %v9781_v32 = vpop.f32.mrf.mxu0  ;;  %v3463_v53 = vadd.f32 %v3420_v29, %v9654_v43  ;;  %v9788_v62 = vadd.f32 %v7055_v17, %v3465_v10  ;;  %vm11152_vm9 = vmmov %vm11125_vm0 }
 0x29d   : > { %v7022_v8 = vpop.f32.mrf.mxu1 }
 0x29e   : > { %v9786_v61 = vpop.f32.mrf.mxu0  ;;  %v3466_v7 = vadd.f32 %v7022_v8, %v9656_v33  ;;  %v9793_v56 = vadd.f32 %v3810_v15, %v3463_v53 }
 0x29f   : > { %v3423_v63 = vpop.f32.mrf.mxu1 }
 0x2a0   : > { %v9791_v18 = vpop.f32.mrf.mxu0  ;;  %v3464_v26 = vadd.f32 %v3423_v63, %v11046_v12  ;;  %v9798_v49 = vadd.f32 %v7056_v22, %v3466_v7 }
 0x2a1   : > { %v7061_v21 = vpop.f32.mrf.mxu1 }
 0x2a2   : > { %v9796_v27 = vpop.f32.mrf.mxu0  ;;  %v9801_v43 = vadd.f32 %v7061_v21, %v9670_v9  ;;  %v9805_v17 = vadd.f32 %v3813_v16, %v3464_v26 }
 0x2a3   : > { %v4192_v33 = vpop.f32.mrf.mxu1 }
 0x2a4   : > { %v9803_v45 = vpop.f32.mrf.mxu0  ;;  %v9808_v24 = vadd.f32 %v4192_v33, %v9673_v58 }
 0x2a5   : > { %v7062_v15 = vpop.f32.mrf.mxu1 }
 0x2a6   : > { %v9810_v55 = vpop.f32.mrf.mxu0  ;;  %v9813_v37 = vadd.f32 %v7062_v15, %v9676_v13 }
 0x2a7   : > { %v4195_v22 = vpop.f32.mrf.mxu1 }
 0x2a8   : > { %v9815_v30 = vpop.f32.mrf.mxu0  ;;  %v9818_v9 = vadd.f32 %v4195_v22, %v9683_v41 }
 0x2a9   : > { %v7065_v3 = vpop.f32.mrf.mxu1 }
 0x2aa   : > { %v9820_v35 = vpop.f32.mrf.mxu0  ;;  %v9823_v16 = vadd.f32 %v7065_v3, %v9686_v2 }
 0x2ab   : > { %v4208_v11 = vpop.f32.mrf.mxu1 }
 0x2ac   : > { %v9825_v58 = vpop.f32.mrf.mxu0  ;;  %v9828_v39 = vadd.f32 %v4208_v11, %v9689_v31 }
 0x2ad   : > { %v7066_v51 = vpop.f32.mrf.mxu1 }
 0x2ae   : > { %v9830_v13 = vpop.f32.mrf.mxu0  ;;  %v9833_v1 = vadd.f32 %v7066_v51, %v9692_v48 }
 0x2af   : > { %v4211_v42 = vpop.f32.mrf.mxu1 }
 0x2b0   : > { %v9835_v41 = vpop.f32.mrf.mxu0  ;;  %v9838_v10 = vadd.f32 %v4211_v42, %v9699_v57 }
 0x2b1   : > { %v7069_v29 = vpop.f32.mrf.mxu1 }
 0x2b2   : > { %v9840_v2 = vpop.f32.mrf.mxu0  ;;  %v9843_v53 = vadd.f32 %v7069_v29, %v9702_v25 }
 0x2b3   : > { %v4224_v8 = vpop.f32.mrf.mxu1 }
 0x2b4   : > { %v9845_v31 = vpop.f32.mrf.mxu0  ;;  %v9848_v7 = vadd.f32 %v4224_v8, %v9705_v38 }
 0x2b5   : > { %11047 = vst [vmem:[#allocation14_spill] sm:$0xff] %v9845_v31  ;;  %v7070_v63 = vpop.f32.mrf.mxu1 }
 0x2b6   : > { %v9850_v48 = vpop.f32.mrf.mxu0  ;;  %v9853_v12 = vadd.f32 %v7070_v63, %v9708_v19 }
 0x2b7   : > { %11048 = vst [vmem:[#allocation3_spill] sm:$0xff] %v9850_v48  ;;  %v4227_v26 = vpop.f32.mrf.mxu1 }
 0x2b8   : > { %v9855_v57 = vpop.f32.mrf.mxu0  ;;  %v9858_v21 = vadd.f32 %v4227_v26, %v9715_v14 }
 0x2b9   : > { %11049 = vst [vmem:[#allocation10_spill] sm:$0xff] %v9855_v57  ;;  %v7073_v33 = vpop.f32.mrf.mxu1 }
 0x2ba   : > { %v9860_v25 = vpop.f32.mrf.mxu0  ;;  %v9863_v15 = vadd.f32 %v7073_v33, %v9718_v36 }
 0x2bb   : > { %11050 = vst [vmem:[#allocation15_spill] sm:$0xff] %v9860_v25  ;;  %v4240_v22 = vpop.f32.mrf.mxu1 }
 0x2bc   : > { %v9865_v38 = vpop.f32.mrf.mxu0  ;;  %v9868_v3 = vadd.f32 %v4240_v22, %v9721_v0 }
 0x2bd   : > { %11051 = vst [vmem:[#allocation4_spill] sm:$0xff] %v9865_v38  ;;  %v7074_v11 = vpop.f32.mrf.mxu1 }
 0x2be   : > { %v9870_v19 = vpop.f32.mrf.mxu0  ;;  %v9873_v51 = vadd.f32 %v7074_v11, %v9724_v20 }
 0x2bf   : > { %11052 = vst [vmem:[#allocation45_spill] sm:$0xff] %v9870_v19  ;;  %v4243_v42 = vpop.f32.mrf.mxu1 }
 0x2c0   : > { %11053 = vst [vmem:[#allocation5_spill] sm:$0xff] %v9873_v51  ;;  %v9875_v14 = vpop.f32.mrf.mxu0  ;;  %v9878_v29 = vadd.f32 %v4243_v42, %v9731_v28 }
 0x2c1   : > { %11054 = vst [vmem:[#allocation16_spill] sm:$0xff] %v9875_v14  ;;  %v7077_v8 = vpop.f32.mrf.mxu1 }
 0x2c2   : > { %11055 = vst [vmem:[#allocation47_spill] sm:$0xff] %v9878_v29  ;;  %v9880_v36 = vpop.f32.mrf.mxu0  ;;  %v9883_v63 = vadd.f32 %v7077_v8, %v9734_v50 }
 0x2c3   : > { %11056 = vst [vmem:[#allocation46_spill] sm:$0xff] %v9880_v36  ;;  %v4256_v26 = vpop.f32.mrf.mxu1 }
 0x2c4   : > { %11057 = vst [vmem:[#allocation19_spill] sm:$0xff] %v9883_v63  ;;  %v9885_v0 = vpop.f32.mrf.mxu0  ;;  %v9888_v33 = vadd.f32 %v4256_v26, %v9737_v47 }
 0x2c5   : > { %11058 = vst [vmem:[#allocation43_spill] sm:$0xff] %v9885_v0  ;;  %v7078_v22 = vpop.f32.mrf.mxu1 }
 0x2c6   : > { %11059 = vst [vmem:[#allocation17_spill] sm:$0xff] %v9888_v33  ;;  %v9890_v20 = vpop.f32.mrf.mxu0  ;;  %v9893_v11 = vadd.f32 %v7078_v22, %v9740_v4 }
 0x2c7   : > { %11060 = vst [vmem:[#allocation22_spill] sm:$0xff] %v9890_v20  ;;  %v4259_v42 = vpop.f32.mrf.mxu1 }
 0x2c8   : > { %11061 = vst [vmem:[#allocation20_spill] sm:$0xff] %v9893_v11  ;;  %v9895_v28 = vpop.f32.mrf.mxu0  ;;  %v9898_v36 = vadd.f32 %v4259_v42, %v9747_v44 }
 0x2c9   : > { %11062 = vst [vmem:[#allocation38_spill] sm:$0xff] %v9895_v28  ;;  %v7081_v8 = vpop.f32.mrf.mxu1 }
 0x2ca   : > { %11063 = vst [vmem:[#allocation48_spill] sm:$0xff] %v9898_v36  ;;  %v9900_v50 = vpop.f32.mrf.mxu0  ;;  %v9903_v0 = vadd.f32 %v7081_v8, %v9750_v34 }
 0x2cb   : > { %11064 = vst [vmem:[#allocation37_spill] sm:$0xff] %v9900_v50  ;;  %v4272_v26 = vpop.f32.mrf.mxu1 }
 0x2cc   : > { %11065 = vst [vmem:[#allocation39_spill] sm:$0xff] %v9903_v0  ;;  %v9905_v47 = vpop.f32.mrf.mxu0  ;;  %v9908_v20 = vadd.f32 %v4272_v26, %v9753_v54 }
 0x2cd   : > { %11066 = vst [vmem:[#allocation40_spill] sm:$0xff] %v9905_v47  ;;  %v7082_v22 = vpop.f32.mrf.mxu1 }
 0x2ce   : > { %11067 = vst [vmem:[#allocation42_spill] sm:$0xff] %v9908_v20  ;;  %v9910_v4 = vpop.f32.mrf.mxu0  ;;  %v9913_v28 = vadd.f32 %v7082_v22, %v9756_v40 }
 0x2cf   : > { %11068 = vst [vmem:[#allocation41_spill] sm:$0xff] %v9910_v4  ;;  %v4275_v44 = vpop.f32.mrf.mxu1 }
 0x2d0   : > { %11069 = vst [vmem:[#allocation29_spill] sm:$0xff] %v9913_v28  ;;  %v9916_v42 = vadd.f32 %v4275_v44, %v9763_v60  ;;  %v9918_v50 = vpop.f32.mrf.mxu0 }
 0x2d1   : > { %11071 = vst [vmem:[#allocation30_spill] sm:$0xff] %v9918_v50  ;;  %v7085_v34 = vpop.f32.mrf.mxu1 }
 0x2d2   : > { %11070 = vst [vmem:[#allocation21_spill] sm:$0xff] %v9916_v42  ;;  %v9921_v8 = vadd.f32 %v7085_v34, %v9766_v5  ;;  %v9926_v26 = vpop.f32.mrf.mxu0 }
 0x2d3   : > { %v4288_v47 = vpop.f32.mrf.mxu1  ;;  %11074 = vst [vmem:[#allocation8_spill] sm:$0xff] %v9926_v26 }
 0x2d4   : > { %11072 = vst [vmem:[#allocation34_spill] sm:$0xff] %v9921_v8  ;;  %v9924_v54 = vadd.f32 %v4288_v47, %v9771_v23  ;;  %v9934_v44 = vpop.f32.mrf.mxu0 }
 0x2d5   : > { %v7086_v4 = vpop.f32.mrf.mxu1  ;;  %11077 = vst [vmem:[#allocation25_spill] sm:$0xff] %v9934_v44 }
 0x2d6   : > { %11073 = vst [vmem:[#allocation33_spill] sm:$0xff] %v9924_v54  ;;  %v9929_v40 = vadd.f32 %v7086_v4, %v9776_v46  ;;  %v9939_v8 = vpop.f32.mrf.mxu0 }
 0x2d7   : > { %v4291_v22 = vpop.f32.mrf.mxu1  ;;  %11079 = vst [vmem:[#allocation27_spill] sm:$0xff] %v9939_v8 }
 0x2d8   : > { %11075 = vst [vmem:[#allocation24_spill] sm:$0xff] %v9929_v40  ;;  %v9932_v60 = vadd.f32 %v4291_v22, %v9783_v52  ;;  %v7163_v26 = vpop.f32.mrf.mxu0 }
 0x2d9   : > { %v7089_v50 = vpop.f32.mrf.mxu1 }
 0x2da   : > { %11076 = vst [vmem:[#allocation26_spill] sm:$0xff] %v9932_v60  ;;  %v9937_v5 = vadd.f32 %v7089_v50, %v9788_v62  ;;  %v5472_v60 = vpop.f32.mrf.mxu0 }
 0x2db   : > { %v4304_v34 = vpop.f32.mrf.mxu1 }
 0x2dc   : > { %11078 = vst [vmem:[#allocation28_spill] sm:$0xff] %v9937_v5  ;;  %v9942_v23 = vadd.f32 %v4304_v34, %v9793_v56  ;;  %v7164_v5 = vpop.f32.mrf.mxu0 }
 0x2dd   : > { %v7090_v47 = vpop.f32.mrf.mxu1 }
 0x2de   : > { %11080 = vst [vmem:[#allocation7_spill] sm:$0xff] %v9942_v23  ;;  %v9945_v46 = vadd.f32 %v7090_v47, %v9798_v49  ;;  %v9950_v54 = vpop.f32.mrf.mxu0 }
 0x2df   : > { %v4307_v4 = vpop.f32.mrf.mxu1 }
 0x2e0   : > { %11081 = vst [vmem:[#allocation32_spill] sm:$0xff] %v9945_v46  ;;  %v9948_v52 = vadd.f32 %v4307_v4, %v9805_v17  ;;  %v9956_v49 = vpop.f32.mrf.mxu0 }
 0x2e1   : > { %v7129_v22 = vpop.f32.mrf.mxu1 }
 0x2e2   : > { %11082 = vst [vmem:[#allocation35_spill] sm:$0xff] %v9948_v52  ;;  %v9962_v4 = vpop.f32.mrf.mxu0 }
 0x2e3   : > { %v4978_v44 = vpop.f32.mrf.mxu1 }
 0x2e4   : > { %v9968_v23 = vpop.f32.mrf.mxu0 }
 0x2e5   : > { %v7130_v62 = vpop.f32.mrf.mxu1 }
 0x2e6   : > { %v9974_v20 = vpop.f32.mrf.mxu0 }
 0x2e7   : > { %v4981_v50 = vpop.f32.mrf.mxu1 }
 0x2e8   : > { %v9980_v19 = vpop.f32.mrf.mxu0 }
 0x2e9   : > { %v7133_v40 = vpop.f32.mrf.mxu1 }
 0x2ea   : > { %v9986_v11 = vpop.f32.mrf.mxu0 }
 0x2eb   : > { %v4994_v8 = vpop.f32.mrf.mxu1 }
 0x2ec   : > { %v9992_v57 = vpop.f32.mrf.mxu0 }
 0x2ed   : > { %v9952_v56 = vpop.f32.mrf.mxu1 }
 0x2ef   : > { %v9954_v34 = vpop.f32.mrf.mxu1 }
 0x2f1   : > { %v9958_v47 = vpop.f32.mrf.mxu1 }
 0x2f3   : > { %v9960_v17 = vpop.f32.mrf.mxu1 }
 0x2f5   : > { %v9964_v52 = vpop.f32.mrf.mxu1 }
 0x2f7   : > { %v9966_v46 = vpop.f32.mrf.mxu1 }
 0x2fc   : > { %v9970_v42 = vpop.f32.mrf.mxu1 }
 0x2fe   : > { %v9972_v28 = vpop.f32.mrf.mxu1 }
 0x300   : > { %v9976_v14 = vpop.f32.mrf.mxu1 }
 0x301   : > { %11083 = vst [vmem:[#allocation31_spill] sm:$0xff] %v9976_v14  ;;  %v9998_v14 = vpop.f32.mrf.mxu0 }
 0x302   : > { %v9978_v0 = vpop.f32.mrf.mxu1 }
 0x303   : > { %11084 = vst [vmem:[#allocation13_spill] sm:$0xff] %v9978_v0 }
 0x304   : > { %v9982_v36 = vpop.f32.mrf.mxu1 }
 0x305   : > { %11085 = vst [vmem:[#allocation9_spill] sm:$0xff] %v9982_v36  ;;  %v10004_v36 = vpop.f32.mrf.mxu0 }
 0x306   : > { %v9984_v38 = vpop.f32.mrf.mxu1  ;;  %11093 = vst [vmem:[#allocation49_spill] sm:$0xff] %v10004_v36 }
 0x307   : > { %11086 = vst [vmem:[#allocation6_spill] sm:$0xff] %v9984_v38 }
 0x308   : > { %v9988_v25 = vpop.f32.mrf.mxu1 }
 0x309   : > { %11087 = vst [vmem:[#allocation36_spill] sm:$0xff] %v9988_v25  ;;  %v10010_v25 = vpop.f32.mrf.mxu0 }
 0x30a   : > { %v9990_v33 = vpop.f32.mrf.mxu1  ;;  %11096 = vst [vmem:[#allocation52_spill] sm:$0xff] %v10010_v25 }
 0x30b   : > { %11088 = vst [vmem:[#allocation11_spill] sm:$0xff] %v9990_v33 }
 0x30c   : > { %v9994_v63 = vpop.f32.mrf.mxu1 }
 0x30d   : > { %11089 = vst [vmem:[#allocation12_spill] sm:$0xff] %v9994_v63  ;;  %v10016_v63 = vpop.f32.mrf.mxu0 }
 0x30e   : > { %v9996_v48 = vpop.f32.mrf.mxu1  ;;  %11099 = vst [vmem:[#allocation55_spill] sm:$0xff] %v10016_v63 }
 0x30f   : > { %11090 = vst [vmem:[#allocation44_spill] sm:$0xff] %v9996_v48 }
 0x310   : > { %v10000_v0 = vpop.f32.mrf.mxu1 }
 0x311   : > { %11091 = vst [vmem:[#allocation18_spill] sm:$0xff] %v10000_v0  ;;  %v4717_v0 = vadd.f32 %v9769_v6, %v9801_v43  ;;  %v4716_v6 = vadd.f32 %v9786_v61, %v9818_v9 }
 0x312   : > { %v10002_v29 = vpop.f32.mrf.mxu1 }
 0x313   : > { %11092 = vst [vmem:[#allocation23_spill] sm:$0xff] %v10002_v29  ;;  %v5107_v36 = vadd.f32 %v7129_v22, %v4717_v0 }
 0x314   : > { %v10006_v38 = vpop.f32.mrf.mxu1 }
 0x315   : > { %11094 = vst [vmem:[#allocation50_spill] sm:$0xff] %v10006_v38  ;;  %v4715_v38 = vadd.f32 %v9774_v59, %v9808_v24  ;;  %v5601_v0 = vadd.f32 %v7163_v26, %v5107_v36  ;;  %v10041_v59 = vld [vmem:[%s10318_s6] ss:$0 sm:$0xff]  ;;  %v5106_v24 = vadd.f32 %v4981_v50, %v4716_v6  ;;  %v4722_v50 = vadd.f32 %v9803_v45, %v9833_v1 }
 0x316   : > { %v10008_v31 = vpop.f32.mrf.mxu1  ;;  %v4720_v6 = vadd.f32 %v9810_v55, %v9838_v10 }
 0x317   : > { %11095 = vst [vmem:[#allocation51_spill] sm:$0xff] %v10008_v31  ;;  %v10026_v31 = vpop.f32.mrf.mxu0 }
 0x318   : > { %v10012_v33 = vpop.f32.mrf.mxu1 }
 0x319   : > { %11097 = vst [vmem:[#allocation53_spill] sm:$0xff] %v10012_v33  ;;  %v5105_v33 = vadd.f32 %v4978_v44, %v4715_v38  ;;  %v10036_v43 = vpop.f32.mrf.mxu0 }
 0x31a   : > { %v10014_v51 = vpop.f32.mrf.mxu1 }
 0x31b   : > { %11098 = vst [vmem:[#allocation54_spill] sm:$0xff] %v10014_v51  ;;  %v4718_v51 = vadd.f32 %v9781_v32, %v9813_v37  ;;  %v5599_v44 = vadd.f32 %v5472_v60, %v5105_v33  ;;  %v4721_v32 = vadd.f32 %v9791_v18, %v9823_v16  ;;  %v4719_v37 = vadd.f32 %v9796_v27, %v9828_v39  ;;  %v10047_v61 = vpop.f32.mrf.mxu0 }
 0x31c   : > { %v10018_v48 = vpop.f32.mrf.mxu1  ;;  %v5600_v27 = vadd.f32 %v9950_v54, %v5106_v24  ;;  %v5112_v39 = vadd.f32 %v9952_v56, %v4722_v50  ;;  %v5110_v54 = vadd.f32 %v9954_v34, %v4720_v6  ;;  %v4725_v56 = vadd.f32 %v9815_v30, %v9843_v53  ;;  %v7315_v50 = vld [vmem:[%s7440_s12 + $0x18] sm:$0xff] }
 0x31d   : > { %11100 = vst [vmem:[#allocation56_spill] sm:$0xff] %v10018_v48  ;;  %v5108_v48 = vadd.f32 %v7130_v62, %v4718_v51  ;;  %v5111_v62 = vadd.f32 %v7133_v40, %v4721_v32  ;;  %v10057_v40 = vpop.f32.mrf.mxu0  ;;  %v4723_v34 = vadd.f32 %v9820_v35, %v9848_v7  ;;  %v4724_v35 = vadd.f32 %v9830_v13, %v9858_v21 }
 0x31e   : > { %v10022_v29 = vpop.f32.mrf.mxu1  ;;  %v5606_v53 = vadd.f32 %v9968_v23, %v5112_v39 }
 0x31f   : > { %v5602_v26 = vadd.f32 %v7164_v5, %v5108_v48  ;;  %v5605_v55 = vadd.f32 %v9956_v49, %v5111_v62  ;;  %v10077_v49 = vpop.f32.mrf.mxu0  ;;  %v5604_v62 = vadd.f32 %v9974_v20, %v5110_v54  ;;  %v7316_v20 = vld [vmem:[%s7440_s12 + $0x8] sm:$0xff] }
 0x320   : > { %v10028_v25 = vpop.f32.mrf.mxu1 }
 0x321   : > { %v10095_v39 = vpop.f32.mrf.mxu0 }
 0x322   : > { %v10032_v63 = vpop.f32.mrf.mxu1 }
 0x323   : > { %11101 = vst [vmem:[#allocation57_spill] sm:$0xff] %v10032_v63  ;;  %v5109_v63 = vadd.f32 %v4994_v8, %v4719_v37  ;;  %v5115_v37 = vadd.f32 %v9958_v47, %v4725_v56  ;;  %v4726_v47 = vadd.f32 %v9825_v58, %v9853_v12  ;;  %v5113_v58 = vadd.f32 %v9960_v17, %v4723_v34 }
 0x324   : > { %v7197_v22 = vpop.f32.mrf.mxu1  ;;  %v5114_v17 = vadd.f32 %v9966_v46, %v4724_v35  ;;  %v7317_v46 = vld [vmem:[%s7440_s12 + $0x30] sm:$0xff] }
 0x325   : > { %v5997_v38 = vadd.f32 %v7197_v22, %v5601_v0  ;;  %v5603_v0 = vadd.f32 %v9962_v4, %v5109_v63  ;;  %v7313_v22 = vld [vmem:[%s7440_s12 + $0x10] sm:$0xff]  ;;  %v7314_v63 = vld [vmem:[%s7440_s12] sm:$0xff]  ;;  %v5116_v12 = vadd.f32 %v9964_v52, %v4726_v47  ;;  %v4729_v52 = vadd.f32 %v9835_v41, %v9863_v15 }
 0x326   : > { %v5868_v51 = vpop.f32.mrf.mxu1  ;;  %v5607_v41 = vadd.f32 %v9986_v11, %v5113_v58  ;;  %v11110_v47 = vld [vmem:[#allocation47_spill] sm:$0xff] }
 0x327   : > { %v6036_v9 = vadd.f32 %v10041_v59, %v5997_v38  ;;  %v5995_v36 = vadd.f32 %v5868_v51, %v5599_v44 }
 0x328   : > { %v7198_v33 = vpop.f32.mrf.mxu1 }
 0x329   : > { %v6068_v60 = vmul.f32 0.1, %v6036_v9  ;;  %v6034_v18 = vadd.f32 %v10041_v59, %v5995_v36  ;;  %v5998_v16 = vadd.f32 %v7198_v33, %v5602_v26 }
 0x32a   : > { %v5871_v48 = vpop.f32.mrf.mxu1 }
 0x32b   : > { %v6100_v8 = vmax.f32 %v6036_v9, %v6068_v60  ;;  %v6066_v5 = vmul.f32 0.1, %v6034_v18  ;;  %v6037_v45 = vadd.f32 %v10041_v59, %v5998_v16  ;;  %v5996_v1 = vadd.f32 %v5871_v48, %v5600_v27 }
 0x32c   : > { %v7201_v10 = vpop.f32.mrf.mxu1  ;;  %v5609_v27 = vadd.f32 %v9980_v19, %v5115_v37  ;;  %v4727_v19 = vadd.f32 %v9840_v2, %v9868_v3  ;;  %v5610_v2 = vadd.f32 %v9992_v57, %v5116_v12  ;;  %v10113_v3 = vpop.f32.mrf.mxu0  ;;  %v5608_v57 = vadd.f32 %v9998_v14, %v5114_v17  ;;  %v11118_v17 = vld [vmem:[#allocation52_spill] sm:$0xff] }
 0x32d   : > { %v6132_v24 = vadd.f32 %v7313_v22, %v6100_v8  ;;  %v6098_v38 = vmax.f32 %v6034_v18, %v6066_v5  ;;  %v6069_v44 = vmul.f32 0.1, %v6037_v45  ;;  %v6035_v32 = vadd.f32 %v10041_v59, %v5996_v1 }
 0x32e   : > { %v6001_v51 = vadd.f32 %v7201_v10, %v5605_v55  ;;  %v5884_v30 = vpop.f32.mrf.mxu1  ;;  %v5117_v34 = vadd.f32 %v9972_v28, %v4727_v19  ;;  %v11111_v28 = vld [vmem:[#allocation3_spill] sm:$0xff] }
 0x32f   : > { %6164 = vst.msk [vmem:[%s10064_s11 + $0x10] sm:$0xff] %vm11102_vm15, %v6132_v24  ;;  %v6130_v4 = vadd.f32 %v7314_v63, %v6098_v38  ;;  %v6101_v9 = vmax.f32 %v6037_v45, %v6069_v44  ;;  %v6067_v36 = vmul.f32 0.1, %v6035_v32  ;;  %v5999_v26 = vadd.f32 %v5884_v30, %v5603_v0  ;;  %v7318_v24 = vld [vmem:[%s7440_s12 + $0x20] sm:$0xff]  ;;  %v7319_v63 = vld [vmem:[%s7440_s12 + $0x38] sm:$0xff]  ;;  %v7321_v19 = vld [vmem:[%s7440_s12 + $0x50] sm:$0xff] }
 0x330   : > { %v6040_v7 = vadd.f32 %v10041_v59, %v6001_v51  ;;  %v7202_v23 = vpop.f32.mrf.mxu1  ;;  %v5119_v0 = vadd.f32 %v9970_v42, %v4729_v52  ;;  %v11106_v42 = vld [vmem:[#allocation5_spill] sm:$0xff]  ;;  %v11107_v51 = vld [vmem:[#allocation14_spill] sm:$0xff]  ;;  %v4728_v35 = vadd.f32 %v11111_v28, %v11110_v47  ;;  %v5611_v52 = vadd.f32 %v11118_v17, %v5117_v34  ;;  %vm11157_vm15 = vmmov %vm11125_vm0 }
 0x331   : > { %6162 = vst.msk [vmem:[%s10064_s11] sm:$0xff] %vm11103_vm1, %v6130_v4  ;;  %v6133_v33 = vadd.f32 %v7315_v50, %v6101_v9  ;;  %v6099_v60 = vmax.f32 %v6035_v32, %v6067_v36  ;;  %v6038_v18 = vadd.f32 %v10041_v59, %v5999_v26  ;;  %v6002_v16 = vadd.f32 %v7202_v23, %v5606_v53  ;;  %v11113_v23 = vld [vmem:[#allocation10_spill] sm:$0xff]  ;;  %vm11160_vm1 = vmmov %vm11125_vm0 }
 0x332   : > { %v6072_v13 = vmul.f32 0.1, %v6040_v7  ;;  %v5887_v21 = vpop.f32.mrf.mxu1  ;;  %v4730_v30 = vadd.f32 %v11107_v51, %v11106_v42  ;;  %v11126_v51 = vld [vmem:[#allocation6_spill] sm:$0xff] }
 0x333   : > { %6165 = vst.msk [vmem:[%s10064_s11 + $0x18] sm:$0xff] %vm11104_vm7, %v6133_v33  ;;  %v6131_v6 = vadd.f32 %v7316_v20, %v6099_v60  ;;  %v6070_v48 = vmul.f32 0.1, %v6038_v18  ;;  %v6041_v8 = vadd.f32 %v10041_v59, %v6002_v16  ;;  %v6000_v5 = vadd.f32 %v5887_v21, %v5604_v62  ;;  %v11114_v60 = vld [vmem:[#allocation49_spill] sm:$0xff]  ;;  %vm11166_vm7 = vmmov %vm11125_vm0 }
 0x334   : > { %v6104_v45 = vmax.f32 %v6040_v7, %v6072_v13  ;;  %v7205_v1 = vpop.f32.mrf.mxu1  ;;  %v11112_v7 = vld [vmem:[#allocation19_spill] sm:$0xff]  ;;  %v5613_v14 = vadd.f32 %v11114_v60, %v5119_v0  ;;  %v7320_v16 = vld [vmem:[%s7440_s12 + $0x28] sm:$0xff] }
 0x335   : > { %6163 = vst.msk [vmem:[%s10064_s11 + $0x8] sm:$0xff] %vm11105_vm14, %v6131_v6  ;;  %v6102_v54 = vmax.f32 %v6038_v18, %v6070_v48  ;;  %v6073_v56 = vmul.f32 0.1, %v6041_v8  ;;  %v6039_v55 = vadd.f32 %v10041_v59, %v6000_v5  ;;  %v6005_v10 = vadd.f32 %v7205_v1, %v5609_v27  ;;  %v10132_v18 = vpop.f32.mrf.mxu0  ;;  %v11116_v27 = vld [vmem:[#allocation31_spill] sm:$0xff]  ;;  %v11117_v6 = vld [vmem:[#allocation13_spill] sm:$0xff]  ;;  %vm11171_vm14 = vmmov %vm11125_vm0 }
 0x336   : > { %v6136_v22 = vadd.f32 %v7317_v46, %v6104_v45  ;;  %v5900_v15 = vpop.f32.mrf.mxu1  ;;  %v4733_v62 = vadd.f32 %v11113_v23, %v11112_v7  ;;  %v5120_v20 = vadd.f32 %v11116_v27, %v4730_v30  ;;  %v5118_v48 = vadd.f32 %v11117_v6, %v4728_v35  ;;  %v11121_v0 = vld [vmem:[#allocation17_spill] sm:$0xff]  ;;  %v11122_v46 = vld [vmem:[#allocation15_spill] sm:$0xff]  ;;  %v11128_v7 = vld [vmem:[#allocation36_spill] sm:$0xff] }
 0x337   : > { %v6134_v38 = vadd.f32 %v7318_v24, %v6102_v54  ;;  %v6105_v44 = vmax.f32 %v6041_v8, %v6073_v56  ;;  %v6071_v32 = vmul.f32 0.1, %v6039_v55  ;;  %v6044_v37 = vadd.f32 %v10041_v59, %v6005_v10  ;;  %v11134_v6 = vld [vmem:[#allocation16_spill] sm:$0xff] }
 0x338   : > { %6168 = vst.msk [vmem:[%s10064_s11 + $0x30] sm:$0xff] %vm11108_vm6, %v6136_v22  ;;  %v6003_v11 = vadd.f32 %v5900_v15, %v5607_v41  ;;  %v7206_v53 = vpop.f32.mrf.mxu1  ;;  %v4731_v22 = vadd.f32 %v11122_v46, %v11121_v0  ;;  %v11123_v41 = vld [vmem:[#allocation20_spill] sm:$0xff]  ;;  %vm11172_vm6 = vmmov %vm11125_vm0 }
 0x339   : > { %6166 = vst.msk [vmem:[%s10064_s11 + $0x20] sm:$0xff] %vm11109_vm4, %v6134_v38  ;;  %v6137_v4 = vadd.f32 %v7319_v63, %v6105_v44  ;;  %v6103_v9 = vmax.f32 %v6039_v55, %v6071_v32  ;;  %v6076_v36 = vmul.f32 0.1, %v6044_v37  ;;  %v6006_v26 = vadd.f32 %v7206_v53, %v5610_v2  ;;  %v11120_v55 = vld [vmem:[#allocation9_spill] sm:$0xff]  ;;  %v11124_v15 = vld [vmem:[#allocation4_spill] sm:$0xff]  ;;  %v10150_v44 = vpop.f32.mrf.mxu0  ;;  %vm11177_vm4 = vmmov %vm11125_vm0 }
 0x33a   : > { %v6042_v50 = vadd.f32 %v10041_v59, %v6003_v11  ;;  %v5903_v33 = vpop.f32.mrf.mxu1  ;;  %v5123_v10 = vadd.f32 %v11120_v55, %v4733_v62  ;;  %v4734_v2 = vadd.f32 %v11124_v15, %v11123_v41  ;;  %v5121_v30 = vadd.f32 %v11126_v51, %v4731_v22  ;;  %v7322_v11 = vld [vmem:[%s7440_s12 + $0x40] sm:$0xff] }
 0x33b   : > { %6169 = vst.msk [vmem:[%s10064_s11 + $0x38] sm:$0xff] %vm11115_vm5, %v6137_v4  ;;  %v6135_v58 = vadd.f32 %v7320_v16, %v6103_v9  ;;  %v6108_v12 = vmax.f32 %v6044_v37, %v6076_v36  ;;  %v6045_v13 = vadd.f32 %v10041_v59, %v6006_v26  ;;  %v6004_v21 = vadd.f32 %v5903_v33, %v5608_v57  ;;  %v11127_v57 = vld [vmem:[#allocation55_spill] sm:$0xff]  ;;  %v11129_v62 = vld [vmem:[#allocation48_spill] sm:$0xff]  ;;  %vm11178_vm5 = vmmov %vm11125_vm0 }
 0x33c   : > { %v6074_v8 = vmul.f32 0.1, %v6042_v50  ;;  %v7209_v5 = vpop.f32.mrf.mxu1  ;;  %v5614_v63 = vadd.f32 %v11127_v57, %v5120_v20  ;;  %v5612_v9 = vadd.f32 %v10026_v31, %v5118_v48  ;;  %v7323_v36 = vld [vmem:[%s7440_s12 + $0x58] sm:$0xff]  ;;  %v5124_v23 = vadd.f32 %v11128_v7, %v4734_v2  ;;  %v10167_v31 = vpop.f32.mrf.mxu0  ;;  %v11144_v57 = vld [vmem:[#allocation21_spill] sm:$0xff] }
 0x33d   : > { %6167 = vst.msk [vmem:[%s10064_s11 + $0x28] sm:$0xff] %vm11119_vm12, %v6135_v58  ;;  %v6140_v45 = vadd.f32 %v7321_v19, %v6108_v12  ;;  %v6077_v1 = vmul.f32 0.1, %v6045_v13  ;;  %v6043_v54 = vadd.f32 %v10041_v59, %v6004_v21  ;;  %v6009_v56 = vadd.f32 %v7209_v5, %v5613_v14  ;;  %v7324_v58 = vld [vmem:[%s7440_s12 + $0x48] sm:$0xff]  ;;  %v11133_v20 = vld [vmem:[#allocation39_spill] sm:$0xff]  ;;  %v11139_v46 = vld [vmem:[#allocation12_spill] sm:$0xff] }
 0x33e   : > { %v6106_v24 = vmax.f32 %v6042_v50, %v6074_v8  ;;  %v5916_v38 = vpop.f32.mrf.mxu1  ;;  %v11130_v50 = vld [vmem:[#allocation45_spill] sm:$0xff]  ;;  %v5617_v16 = vadd.f32 %v10036_v43, %v5123_v10  ;;  %v4737_v48 = vadd.f32 %v11134_v6, %v11133_v20  ;;  %v11135_v8 = vld [vmem:[#allocation42_spill] sm:$0xff]  ;;  %v5615_v19 = vadd.f32 %v10047_v61, %v5121_v30  ;;  %v11138_v10 = vld [vmem:[#allocation11_spill] sm:$0xff] }
 0x33f   : > { %6172 = vst.msk [vmem:[%s10064_s11 + $0x50] sm:$0xff] %vm11125_vm0, %v6140_v45  ;;  %v6109_v32 = vmax.f32 %v6045_v13, %v6077_v1  ;;  %v6075_v37 = vmul.f32 0.1, %v6043_v54  ;;  %v6048_v34 = vadd.f32 %v10041_v59, %v6009_v56  ;;  %v6007_v42 = vadd.f32 %v5916_v38, %v5611_v52  ;;  %v11136_v5 = vld [vmem:[#allocation46_spill] sm:$0xff]  ;;  %v7326_v61 = vld [vmem:[%s7440_s12 + $0x60] sm:$0xff]  ;;  %vm11180_vm12 = vmmov %vm11125_vm0 }
 0x340   : > { %v6138_v53 = vadd.f32 %v7322_v11, %v6106_v24  ;;  %v7210_v4 = vpop.f32.mrf.mxu1  ;;  %v4732_v33 = vadd.f32 %v11130_v50, %v11129_v62  ;;  %v4735_v17 = vadd.f32 %v11136_v5, %v11135_v8  ;;  %v7325_v45 = vld [vmem:[%s7440_s12 + $0x70] sm:$0xff]  ;;  %v5127_v22 = vadd.f32 %v11139_v46, %v4737_v48  ;;  %v10185_v24 = vpop.f32.mrf.mxu0  ;;  %v11142_v30 = vld [vmem:[#allocation29_spill] sm:$0xff] }
 0x341   : > { %v6141_v26 = vadd.f32 %v7323_v36, %v6109_v32  ;;  %v6107_v47 = vmax.f32 %v6043_v54, %v6075_v37  ;;  %v6080_v28 = vmul.f32 0.1, %v6048_v34  ;;  %v6046_v35 = vadd.f32 %v10041_v59, %v6007_v42  ;;  %v11141_v42 = vld [vmem:[#allocation44_spill] sm:$0xff]  ;;  %v11143_v11 = vld [vmem:[#allocation43_spill] sm:$0xff]  ;;  %v11149_v6 = vld [vmem:[#allocation34_spill] sm:$0xff] }
 0x342   : > { %6170 = vst.msk [vmem:[%s10064_s11 + $0x40] sm:$0xff] %vm11131_vm10, %v6138_v53  ;;  %v6010_v60 = vadd.f32 %v7210_v4, %v5614_v63  ;;  %v5919_v14 = vpop.f32.mrf.mxu1  ;;  %v5122_v0 = vadd.f32 %v11138_v10, %v4732_v33  ;;  %v5618_v2 = vadd.f32 %v10057_v40, %v5124_v23  ;;  %v5125_v51 = vadd.f32 %v11141_v42, %v4735_v17  ;;  %v11145_v63 = vld [vmem:[#allocation22_spill] sm:$0xff]  ;;  %v7327_v23 = vld [vmem:[%s7440_s12 + $0x78] sm:$0xff]  ;;  %vm11181_vm10 = vmmov %vm11125_vm0 }
 0x343   : > { %6173 = vst.msk [vmem:[%s10064_s11 + $0x58] sm:$0xff] %vm11132_vm13, %v6141_v26  ;;  %v6139_v12 = vadd.f32 %v7324_v58, %v6107_v47  ;;  %v6112_v13 = vmax.f32 %v6048_v34, %v6080_v28  ;;  %v6078_v21 = vmul.f32 0.1, %v6046_v35  ;;  %v6008_v27 = vadd.f32 %v5919_v14, %v5612_v9  ;;  %v10203_v14 = vpop.f32.mrf.mxu0  ;;  %v11150_v48 = vld [vmem:[#allocation38_spill] sm:$0xff]  ;;  %v11156_v10 = vld [vmem:[#allocation40_spill] sm:$0xff]  ;;  %v11159_v42 = vld [vmem:[#allocation51_spill] sm:$0xff] }
 0x344   : > { %v6049_v52 = vadd.f32 %v10041_v59, %v6010_v60  ;;  %v7213_v43 = vpop.f32.mrf.mxu1  ;;  %v4738_v53 = vadd.f32 %v11143_v11, %v11142_v30  ;;  %v4736_v40 = vadd.f32 %v11145_v63, %v11144_v57  ;;  %v5616_v50 = vadd.f32 %v10077_v49, %v5122_v0  ;;  %v7329_v17 = vld [vmem:[%s7440_s12 + $0x90] sm:$0xff]  ;;  %vm11182_vm13 = vmmov %vm11125_vm0 }
 0x345   : > { %6171 = vst.msk [vmem:[%s10064_s11 + $0x48] sm:$0xff] %vm11137_vm3, %v6139_v12  ;;  %v6144_v1 = vadd.f32 %v7325_v45, %v6112_v13  ;;  %v6110_v54 = vmax.f32 %v6046_v35, %v6078_v21  ;;  %v6047_v56 = vadd.f32 %v10041_v59, %v6008_v27  ;;  %v6013_v55 = vadd.f32 %v7213_v43, %v5617_v16  ;;  %v11147_v35 = vld [vmem:[#allocation18_spill] sm:$0xff]  ;;  %v11148_v27 = vld [vmem:[#allocation23_spill] sm:$0xff]  ;;  %vm11183_vm3 = vmmov %vm11125_vm0 }
 0x346   : > { %v6081_v41 = vmul.f32 0.1, %v6049_v52  ;;  %v5932_v15 = vpop.f32.mrf.mxu1  ;;  %v5128_v7 = vadd.f32 %v11147_v35, %v4738_v53  ;;  %v5621_v60 = vadd.f32 %v10095_v39, %v5127_v22  ;;  %v7328_v16 = vld [vmem:[%s7440_s12 + $0x68] sm:$0xff]  ;;  %v5126_v20 = vadd.f32 %v11148_v27, %v4736_v40  ;;  %v11164_v35 = vld [vmem:[#allocation28_spill] sm:$0xff] }
 0x347   : > { %6176 = vst.msk [vmem:[%s10064_s11 + $0x70] sm:$0xff] %vm11140_vm8, %v6144_v1  ;;  %v6142_v38 = vadd.f32 %v7326_v61, %v6110_v54  ;;  %v6079_v32 = vmul.f32 0.1, %v6047_v56  ;;  %v6052_v37 = vadd.f32 %v10041_v59, %v6013_v55  ;;  %v6011_v34 = vadd.f32 %v5932_v15, %v5615_v19  ;;  %v11153_v1 = vld [vmem:[#allocation33_spill] sm:$0xff]  ;;  %v11155_v55 = vld [vmem:[#allocation24_spill] sm:$0xff]  ;;  %vm11184_vm8 = vmmov %vm11125_vm0 }
 0x348   : > { %v6113_v4 = vmax.f32 %v6049_v52, %v6081_v41  ;;  %v7214_v9 = vpop.f32.mrf.mxu1  ;;  %v4741_v8 = vadd.f32 %v11150_v48, %v11149_v6  ;;  %v5619_v39 = vadd.f32 %v10113_v3, %v5125_v51  ;;  %v11154_v54 = vld [vmem:[#allocation37_spill] sm:$0xff]  ;;  %v4742_v0 = vadd.f32 %v11156_v10, %v11155_v55  ;;  %v5571_v41 = vpop.f32.mrf.mxu0 }
 0x349   : > { %6174 = vst.msk [vmem:[%s10064_s11 + $0x60] sm:$0xff] %vm11146_vm11, %v6142_v38  ;;  %v6111_v36 = vmax.f32 %v6047_v56, %v6079_v32  ;;  %v6084_v26 = vmul.f32 0.1, %v6052_v37  ;;  %v6050_v47 = vadd.f32 %v10041_v59, %v6011_v34  ;;  %v6014_v28 = vadd.f32 %v7214_v9, %v5618_v2  ;;  %v7330_v15 = vld [vmem:[%s7440_s12 + $0x80] sm:$0xff]  ;;  %vm11185_vm11 = vmmov %vm11125_vm0 }
 0x34a   : > { %v6145_v62 = vadd.f32 %v7327_v23, %v6113_v4  ;;  %v5935_v33 = vpop.f32.mrf.mxu1  ;;  %v4739_v56 = vadd.f32 %v11154_v54, %v11153_v1  ;;  %v5622_v3 = vadd.f32 %v10132_v18, %v5128_v7  ;;  %v5620_v53 = vadd.f32 %v10150_v44, %v5126_v20  ;;  %v7331_v18 = vld [vmem:[%s7440_s12 + $0x98] sm:$0xff]  ;;  %v11161_v9 = vld [vmem:[#allocation53_spill] sm:$0xff]  ;;  %v11165_v7 = vld [vmem:[#allocation30_spill] sm:$0xff] }
 0x34b   : > { %v6143_v58 = vadd.f32 %v7328_v16, %v6111_v36  ;;  %v6116_v12 = vmax.f32 %v6052_v37, %v6084_v26  ;;  %v6082_v13 = vmul.f32 0.1, %v6050_v47  ;;  %v6053_v21 = vadd.f32 %v10041_v59, %v6014_v28  ;;  %v11158_v37 = vld [vmem:[#allocation50_spill] sm:$0xff]  ;;  %v7334_v55 = vld [vmem:[%s7440_s12 + $0xa0] sm:$0xff] }
 0x34c   : > { %6177 = vst.msk [vmem:[%s10064_s11 + $0x78] sm:$0xff] %vm11151_vm2, %v6145_v62  ;;  %v6012_v49 = vadd.f32 %v5935_v33, %v5616_v50  ;;  %v7217_v5 = vpop.f32.mrf.mxu1  ;;  %v5131_v34 = vadd.f32 %v11158_v37, %v4741_v8  ;;  %v5129_v51 = vadd.f32 %v11159_v42, %v4739_v56  ;;  %v5132_v36 = vadd.f32 %v11161_v9, %v4742_v0  ;;  %v11162_v26 = vld [vmem:[#allocation26_spill] sm:$0xff]  ;;  %v7191_v50 = vpop.f32.mrf.mxu0  ;;  %v7335_v42 = vld [vmem:[%s7440_s12 + $0xb8] sm:$0xff]  ;;  %vm11186_vm2 = vmmov %vm11125_vm0 }
 0x34d   : > { %6175 = vst.msk [vmem:[%s10064_s11 + $0x68] sm:$0xff] %vm11152_vm9, %v6143_v58  ;;  %v6148_v52 = vadd.f32 %v7329_v17, %v6116_v12  ;;  %v6114_v43 = vmax.f32 %v6050_v47, %v6082_v13  ;;  %v6085_v19 = vmul.f32 0.1, %v6053_v21  ;;  %v6017_v45 = vadd.f32 %v7217_v5, %v5621_v60  ;;  %v11163_v47 = vld [vmem:[#allocation41_spill] sm:$0xff]  ;;  %v11167_v12 = vld [vmem:[#allocation54_spill] sm:$0xff]  ;;  %vm11187_vm9 = vmmov %vm11125_vm0 }
 0x34e   : > { %v6051_v46 = vadd.f32 %v10041_v59, %v6012_v49  ;;  %v5948_v22 = vpop.f32.mrf.mxu1  ;;  %v4740_v28 = vadd.f32 %v11163_v47, %v11162_v26  ;;  %v4745_v23 = vadd.f32 %v11165_v7, %v11164_v35  ;;  %v5625_v20 = vadd.f32 %v10167_v31, %v5131_v34  ;;  %v7333_v8 = vld [vmem:[%s7440_s12 + $0xb0] sm:$0xff]  ;;  %v11179_v35 = vld [vmem:[#allocation57_spill] sm:$0xff] }
 0x34f   : > { %6180 = vst.msk [vmem:[%s10064_s11 + $0x90] sm:$0xff] %vm11157_vm15, %v6148_v52  ;;  %v6146_v2 = vadd.f32 %v7330_v15, %v6114_v43  ;;  %v6117_v61 = vmax.f32 %v6053_v21, %v6085_v19  ;;  %v6056_v38 = vadd.f32 %v10041_v59, %v6017_v45  ;;  %v6015_v32 = vadd.f32 %v5948_v22, %v5619_v39  ;;  %v7332_v21 = vld [vmem:[%s7440_s12 + $0x88] sm:$0xff]  ;;  %v11168_v52 = vld [vmem:[#allocation56_spill] sm:$0xff]  ;;  %v11169_v19 = vld [vmem:[#allocation7_spill] sm:$0xff] }
 0x350   : > { %v6083_v30 = vmul.f32 0.1, %v6051_v46  ;;  %v7218_v11 = vpop.f32.mrf.mxu1  ;;  %v5130_v13 = vadd.f32 %v11167_v12, %v4740_v28  ;;  %v5623_v48 = vadd.f32 %v10185_v24, %v5129_v51  ;;  %v5135_v43 = vadd.f32 %v11168_v52, %v4745_v23  ;;  %v11170_v45 = vld [vmem:[#allocation8_spill] sm:$0xff]  ;;  %v5584_v24 = vpop.f32.mrf.mxu0  ;;  %v11174_v15 = vld [vmem:[#allocation25_spill] sm:$0xff] }
 0x351   : > { %6178 = vst.msk [vmem:[%s10064_s11 + $0x80] sm:$0xff] %vm11160_vm1, %v6146_v2  ;;  %v6149_v57 = vadd.f32 %v7331_v18, %v6117_v61  ;;  %v6088_v63 = vmul.f32 0.1, %v6056_v38  ;;  %v6054_v40 = vadd.f32 %v10041_v59, %v6015_v32  ;;  %v6018_v4 = vadd.f32 %v7218_v11, %v5622_v3  ;;  %v11173_v3 = vld [vmem:[#allocation32_spill] sm:$0xff]  ;;  %v11175_v61 = vld [vmem:[#allocation35_spill] sm:$0xff] }
 0x352   : > { %v6115_v62 = vmax.f32 %v6051_v46, %v6083_v30  ;;  %v5951_v44 = vpop.f32.mrf.mxu1  ;;  %v4743_v1 = vadd.f32 %v11170_v45, %v11169_v19  ;;  %v5626_v56 = vadd.f32 %v10203_v14, %v5132_v36  ;;  %v4746_v2 = vadd.f32 %v11174_v15, %v11173_v3  ;;  %v7192_v9 = vpop.f32.mrf.mxu0 }
 0x353   : > { %6181 = vst.msk [vmem:[%s10064_s11 + $0x98] sm:$0xff] %vm11166_vm7, %v6149_v57  ;;  %v6120_v33 = vmax.f32 %v6056_v38, %v6088_v63  ;;  %v6086_v60 = vmul.f32 0.1, %v6054_v40  ;;  %v6057_v16 = vadd.f32 %v10041_v59, %v6018_v4  ;;  %v6016_v58 = vadd.f32 %v5951_v44, %v5620_v53  ;;  %v11176_v38 = vld [vmem:[#allocation27_spill] sm:$0xff] }
 0x354   : > { %v6147_v27 = vadd.f32 %v7332_v21, %v6115_v62  ;;  %v7221_v6 = vpop.f32.mrf.mxu1  ;;  %v4744_v32 = vadd.f32 %v11176_v38, %v11175_v61  ;;  %v5624_v14 = vadd.f32 %v5571_v41, %v5130_v13  ;;  %v5133_v18 = vadd.f32 %v10022_v29, %v4743_v1  ;;  %v7336_v41 = vld [vmem:[%s7440_s12 + $0xa8] sm:$0xff]  ;;  %v5587_v13 = vpop.f32.mrf.mxu0  ;;  %v7338_v21 = vld [vmem:[%s7440_s12 + $0xc0] sm:$0xff] }
 0x355   : > { %v6152_v49 = vadd.f32 %v7333_v8, %v6120_v33  ;;  %v6118_v5 = vmax.f32 %v6054_v40, %v6086_v60  ;;  %v6089_v39 = vmul.f32 0.1, %v6057_v16  ;;  %v6055_v17 = vadd.f32 %v10041_v59, %v6016_v58  ;;  %v7337_v33 = vld [vmem:[%s7440_s12 + $0xd0] sm:$0xff]  ;;  %v7342_v38 = vld [vmem:[%s7440_s12 + $0xe0] sm:$0xff] }
 0x356   : > { %6179 = vst.msk [vmem:[%s10064_s11 + $0x88] sm:$0xff] %vm11171_vm14, %v6147_v27  ;;  %v6021_v54 = vadd.f32 %v7221_v6, %v5625_v20  ;;  %v5964_v31 = vpop.f32.mrf.mxu1  ;;  %v5136_v57 = vadd.f32 %v10028_v25, %v4746_v2  ;;  %v5629_v4 = vadd.f32 %v7191_v50, %v5135_v43  ;;  %v5134_v7 = vadd.f32 %v11179_v35, %v4744_v32 }
 0x357   : > { %6184 = vst.msk [vmem:[%s10064_s11 + $0xb0] sm:$0xff] %vm11172_vm6, %v6152_v49  ;;  %v6150_v10 = vadd.f32 %v7334_v55, %v6118_v5  ;;  %v6121_v0 = vmax.f32 %v6057_v16, %v6089_v39  ;;  %v6087_v46 = vmul.f32 0.1, %v6055_v17  ;;  %v6019_v22 = vadd.f32 %v5964_v31, %v5623_v48  ;;  %v7339_v39 = vld [vmem:[%s7440_s12 + $0xd8] sm:$0xff] }
 0x358   : > { %v6060_v37 = vadd.f32 %v10041_v59, %v6021_v54  ;;  %v7222_v34 = vpop.f32.mrf.mxu1  ;;  %v5627_v16 = vadd.f32 %v5584_v24, %v5133_v18  ;;  %v5630_v12 = vadd.f32 %v7192_v9, %v5136_v57  ;;  %v5628_v5 = vadd.f32 %v5587_v13, %v5134_v7  ;;  %v7340_v54 = vld [vmem:[%s7440_s12 + $0xc8] sm:$0xff] }
 0x359   : > { %6182 = vst.msk [vmem:[%s10064_s11 + $0xa0] sm:$0xff] %vm11177_vm4, %v6150_v10  ;;  %v6153_v51 = vadd.f32 %v7335_v42, %v6121_v0  ;;  %v6119_v30 = vmax.f32 %v6055_v17, %v6087_v46  ;;  %v6058_v11 = vadd.f32 %v10041_v59, %v6019_v22  ;;  %v6022_v53 = vadd.f32 %v7222_v34, %v5626_v56  ;;  %v7341_v0 = vld [vmem:[%s7440_s12 + $0xf0] sm:$0xff]  ;;  %v7344_v42 = vld [vmem:[%s7440_s12 + $0xe8] sm:$0xff] }
 0x35a   : > { %v6092_v63 = vmul.f32 0.1, %v6060_v37  ;;  %v5967_v40 = vpop.f32.mrf.mxu1 }
 0x35b   : > { %6185 = vst.msk [vmem:[%s10064_s11 + $0xb8] sm:$0xff] %vm11178_vm5, %v6153_v51  ;;  %v6151_v36 = vadd.f32 %v7336_v41, %v6119_v30  ;;  %v6090_v26 = vmul.f32 0.1, %v6058_v11  ;;  %v6061_v47 = vadd.f32 %v10041_v59, %v6022_v53  ;;  %v6020_v28 = vadd.f32 %v5967_v40, %v5624_v14 }
 0x35c   : > { %v6124_v23 = vmax.f32 %v6060_v37, %v6092_v63  ;;  %v7225_v29 = vpop.f32.mrf.mxu1  ;;  %v7343_v37 = vld [vmem:[%s7440_s12 + $0xf8] sm:$0xff] }
 0x35d   : > { %6183 = vst.msk [vmem:[%s10064_s11 + $0xa8] sm:$0xff] %vm11180_vm12, %v6151_v36  ;;  %v6122_v25 = vmax.f32 %v6058_v11, %v6090_v26  ;;  %v6093_v62 = vmul.f32 0.1, %v6061_v47  ;;  %v6059_v44 = vadd.f32 %v10041_v59, %v6020_v28  ;;  %v6025_v50 = vadd.f32 %v7225_v29, %v5629_v4 }
 0x35e   : > { %v6156_v60 = vadd.f32 %v7337_v33, %v6124_v23  ;;  %v5980_v58 = vpop.f32.mrf.mxu1 }
 0x35f   : > { %v6154_v27 = vadd.f32 %v7338_v21, %v6122_v25  ;;  %v6125_v20 = vmax.f32 %v6061_v47, %v6093_v62  ;;  %v6091_v6 = vmul.f32 0.1, %v6059_v44  ;;  %v6064_v48 = vadd.f32 %v10041_v59, %v6025_v50 }
 0x360   : > { %6188 = vst.msk [vmem:[%s10064_s11 + $0xd0] sm:$0xff] %vm11125_vm0, %v6156_v60  ;;  %v6023_v8 = vadd.f32 %v5980_v58, %v5627_v16  ;;  %v7226_v49 = vpop.f32.mrf.mxu1 }
 0x361   : > { %6186 = vst.msk [vmem:[%s10064_s11 + $0xc0] sm:$0xff] %vm11181_vm10, %v6154_v27  ;;  %v6157_v17 = vadd.f32 %v7339_v39, %v6125_v20  ;;  %v6123_v52 = vmax.f32 %v6059_v44, %v6091_v6  ;;  %v6096_v43 = vmul.f32 0.1, %v6064_v48  ;;  %v6026_v19 = vadd.f32 %v7226_v49, %v5630_v12 }
 0x362   : > { %v6062_v45 = vadd.f32 %v10041_v59, %v6023_v8  ;;  %v5983_v1 = vpop.f32.mrf.mxu1 }
 0x363   : > { %6189 = vst.msk [vmem:[%s10064_s11 + $0xd8] sm:$0xff] %vm11182_vm13, %v6157_v17  ;;  %v6155_v31 = vadd.f32 %v7340_v54, %v6123_v52  ;;  %v6128_v56 = vmax.f32 %v6064_v48, %v6096_v43  ;;  %v6065_v24 = vadd.f32 %v10041_v59, %v6026_v19  ;;  %v6024_v55 = vadd.f32 %v5983_v1, %v5628_v5 }
 0x364   : > { %v6094_v10 = vmul.f32 0.1, %v6062_v45 }
 0x365   : > { %6187 = vst.msk [vmem:[%s10064_s11 + $0xc8] sm:$0xff] %vm11183_vm3, %v6155_v31  ;;  %v6160_v46 = vadd.f32 %v7341_v0, %v6128_v56  ;;  %v6097_v22 = vmul.f32 0.1, %v6065_v24  ;;  %v6063_v3 = vadd.f32 %v10041_v59, %v6024_v55 }
 0x366   : > { %v6126_v15 = vmax.f32 %v6062_v45, %v6094_v10 }
 0x367   : > { %6192 = vst.msk [vmem:[%s10064_s11 + $0xf0] sm:$0xff] %vm11184_vm8, %v6160_v46  ;;  %v6129_v2 = vmax.f32 %v6065_v24, %v6097_v22  ;;  %v6095_v61 = vmul.f32 0.1, %v6063_v3 }
 0x368   : > { %v6158_v32 = vadd.f32 %v7342_v38, %v6126_v15 }
 0x369   : > { %v6161_v34 = vadd.f32 %v7343_v37, %v6129_v2  ;;  %v6127_v14 = vmax.f32 %v6063_v3, %v6095_v61 }
 0x36a   : > { %6190 = vst.msk [vmem:[%s10064_s11 + $0xe0] sm:$0xff] %vm11185_vm11, %v6158_v32 }
 0x36b   : > { %6193 = vst.msk [vmem:[%s10064_s11 + $0xf8] sm:$0xff] %vm11186_vm2, %v6161_v34  ;;  %v6159_v51 = vadd.f32 %v7344_v42, %v6127_v14 }
 0x36d   : > { %6191 = vst.msk [vmem:[%s10064_s11 + $0xe8] sm:$0xff] %vm11187_vm9, %v6159_v51 }
 0x36e PF: > { %s17_s26 = sadd.s32 1, %s7367_s26   ;;  %s11188_s24 = smov %s7363_s25 }
 0x36f   : > { %p14_p6 = scmp.ge.s32.totalorder %s17_s26, 4   ;;  %s11189_s25 = smov %s11191_s27 }
 0x371   :  { %16 = sbr.rel (!%p14_p6) target bundleno = 2 (0x2), region = 92 }

</bundles_post_ra>
